<compile_context>
chip_gen: v5e
topology: v5e:2x2
jax: 0.10.0
libtpu: 0.0.40
codegen_flags: <defaults>
</compile_context>

<pallas_src>
import functools

import jax
import jax.numpy as jnp
from jax.experimental import pallas as pl
from jax.experimental.pallas import tpu as pltpu

# ---------------- model hyper-parameters (module defaults, small demo sizes) ----
VOCAB = 100
D_MODEL = 256          # embedding_dim
N_HEADS = 8
N_LAYERS = 4
HIDDEN = 512           # dim_feedforward == hidden_dim
OUT_DIM = 2
MAX_LEN = 128
PAD_IDX = 1


# ---------------- shared in-kernel helpers -------------------------------------
def _layernorm(x, g, b, eps=1e-5):
    # PyTorch nn.LayerNorm: biased variance, eps inside rsqrt. Stats in f32.
    mu = jnp.mean(x, axis=-1, keepdims=True)
    var = jnp.mean(jnp.square(x - mu), axis=-1, keepdims=True)
    return (x - mu) * jax.lax.rsqrt(var + eps) * g + b


# ---------------- fused encoder kernel ------------------------------------------
def fused_encoder_kernel(n_heads, n_layers,
                         x_ref, kbias_ref,
                         ln0g_ref, ln0b_ref,
                         wqkv_ref, bqkv_ref, wo_ref, bo_ref,
                         ln1g_ref, ln1b_ref, ln2g_ref, ln2b_ref,
                         w1_ref, b1_ref, w2_ref, b2_ref,
                         pooled_ref):
    Bt, S, D = x_ref.shape
    H = n_heads
    dh = D // H
    M = Bt * S

    # Key-padding additive bias, replicated per head ONCE (hoisted out of the
    # layer loop): (Bt, 1, S) -> (H*Bt, 1, S).
    kbias = kbias_ref[...]
    kbias_h = jnp.broadcast_to(kbias[None], (H, Bt, 1, S)).reshape(H * Bt, 1, S)

    # Initial LayerNorm; residual stream stays f32, packed as (Bt*S, D) so every
    # projection / FFN matmul sees M = Bt*S on the MXU.
    x0 = _layernorm(x_ref[...].reshape(M, D), ln0g_ref[...], ln0b_ref[...])

    def split_heads(t):                         # (Bt, S, D) -> (H*Bt, S, dh)
        return jnp.stack([t[:, :, h * dh:(h + 1) * dh] for h in range(H)],
                         axis=0).reshape(H * Bt, S, dh)

    def layer(l, x):
        # ---------- pre-norm multi-head self-attention ----------
        y = _layernorm(x, ln1g_ref[l], ln1b_ref[l])
        qkv = jnp.dot(y.astype(jnp.bfloat16), wqkv_ref[l],
                      preferred_element_type=jnp.float32) + bqkv_ref[l]   # (M, 3D) f32
        qkv = qkv.astype(jnp.bfloat16)          # single cast (review #5)
        # Q/K/V slices are 128-lane aligned (each D=256 wide).
        q = qkv[:, 0 * D:1 * D].reshape(Bt, S, D)
        k = qkv[:, 1 * D:2 * D].reshape(Bt, S, D)
        v = qkv[:, 2 * D:3 * D].reshape(Bt, S, D)

        # Head-batched attention (review #1): one score matmul, one softmax,
        # one PV matmul with leading batch dim H*Bt.  The 1/sqrt(dh) scale is
        # already folded into Wq/bq (review #2).
        qh, kh, vh = split_heads(q), split_heads(k), split_heads(v)
        s = jnp.einsum('bqd,bkd->bqk', qh, kh,
                       preferred_element_type=jnp.float32) + kbias_h
        m = jnp.max(s, axis=-1, keepdims=True)              # softmax stats in f32
        p = jnp.exp(s - m)
        p = p * pl.reciprocal(jnp.sum(p, axis=-1, keepdims=True), approx=True)
        ctx = jnp.einsum('bqk,bkd->bqd', p.astype(jnp.bfloat16), vh,
                         preferred_element_type=jnp.float32)  # (H*Bt, S, dh)
        ctx = ctx.reshape(H, Bt, S, dh)
        attn = jnp.concatenate([ctx[h] for h in range(H)], axis=-1).reshape(M, D)
        attn = jnp.dot(attn.astype(jnp.bfloat16), wo_ref[l],
                       preferred_element_type=jnp.float32) + bo_ref[l]
        x = x + attn                            # dropout = identity (eval)

        # ---------- pre-norm feed-forward (ReLU: PyTorch default) ----------
        z = _layernorm(x, ln2g_ref[l], ln2b_ref[l])
        ff = jnp.maximum(jnp.dot(z.astype(jnp.bfloat16), w1_ref[l],
                                 preferred_element_type=jnp.float32) + b1_ref[l], 0.0)
        x = x + jnp.dot(ff.astype(jnp.bfloat16), w2_ref[l],
                        preferred_element_type=jnp.float32) + b2_ref[l]
        return x

    # Dynamic layer loop bounds live ranges / shrinks the program (review #6).
    x = jax.lax.fori_loop(0, n_layers, layer, x0)

    # Mean pool over the sequence (all positions, exactly like the reference).
    pooled = jnp.mean(x.reshape(Bt, S, D), axis=1)           # (Bt, D)
    pooled_ref[...] = pooled.reshape(Bt, 1, D)


# ---------------- generation-aware tiling helpers --------------------------------
def _tpu_flavor():
    """(dual_core, vmem_limit_bytes) from the attached TPU generation."""
    kind = ""
    try:
        kind = jax.devices()[0].device_kind.lower()
    except Exception:
        pass
    dual_core = ("v7" in kind) or ("v4" in kind) or ("v5p" in kind)
    if "v7" in kind:
        vmem_limit = 48 * 1024 * 1024          # 64 MiB physical per TC on v7x
    elif ("v6" in kind) or ("v5e" in kind) or ("v5 lite" in kind):
        vmem_limit = 96 * 1024 * 1024          # 128 MiB physical, single TC
    else:
        vmem_limit = 32 * 1024 * 1024          # conservative default
    return dual_core, vmem_limit


def _choose_block_b(B, S, dual_core):
    """Sequences per grid step (packed matmul M dim is bb*S)."""
    max_m = 2048 if dual_core else 4096        # per-step activation row cap (VMEM)
    divs = [d for d in range(1, B + 1) if B % d == 0]
    fitting = [d for d in divs if d * S <= max_m] or divs[:1]
    if dual_core:
        # Force >=2 grid steps so the "parallel" batch axis feeds both
        # TensorCores (review #3); pick the biggest block that still does.
        multi = [d for d in fitting if B // d >= 2]
        if multi:
            return max(multi)
    # Single-core v5e/v6e: fewest steps / biggest packed M (review #4).
    return max(fitting)


def _resident_spec(arr):
    # Grid-invariant full-array weight block (fetched once, VMEM-resident).
    nd = arr.ndim
    return pl.BlockSpec(arr.shape, lambda i, _n=nd: (0,) * _n)


# ---------------- wrapper --------------------------------------------------------
def forward(params, text, attention_mask=None):
    B, S = text.shape
    D = params['embedding'].shape[1]
    lp, hp = params['layers'], params['head']
    n_layers = lp['wqkv'].shape[0]

    # Glue (not hot path): embedding gather + learned positional embedding.
    x = (params['embedding'][text] + params['pos_embedding'][:S][None, :, :]
         ).astype(jnp.float32)

    # src_key_padding_mask -> additive key bias (0 for valid token, -1e9 for pad).
    # Finite negative keeps fully-padded rows NaN-free; equivalent after softmax.
    if attention_mask is None:
        kbias = jnp.zeros((B, 1, S), jnp.float32)
    else:
        kbias = jnp.where(attention_mask == 0, -1e9, 0.0).astype(jnp.float32)[:, None, :]

    dual_core, vmem_limit = _tpu_flavor()
    bb = _choose_block_b(B, S, dual_core)

    weight_args = [params['ln_g'], params['ln_b'],
                   lp['wqkv'], lp['bqkv'], lp['wo'], lp['bo'],
                   lp['ln1_g'], lp['ln1_b'], lp['ln2_g'], lp['ln2_b'],
                   lp['w1'], lp['b1'], lp['w2'], lp['b2']]

    pooled = pl.pallas_call(
        functools.partial(fused_encoder_kernel, N_HEADS, n_layers),
        out_shape=jax.ShapeDtypeStruct((B, 1, D), jnp.float32),
        grid=(B // bb,),
        in_specs=[pl.BlockSpec((bb, S, D), lambda i: (i, 0, 0)),
                  pl.BlockSpec((bb, 1, S), lambda i: (i, 0, 0))]
                 + [_resident_spec(w) for w in weight_args],
        # 3-D pooled output keeps the lane dim at D=256 (unmasked vst) and frees
        # bb from the 8-sublane constraint, so dual-core chips can always split
        # the batch (reviews #3, #9).
        out_specs=pl.BlockSpec((bb, 1, D), lambda i: (i, 0, 0)),
        compiler_params=pltpu.CompilerParams(
            dimension_semantics=("parallel",),
            vmem_limit_bytes=vmem_limit),
    )(x, kbias, *weight_args)
    pooled = pooled[:, 0, :]                                   # (B, D)

    # Tiny classification head in plain JAX: exact erf GELU == F.gelu default;
    # dropout1/dropout2 are identity in eval mode.
    g = jax.nn.gelu(pooled @ hp['fc1_w'] + hp['fc1_b'], approximate=False)
    g = jax.nn.gelu(g @ hp['fc2_w'] + hp['fc2_b'], approximate=False)
    return g @ hp['fc3_w'] + hp['fc3_b']


# ---------------- parameters (deterministic synthetic init) --------------------
def init_params(key):
    keys = iter(jax.random.split(key, 64))

    def nrm(shape, scale=0.02):
        return jax.random.normal(next(keys), shape, dtype=jnp.float32) * scale

    emb = nrm((VOCAB, D_MODEL)).at[PAD_IDX].set(0.0)     # padding_idx row is zero
    pos = jnp.zeros((MAX_LEN, D_MODEL), jnp.float32)     # nn.Parameter(torch.zeros)

    dh = D_MODEL // N_HEADS
    q_scale = 1.0 / float(dh) ** 0.5

    def one_wqkv():
        wq, wk, wv = nrm((D_MODEL, D_MODEL)), nrm((D_MODEL, D_MODEL)), nrm((D_MODEL, D_MODEL))
        # Fold the 1/sqrt(dh) attention scale into the Q projection (review #2).
        # (A real checkpoint's Q bias must be scaled the same way; zero here.)
        return jnp.concatenate([wq * q_scale, wk, wv], axis=1)

    layers = dict(
        # Fused QKV weight, stored (in, out) so the kernel computes x @ W + b.
        wqkv=jnp.stack([one_wqkv() for _ in range(N_LAYERS)], axis=0).astype(jnp.bfloat16),
        bqkv=jnp.zeros((N_LAYERS, 1, 3 * D_MODEL), jnp.float32),
        wo=jnp.stack([nrm((D_MODEL, D_MODEL)) for _ in range(N_LAYERS)]).astype(jnp.bfloat16),
        bo=jnp.zeros((N_LAYERS, 1, D_MODEL), jnp.float32),
        ln1_g=jnp.ones((N_LAYERS, 1, D_MODEL), jnp.float32),
        ln1_b=jnp.zeros((N_LAYERS, 1, D_MODEL), jnp.float32),
        ln2_g=jnp.ones((N_LAYERS, 1, D_MODEL), jnp.float32),
        ln2_b=jnp.zeros((N_LAYERS, 1, D_MODEL), jnp.float32),
        w1=jnp.stack([nrm((D_MODEL, HIDDEN)) for _ in range(N_LAYERS)]).astype(jnp.bfloat16),
        b1=jnp.zeros((N_LAYERS, 1, HIDDEN), jnp.float32),
        w2=jnp.stack([nrm((HIDDEN, D_MODEL)) for _ in range(N_LAYERS)]).astype(jnp.bfloat16),
        b2=jnp.zeros((N_LAYERS, 1, D_MODEL), jnp.float32),
    )

    head = dict(   # classifier head runs in plain JAX (f32, exact erf GELU)
        fc1_w=nrm((D_MODEL, HIDDEN)), fc1_b=jnp.zeros((HIDDEN,), jnp.float32),
        fc2_w=nrm((HIDDEN, HIDDEN // 2)), fc2_b=jnp.zeros((HIDDEN // 2,), jnp.float32),
        fc3_w=nrm((HIDDEN // 2, OUT_DIM)), fc3_b=jnp.zeros((OUT_DIM,), jnp.float32),
    )

    return dict(embedding=emb, pos_embedding=pos,
                ln_g=jnp.ones((1, D_MODEL), jnp.float32),
                ln_b=jnp.zeros((1, D_MODEL), jnp.float32),
                layers=layers, head=head)


# ---------------- demo -----------------------------------------------------------
if __name__ == "__main__":
    root = jax.random.PRNGKey(0)
    pkey, tkey = jax.random.split(root)

    params = init_params(pkey)

    B, S = 2, 8
    text = jax.random.randint(tkey, (B, S), 0, VOCAB, dtype=jnp.int32)
    attention_mask = jnp.array([[1, 1, 1, 1, 1, 1, 1, 1],
                                [1, 1, 1, 1, 1, 1, 0, 0]], dtype=jnp.int32)

    logits = jax.jit(forward)(params, text, attention_mask)
    logits = jax.block_until_ready(logits)

    assert logits.shape == (B, OUT_DIM), logits.shape
    assert bool(jnp.all(jnp.isfinite(logits)))
    print("KERNEL_OK")
</pallas_src>

<mosaic_0001>
module attributes {stable_mosaic.version = 11 : i64} {
  func.func @fused_encoder_kernel(%arg0: i32, %arg1: memref<2x8x256xf32, #tpu.memory_space<vmem>>, %arg2: memref<2x1x8xf32, #tpu.memory_space<vmem>>, %arg3: memref<1x256xf32, #tpu.memory_space<vmem>>, %arg4: memref<1x256xf32, #tpu.memory_space<vmem>>, %arg5: memref<4x256x768xbf16, #tpu.memory_space<vmem>>, %arg6: memref<4x1x768xf32, #tpu.memory_space<vmem>>, %arg7: memref<4x256x256xbf16, #tpu.memory_space<vmem>>, %arg8: memref<4x1x256xf32, #tpu.memory_space<vmem>>, %arg9: memref<4x1x256xf32, #tpu.memory_space<vmem>>, %arg10: memref<4x1x256xf32, #tpu.memory_space<vmem>>, %arg11: memref<4x1x256xf32, #tpu.memory_space<vmem>>, %arg12: memref<4x1x256xf32, #tpu.memory_space<vmem>>, %arg13: memref<4x256x512xbf16, #tpu.memory_space<vmem>>, %arg14: memref<4x1x512xf32, #tpu.memory_space<vmem>>, %arg15: memref<4x512x256xbf16, #tpu.memory_space<vmem>>, %arg16: memref<4x1x256xf32, #tpu.memory_space<vmem>>, %arg17: memref<2x1x256xf32, #tpu.memory_space<vmem>>) attributes {dimension_semantics = [#tpu.dimension_semantics<parallel>], iteration_bounds = array<i64: 1>, scalar_prefetch = 0 : i64, scratch_operands = 0 : i64, tpu.core_type = #tpu.core_type<tc>, window_params = [{transform_indices = @transform_0, window_bounds = array<i64: 2, 8, 256>}, {transform_indices = @transform_1, window_bounds = array<i64: 2, 1, 8>}, {pipeline_mode = #tpu.pipeline_mode<synchronous>, transform_indices = @transform_2, window_bounds = array<i64: 1, 256>}, {pipeline_mode = #tpu.pipeline_mode<synchronous>, transform_indices = @transform_3, window_bounds = array<i64: 1, 256>}, {pipeline_mode = #tpu.pipeline_mode<synchronous>, transform_indices = @transform_4, window_bounds = array<i64: 4, 256, 768>}, {pipeline_mode = #tpu.pipeline_mode<synchronous>, transform_indices = @transform_5, window_bounds = array<i64: 4, 1, 768>}, {pipeline_mode = #tpu.pipeline_mode<synchronous>, transform_indices = @transform_6, window_bounds = array<i64: 4, 256, 256>}, {pipeline_mode = #tpu.pipeline_mode<synchronous>, transform_indices = @transform_7, window_bounds = array<i64: 4, 1, 256>}, {pipeline_mode = #tpu.pipeline_mode<synchronous>, transform_indices = @transform_8, window_bounds = array<i64: 4, 1, 256>}, {pipeline_mode = #tpu.pipeline_mode<synchronous>, transform_indices = @transform_9, window_bounds = array<i64: 4, 1, 256>}, {pipeline_mode = #tpu.pipeline_mode<synchronous>, transform_indices = @transform_10, window_bounds = array<i64: 4, 1, 256>}, {pipeline_mode = #tpu.pipeline_mode<synchronous>, transform_indices = @transform_11, window_bounds = array<i64: 4, 1, 256>}, {pipeline_mode = #tpu.pipeline_mode<synchronous>, transform_indices = @transform_12, window_bounds = array<i64: 4, 256, 512>}, {pipeline_mode = #tpu.pipeline_mode<synchronous>, transform_indices = @transform_13, window_bounds = array<i64: 4, 1, 512>}, {pipeline_mode = #tpu.pipeline_mode<synchronous>, transform_indices = @transform_14, window_bounds = array<i64: 4, 512, 256>}, {pipeline_mode = #tpu.pipeline_mode<synchronous>, transform_indices = @transform_15, window_bounds = array<i64: 4, 1, 256>}, {transform_indices = @transform_16, window_bounds = array<i64: 2, 1, 256>}]} {
    %c0 = arith.constant 0 : index
    %c0_0 = arith.constant 0 : index
    %c0_1 = arith.constant 0 : index
    %0 = vector.load %arg2[%c0, %c0_0, %c0_1] : memref<2x1x8xf32, #tpu.memory_space<vmem>>, vector<2x1x8xf32>
    %1 = vector.shape_cast %0 : vector<2x1x8xf32> to vector<1x2x1x8xf32>
    %2 = vector.shape_cast %1 : vector<1x2x1x8xf32> to vector<1x2x1x8xf32>
    %3 = vector.broadcast %2 : vector<1x2x1x8xf32> to vector<8x2x1x8xf32>
    %4 = vector.shape_cast %3 : vector<8x2x1x8xf32> to vector<16x1x8xf32>
    %c0_2 = arith.constant 0 : index
    %c0_3 = arith.constant 0 : index
    %c0_4 = arith.constant 0 : index
    %5 = vector.load %arg1[%c0_2, %c0_3, %c0_4] : memref<2x8x256xf32, #tpu.memory_space<vmem>>, vector<2x8x256xf32>
    %6 = vector.shape_cast %5 : vector<2x8x256xf32> to vector<16x256xf32>
    %c0_5 = arith.constant 0 : index
    %c0_6 = arith.constant 0 : index
    %7 = vector.load %arg3[%c0_5, %c0_6] : memref<1x256xf32, #tpu.memory_space<vmem>>, vector<1x256xf32>
    %c0_7 = arith.constant 0 : index
    %c0_8 = arith.constant 0 : index
    %8 = vector.load %arg4[%c0_7, %c0_8] : memref<1x256xf32, #tpu.memory_space<vmem>>, vector<1x256xf32>
    %cst = arith.constant dense<0.000000e+00> : vector<16xf32>
    %9 = vector.multi_reduction <add>, %6, %cst [1] : vector<16x256xf32> to vector<16xf32>
    %10 = vector.shape_cast %9 : vector<16xf32> to vector<16x1xf32>
    %cst_9 = arith.constant 2.560000e+02 : f32
    %11 = vector.broadcast %cst_9 : f32 to vector<16x1xf32>
    %12 = arith.divf %10, %11 : vector<16x1xf32>
    %13 = vector.broadcast %12 : vector<16x1xf32> to vector<16x256xf32>
    %14 = arith.subf %6, %13 : vector<16x256xf32>
    %15 = arith.mulf %14, %14 : vector<16x256xf32>
    %cst_10 = arith.constant dense<0.000000e+00> : vector<16xf32>
    %16 = vector.multi_reduction <add>, %15, %cst_10 [1] : vector<16x256xf32> to vector<16xf32>
    %17 = vector.shape_cast %16 : vector<16xf32> to vector<16x1xf32>
    %cst_11 = arith.constant 2.560000e+02 : f32
    %18 = vector.broadcast %cst_11 : f32 to vector<16x1xf32>
    %19 = arith.divf %17, %18 : vector<16x1xf32>
    %20 = vector.broadcast %12 : vector<16x1xf32> to vector<16x256xf32>
    %21 = arith.subf %6, %20 : vector<16x256xf32>
    %cst_12 = arith.constant 9.99999974E-6 : f32
    %22 = vector.broadcast %cst_12 : f32 to vector<16x1xf32>
    %23 = arith.addf %19, %22 : vector<16x1xf32>
    %24 = math.rsqrt %23 : vector<16x1xf32>
    %25 = vector.broadcast %24 : vector<16x1xf32> to vector<16x256xf32>
    %26 = arith.mulf %21, %25 : vector<16x256xf32>
    %27 = vector.broadcast %7 : vector<1x256xf32> to vector<16x256xf32>
    %28 = arith.mulf %26, %27 : vector<16x256xf32>
    %29 = vector.broadcast %8 : vector<1x256xf32> to vector<16x256xf32>
    %30 = arith.addf %28, %29 : vector<16x256xf32>
    %c0_i32 = arith.constant 0 : i32
    %c4_i32 = arith.constant 4 : i32
    %31 = arith.addi %c0_i32, %c4_i32 : i32
    %c1_i32 = arith.constant 1 : i32
    %32 = scf.for %arg18 = %c0_i32 to %31 step %c1_i32 iter_args(%arg19 = %30) -> (vector<16x256xf32>)  : i32 {
      %39 = arith.index_cast %arg18 : i32 to index
      %c0_19 = arith.constant 0 : index
      %c0_20 = arith.constant 0 : index
      %40 = vector.load %arg9[%39, %c0_19, %c0_20] : memref<4x1x256xf32, #tpu.memory_space<vmem>>, vector<1x1x256xf32>
      %41 = vector.shape_cast %40 : vector<1x1x256xf32> to vector<1x256xf32>
      %42 = arith.index_cast %arg18 : i32 to index
      %c0_21 = arith.constant 0 : index
      %c0_22 = arith.constant 0 : index
      %43 = vector.load %arg10[%42, %c0_21, %c0_22] : memref<4x1x256xf32, #tpu.memory_space<vmem>>, vector<1x1x256xf32>
      %44 = vector.shape_cast %43 : vector<1x1x256xf32> to vector<1x256xf32>
      %cst_23 = arith.constant dense<0.000000e+00> : vector<16xf32>
      %45 = vector.multi_reduction <add>, %arg19, %cst_23 [1] : vector<16x256xf32> to vector<16xf32>
      %46 = vector.shape_cast %45 : vector<16xf32> to vector<16x1xf32>
      %cst_24 = arith.constant 2.560000e+02 : f32
      %47 = vector.broadcast %cst_24 : f32 to vector<16x1xf32>
      %48 = arith.divf %46, %47 : vector<16x1xf32>
      %49 = vector.broadcast %48 : vector<16x1xf32> to vector<16x256xf32>
      %50 = arith.subf %arg19, %49 : vector<16x256xf32>
      %51 = arith.mulf %50, %50 : vector<16x256xf32>
      %cst_25 = arith.constant dense<0.000000e+00> : vector<16xf32>
      %52 = vector.multi_reduction <add>, %51, %cst_25 [1] : vector<16x256xf32> to vector<16xf32>
      %53 = vector.shape_cast %52 : vector<16xf32> to vector<16x1xf32>
      %cst_26 = arith.constant 2.560000e+02 : f32
      %54 = vector.broadcast %cst_26 : f32 to vector<16x1xf32>
      %55 = arith.divf %53, %54 : vector<16x1xf32>
      %56 = vector.broadcast %48 : vector<16x1xf32> to vector<16x256xf32>
      %57 = arith.subf %arg19, %56 : vector<16x256xf32>
      %cst_27 = arith.constant 9.99999974E-6 : f32
      %58 = vector.broadcast %cst_27 : f32 to vector<16x1xf32>
      %59 = arith.addf %55, %58 : vector<16x1xf32>
      %60 = math.rsqrt %59 : vector<16x1xf32>
      %61 = vector.broadcast %60 : vector<16x1xf32> to vector<16x256xf32>
      %62 = arith.mulf %57, %61 : vector<16x256xf32>
      %63 = vector.broadcast %41 : vector<1x256xf32> to vector<16x256xf32>
      %64 = arith.mulf %62, %63 : vector<16x256xf32>
      %65 = vector.broadcast %44 : vector<1x256xf32> to vector<16x256xf32>
      %66 = arith.addf %64, %65 : vector<16x256xf32>
      %67 = arith.truncf %66 : vector<16x256xf32> to vector<16x256xbf16>
      %68 = arith.index_cast %arg18 : i32 to index
      %c0_28 = arith.constant 0 : index
      %c0_29 = arith.constant 0 : index
      %69 = vector.load %arg5[%68, %c0_28, %c0_29] : memref<4x256x768xbf16, #tpu.memory_space<vmem>>, vector<1x256x768xbf16>
      %70 = vector.shape_cast %69 : vector<1x256x768xbf16> to vector<256x768xbf16>
      %cst_30 = arith.constant dense<0.000000e+00> : vector<16x768xf32>
      %71 = tpu.matmul %67, %70, %cst_30 {dimension_numbers = #tpu.dot_dimension_numbers<[1], [0], [0], [1], [0, 0, 1, 1], [], []>} : vector<16x256xbf16>, vector<256x768xbf16>, vector<16x768xf32> -> vector<16x768xf32>
      %72 = arith.index_cast %arg18 : i32 to index
      %c0_31 = arith.constant 0 : index
      %c0_32 = arith.constant 0 : index
      %73 = vector.load %arg6[%72, %c0_31, %c0_32] : memref<4x1x768xf32, #tpu.memory_space<vmem>>, vector<1x1x768xf32>
      %74 = vector.shape_cast %73 : vector<1x1x768xf32> to vector<1x768xf32>
      %75 = vector.broadcast %74 : vector<1x768xf32> to vector<16x768xf32>
      %76 = arith.addf %71, %75 : vector<16x768xf32>
      %77 = arith.truncf %76 : vector<16x768xf32> to vector<16x768xbf16>
      %78 = vector.extract_strided_slice %77 {offsets = [0, 0], sizes = [16, 256], strides = [1, 1]} : vector<16x768xbf16> to vector<16x256xbf16>
      %79 = vector.shape_cast %78 : vector<16x256xbf16> to vector<2x8x256xbf16>
      %80 = vector.extract_strided_slice %77 {offsets = [0, 256], sizes = [16, 256], strides = [1, 1]} : vector<16x768xbf16> to vector<16x256xbf16>
      %81 = vector.shape_cast %80 : vector<16x256xbf16> to vector<2x8x256xbf16>
      %82 = vector.extract_strided_slice %77 {offsets = [0, 512], sizes = [16, 256], strides = [1, 1]} : vector<16x768xbf16> to vector<16x256xbf16>
      %83 = vector.shape_cast %82 : vector<16x256xbf16> to vector<2x8x256xbf16>
      %84 = vector.extract_strided_slice %79 {offsets = [0, 0, 0], sizes = [2, 8, 32], strides = [1, 1, 1]} : vector<2x8x256xbf16> to vector<2x8x32xbf16>
      %85 = vector.extract_strided_slice %79 {offsets = [0, 0, 32], sizes = [2, 8, 32], strides = [1, 1, 1]} : vector<2x8x256xbf16> to vector<2x8x32xbf16>
      %86 = vector.extract_strided_slice %79 {offsets = [0, 0, 64], sizes = [2, 8, 32], strides = [1, 1, 1]} : vector<2x8x256xbf16> to vector<2x8x32xbf16>
      %87 = vector.extract_strided_slice %79 {offsets = [0, 0, 96], sizes = [2, 8, 32], strides = [1, 1, 1]} : vector<2x8x256xbf16> to vector<2x8x32xbf16>
      %88 = vector.extract_strided_slice %79 {offsets = [0, 0, 128], sizes = [2, 8, 32], strides = [1, 1, 1]} : vector<2x8x256xbf16> to vector<2x8x32xbf16>
      %89 = vector.extract_strided_slice %79 {offsets = [0, 0, 160], sizes = [2, 8, 32], strides = [1, 1, 1]} : vector<2x8x256xbf16> to vector<2x8x32xbf16>
      %90 = vector.extract_strided_slice %79 {offsets = [0, 0, 192], sizes = [2, 8, 32], strides = [1, 1, 1]} : vector<2x8x256xbf16> to vector<2x8x32xbf16>
      %91 = vector.extract_strided_slice %79 {offsets = [0, 0, 224], sizes = [2, 8, 32], strides = [1, 1, 1]} : vector<2x8x256xbf16> to vector<2x8x32xbf16>
      %92 = vector.shape_cast %84 : vector<2x8x32xbf16> to vector<1x2x8x32xbf16>
      %93 = vector.shape_cast %85 : vector<2x8x32xbf16> to vector<1x2x8x32xbf16>
      %94 = vector.shape_cast %86 : vector<2x8x32xbf16> to vector<1x2x8x32xbf16>
      %95 = vector.shape_cast %87 : vector<2x8x32xbf16> to vector<1x2x8x32xbf16>
      %96 = vector.shape_cast %88 : vector<2x8x32xbf16> to vector<1x2x8x32xbf16>
      %97 = vector.shape_cast %89 : vector<2x8x32xbf16> to vector<1x2x8x32xbf16>
      %98 = vector.shape_cast %90 : vector<2x8x32xbf16> to vector<1x2x8x32xbf16>
      %99 = vector.shape_cast %91 : vector<2x8x32xbf16> to vector<1x2x8x32xbf16>
      %100 = tpu.concatenate %92, %93, %94, %95, %96, %97, %98, %99 in 0 : vector<1x2x8x32xbf16>, vector<1x2x8x32xbf16>, vector<1x2x8x32xbf16>, vector<1x2x8x32xbf16>, vector<1x2x8x32xbf16>, vector<1x2x8x32xbf16>, vector<1x2x8x32xbf16>, vector<1x2x8x32xbf16> -> vector<8x2x8x32xbf16>
      %101 = vector.shape_cast %100 : vector<8x2x8x32xbf16> to vector<16x8x32xbf16>
      %102 = vector.extract_strided_slice %81 {offsets = [0, 0, 0], sizes = [2, 8, 32], strides = [1, 1, 1]} : vector<2x8x256xbf16> to vector<2x8x32xbf16>
      %103 = vector.extract_strided_slice %81 {offsets = [0, 0, 32], sizes = [2, 8, 32], strides = [1, 1, 1]} : vector<2x8x256xbf16> to vector<2x8x32xbf16>
      %104 = vector.extract_strided_slice %81 {offsets = [0, 0, 64], sizes = [2, 8, 32], strides = [1, 1, 1]} : vector<2x8x256xbf16> to vector<2x8x32xbf16>
      %105 = vector.extract_strided_slice %81 {offsets = [0, 0, 96], sizes = [2, 8, 32], strides = [1, 1, 1]} : vector<2x8x256xbf16> to vector<2x8x32xbf16>
      %106 = vector.extract_strided_slice %81 {offsets = [0, 0, 128], sizes = [2, 8, 32], strides = [1, 1, 1]} : vector<2x8x256xbf16> to vector<2x8x32xbf16>
      %107 = vector.extract_strided_slice %81 {offsets = [0, 0, 160], sizes = [2, 8, 32], strides = [1, 1, 1]} : vector<2x8x256xbf16> to vector<2x8x32xbf16>
      %108 = vector.extract_strided_slice %81 {offsets = [0, 0, 192], sizes = [2, 8, 32], strides = [1, 1, 1]} : vector<2x8x256xbf16> to vector<2x8x32xbf16>
      %109 = vector.extract_strided_slice %81 {offsets = [0, 0, 224], sizes = [2, 8, 32], strides = [1, 1, 1]} : vector<2x8x256xbf16> to vector<2x8x32xbf16>
      %110 = vector.shape_cast %102 : vector<2x8x32xbf16> to vector<1x2x8x32xbf16>
      %111 = vector.shape_cast %103 : vector<2x8x32xbf16> to vector<1x2x8x32xbf16>
      %112 = vector.shape_cast %104 : vector<2x8x32xbf16> to vector<1x2x8x32xbf16>
      %113 = vector.shape_cast %105 : vector<2x8x32xbf16> to vector<1x2x8x32xbf16>
      %114 = vector.shape_cast %106 : vector<2x8x32xbf16> to vector<1x2x8x32xbf16>
      %115 = vector.shape_cast %107 : vector<2x8x32xbf16> to vector<1x2x8x32xbf16>
      %116 = vector.shape_cast %108 : vector<2x8x32xbf16> to vector<1x2x8x32xbf16>
      %117 = vector.shape_cast %109 : vector<2x8x32xbf16> to vector<1x2x8x32xbf16>
      %118 = tpu.concatenate %110, %111, %112, %113, %114, %115, %116, %117 in 0 : vector<1x2x8x32xbf16>, vector<1x2x8x32xbf16>, vector<1x2x8x32xbf16>, vector<1x2x8x32xbf16>, vector<1x2x8x32xbf16>, vector<1x2x8x32xbf16>, vector<1x2x8x32xbf16>, vector<1x2x8x32xbf16> -> vector<8x2x8x32xbf16>
      %119 = vector.shape_cast %118 : vector<8x2x8x32xbf16> to vector<16x8x32xbf16>
      %120 = vector.extract_strided_slice %83 {offsets = [0, 0, 0], sizes = [2, 8, 32], strides = [1, 1, 1]} : vector<2x8x256xbf16> to vector<2x8x32xbf16>
      %121 = vector.extract_strided_slice %83 {offsets = [0, 0, 32], sizes = [2, 8, 32], strides = [1, 1, 1]} : vector<2x8x256xbf16> to vector<2x8x32xbf16>
      %122 = vector.extract_strided_slice %83 {offsets = [0, 0, 64], sizes = [2, 8, 32], strides = [1, 1, 1]} : vector<2x8x256xbf16> to vector<2x8x32xbf16>
      %123 = vector.extract_strided_slice %83 {offsets = [0, 0, 96], sizes = [2, 8, 32], strides = [1, 1, 1]} : vector<2x8x256xbf16> to vector<2x8x32xbf16>
      %124 = vector.extract_strided_slice %83 {offsets = [0, 0, 128], sizes = [2, 8, 32], strides = [1, 1, 1]} : vector<2x8x256xbf16> to vector<2x8x32xbf16>
      %125 = vector.extract_strided_slice %83 {offsets = [0, 0, 160], sizes = [2, 8, 32], strides = [1, 1, 1]} : vector<2x8x256xbf16> to vector<2x8x32xbf16>
      %126 = vector.extract_strided_slice %83 {offsets = [0, 0, 192], sizes = [2, 8, 32], strides = [1, 1, 1]} : vector<2x8x256xbf16> to vector<2x8x32xbf16>
      %127 = vector.extract_strided_slice %83 {offsets = [0, 0, 224], sizes = [2, 8, 32], strides = [1, 1, 1]} : vector<2x8x256xbf16> to vector<2x8x32xbf16>
      %128 = vector.shape_cast %120 : vector<2x8x32xbf16> to vector<1x2x8x32xbf16>
      %129 = vector.shape_cast %121 : vector<2x8x32xbf16> to vector<1x2x8x32xbf16>
      %130 = vector.shape_cast %122 : vector<2x8x32xbf16> to vector<1x2x8x32xbf16>
      %131 = vector.shape_cast %123 : vector<2x8x32xbf16> to vector<1x2x8x32xbf16>
      %132 = vector.shape_cast %124 : vector<2x8x32xbf16> to vector<1x2x8x32xbf16>
      %133 = vector.shape_cast %125 : vector<2x8x32xbf16> to vector<1x2x8x32xbf16>
      %134 = vector.shape_cast %126 : vector<2x8x32xbf16> to vector<1x2x8x32xbf16>
      %135 = vector.shape_cast %127 : vector<2x8x32xbf16> to vector<1x2x8x32xbf16>
      %136 = tpu.concatenate %128, %129, %130, %131, %132, %133, %134, %135 in 0 : vector<1x2x8x32xbf16>, vector<1x2x8x32xbf16>, vector<1x2x8x32xbf16>, vector<1x2x8x32xbf16>, vector<1x2x8x32xbf16>, vector<1x2x8x32xbf16>, vector<1x2x8x32xbf16>, vector<1x2x8x32xbf16> -> vector<8x2x8x32xbf16>
      %137 = vector.shape_cast %136 : vector<8x2x8x32xbf16> to vector<16x8x32xbf16>
      "tpu.trace_start"() <{level = 10 : i32, message = "bqd,bkd->bqk"}> : () -> ()
      %cst_33 = arith.constant dense<0.000000e+00> : vector<16x8x8xf32>
      %138 = tpu.matmul %101, %119, %cst_33 {dimension_numbers = #tpu.dot_dimension_numbers<[2], [2], [1], [1], [0, 0, 0, 1, 1, 1], [0], [0]>} : vector<16x8x32xbf16>, vector<16x8x32xbf16>, vector<16x8x8xf32> -> vector<16x8x8xf32>
      "tpu.trace_stop"() : () -> ()
      %139 = vector.broadcast %4 : vector<16x1x8xf32> to vector<16x8x8xf32>
      %140 = arith.addf %138, %139 : vector<16x8x8xf32>
      %cst_34 = arith.constant dense<0xFF800000> : vector<16x8xf32>
      %141 = vector.multi_reduction <maximumf>, %140, %cst_34 [2] : vector<16x8x8xf32> to vector<16x8xf32>
      %142 = vector.shape_cast %141 : vector<16x8xf32> to vector<16x8x1xf32>
      %143 = vector.broadcast %142 : vector<16x8x1xf32> to vector<16x8x8xf32>
      %144 = arith.subf %140, %143 : vector<16x8x8xf32>
      %145 = math.exp %144 : vector<16x8x8xf32>
      %cst_35 = arith.constant dense<0.000000e+00> : vector<16x8xf32>
      %146 = vector.multi_reduction <add>, %145, %cst_35 [2] : vector<16x8x8xf32> to vector<16x8xf32>
      %147 = vector.shape_cast %146 : vector<16x8xf32> to vector<16x8x1xf32>
      %148 = tpu.reciprocal %147 {approx = true} : vector<16x8x1xf32> -> vector<16x8x1xf32>
      %149 = vector.broadcast %148 : vector<16x8x1xf32> to vector<16x8x8xf32>
      %150 = arith.mulf %145, %149 : vector<16x8x8xf32>
      %151 = arith.truncf %150 : vector<16x8x8xf32> to vector<16x8x8xbf16>
      "tpu.trace_start"() <{level = 10 : i32, message = "bqk,bkd->bqd"}> : () -> ()
      %cst_36 = arith.constant dense<0.000000e+00> : vector<16x8x32xf32>
      %152 = tpu.matmul %151, %137, %cst_36 {dimension_numbers = #tpu.dot_dimension_numbers<[2], [1], [1], [2], [0, 0, 0, 1, 1, 2], [0], [0]>} : vector<16x8x8xbf16>, vector<16x8x32xbf16>, vector<16x8x32xf32> -> vector<16x8x32xf32>
      "tpu.trace_stop"() : () -> ()
      %153 = vector.shape_cast %152 : vector<16x8x32xf32> to vector<8x2x8x32xf32>
      %154 = vector.extract_strided_slice %153 {offsets = [0, 0, 0, 0], sizes = [1, 2, 8, 32], strides = [1, 1, 1, 1]} : vector<8x2x8x32xf32> to vector<1x2x8x32xf32>
      %155 = vector.shape_cast %154 : vector<1x2x8x32xf32> to vector<2x8x32xf32>
      %156 = vector.extract_strided_slice %153 {offsets = [1, 0, 0, 0], sizes = [1, 2, 8, 32], strides = [1, 1, 1, 1]} : vector<8x2x8x32xf32> to vector<1x2x8x32xf32>
      %157 = vector.shape_cast %156 : vector<1x2x8x32xf32> to vector<2x8x32xf32>
      %158 = vector.extract_strided_slice %153 {offsets = [2, 0, 0, 0], sizes = [1, 2, 8, 32], strides = [1, 1, 1, 1]} : vector<8x2x8x32xf32> to vector<1x2x8x32xf32>
      %159 = vector.shape_cast %158 : vector<1x2x8x32xf32> to vector<2x8x32xf32>
      %160 = vector.extract_strided_slice %153 {offsets = [3, 0, 0, 0], sizes = [1, 2, 8, 32], strides = [1, 1, 1, 1]} : vector<8x2x8x32xf32> to vector<1x2x8x32xf32>
      %161 = vector.shape_cast %160 : vector<1x2x8x32xf32> to vector<2x8x32xf32>
      %162 = vector.extract_strided_slice %153 {offsets = [4, 0, 0, 0], sizes = [1, 2, 8, 32], strides = [1, 1, 1, 1]} : vector<8x2x8x32xf32> to vector<1x2x8x32xf32>
      %163 = vector.shape_cast %162 : vector<1x2x8x32xf32> to vector<2x8x32xf32>
      %164 = vector.extract_strided_slice %153 {offsets = [5, 0, 0, 0], sizes = [1, 2, 8, 32], strides = [1, 1, 1, 1]} : vector<8x2x8x32xf32> to vector<1x2x8x32xf32>
      %165 = vector.shape_cast %164 : vector<1x2x8x32xf32> to vector<2x8x32xf32>
      %166 = vector.extract_strided_slice %153 {offsets = [6, 0, 0, 0], sizes = [1, 2, 8, 32], strides = [1, 1, 1, 1]} : vector<8x2x8x32xf32> to vector<1x2x8x32xf32>
      %167 = vector.shape_cast %166 : vector<1x2x8x32xf32> to vector<2x8x32xf32>
      %168 = vector.extract_strided_slice %153 {offsets = [7, 0, 0, 0], sizes = [1, 2, 8, 32], strides = [1, 1, 1, 1]} : vector<8x2x8x32xf32> to vector<1x2x8x32xf32>
      %169 = vector.shape_cast %168 : vector<1x2x8x32xf32> to vector<2x8x32xf32>
      %170 = tpu.concatenate %155, %157, %159, %161, %163, %165, %167, %169 in 2 : vector<2x8x32xf32>, vector<2x8x32xf32>, vector<2x8x32xf32>, vector<2x8x32xf32>, vector<2x8x32xf32>, vector<2x8x32xf32>, vector<2x8x32xf32>, vector<2x8x32xf32> -> vector<2x8x256xf32>
      %171 = vector.shape_cast %170 : vector<2x8x256xf32> to vector<16x256xf32>
      %172 = arith.truncf %171 : vector<16x256xf32> to vector<16x256xbf16>
      %173 = arith.index_cast %arg18 : i32 to index
      %c0_37 = arith.constant 0 : index
      %c0_38 = arith.constant 0 : index
      %174 = vector.load %arg7[%173, %c0_37, %c0_38] : memref<4x256x256xbf16, #tpu.memory_space<vmem>>, vector<1x256x256xbf16>
      %175 = vector.shape_cast %174 : vector<1x256x256xbf16> to vector<256x256xbf16>
      %cst_39 = arith.constant dense<0.000000e+00> : vector<16x256xf32>
      %176 = tpu.matmul %172, %175, %cst_39 {dimension_numbers = #tpu.dot_dimension_numbers<[1], [0], [0], [1], [0, 0, 1, 1], [], []>} : vector<16x256xbf16>, vector<256x256xbf16>, vector<16x256xf32> -> vector<16x256xf32>
      %177 = arith.index_cast %arg18 : i32 to index
      %c0_40 = arith.constant 0 : index
      %c0_41 = arith.constant 0 : index
      %178 = vector.load %arg8[%177, %c0_40, %c0_41] : memref<4x1x256xf32, #tpu.memory_space<vmem>>, vector<1x1x256xf32>
      %179 = vector.shape_cast %178 : vector<1x1x256xf32> to vector<1x256xf32>
      %180 = vector.broadcast %179 : vector<1x256xf32> to vector<16x256xf32>
      %181 = arith.addf %176, %180 : vector<16x256xf32>
      %182 = arith.addf %arg19, %181 : vector<16x256xf32>
      %183 = arith.index_cast %arg18 : i32 to index
      %c0_42 = arith.constant 0 : index
      %c0_43 = arith.constant 0 : index
      %184 = vector.load %arg11[%183, %c0_42, %c0_43] : memref<4x1x256xf32, #tpu.memory_space<vmem>>, vector<1x1x256xf32>
      %185 = vector.shape_cast %184 : vector<1x1x256xf32> to vector<1x256xf32>
      %186 = arith.index_cast %arg18 : i32 to index
      %c0_44 = arith.constant 0 : index
      %c0_45 = arith.constant 0 : index
      %187 = vector.load %arg12[%186, %c0_44, %c0_45] : memref<4x1x256xf32, #tpu.memory_space<vmem>>, vector<1x1x256xf32>
      %188 = vector.shape_cast %187 : vector<1x1x256xf32> to vector<1x256xf32>
      %cst_46 = arith.constant dense<0.000000e+00> : vector<16xf32>
      %189 = vector.multi_reduction <add>, %182, %cst_46 [1] : vector<16x256xf32> to vector<16xf32>
      %190 = vector.shape_cast %189 : vector<16xf32> to vector<16x1xf32>
      %cst_47 = arith.constant 2.560000e+02 : f32
      %191 = vector.broadcast %cst_47 : f32 to vector<16x1xf32>
      %192 = arith.divf %190, %191 : vector<16x1xf32>
      %193 = vector.broadcast %192 : vector<16x1xf32> to vector<16x256xf32>
      %194 = arith.subf %182, %193 : vector<16x256xf32>
      %195 = arith.mulf %194, %194 : vector<16x256xf32>
      %cst_48 = arith.constant dense<0.000000e+00> : vector<16xf32>
      %196 = vector.multi_reduction <add>, %195, %cst_48 [1] : vector<16x256xf32> to vector<16xf32>
      %197 = vector.shape_cast %196 : vector<16xf32> to vector<16x1xf32>
      %cst_49 = arith.constant 2.560000e+02 : f32
      %198 = vector.broadcast %cst_49 : f32 to vector<16x1xf32>
      %199 = arith.divf %197, %198 : vector<16x1xf32>
      %200 = vector.broadcast %192 : vector<16x1xf32> to vector<16x256xf32>
      %201 = arith.subf %182, %200 : vector<16x256xf32>
      %cst_50 = arith.constant 9.99999974E-6 : f32
      %202 = vector.broadcast %cst_50 : f32 to vector<16x1xf32>
      %203 = arith.addf %199, %202 : vector<16x1xf32>
      %204 = math.rsqrt %203 : vector<16x1xf32>
      %205 = vector.broadcast %204 : vector<16x1xf32> to vector<16x256xf32>
      %206 = arith.mulf %201, %205 : vector<16x256xf32>
      %207 = vector.broadcast %185 : vector<1x256xf32> to vector<16x256xf32>
      %208 = arith.mulf %206, %207 : vector<16x256xf32>
      %209 = vector.broadcast %188 : vector<1x256xf32> to vector<16x256xf32>
      %210 = arith.addf %208, %209 : vector<16x256xf32>
      %211 = arith.truncf %210 : vector<16x256xf32> to vector<16x256xbf16>
      %212 = arith.index_cast %arg18 : i32 to index
      %c0_51 = arith.constant 0 : index
      %c0_52 = arith.constant 0 : index
      %213 = vector.load %arg13[%212, %c0_51, %c0_52] : memref<4x256x512xbf16, #tpu.memory_space<vmem>>, vector<1x256x512xbf16>
      %214 = vector.shape_cast %213 : vector<1x256x512xbf16> to vector<256x512xbf16>
      %cst_53 = arith.constant dense<0.000000e+00> : vector<16x512xf32>
      %215 = tpu.matmul %211, %214, %cst_53 {dimension_numbers = #tpu.dot_dimension_numbers<[1], [0], [0], [1], [0, 0, 1, 1], [], []>} : vector<16x256xbf16>, vector<256x512xbf16>, vector<16x512xf32> -> vector<16x512xf32>
      %216 = arith.index_cast %arg18 : i32 to index
      %c0_54 = arith.constant 0 : index
      %c0_55 = arith.constant 0 : index
      %217 = vector.load %arg14[%216, %c0_54, %c0_55] : memref<4x1x512xf32, #tpu.memory_space<vmem>>, vector<1x1x512xf32>
      %218 = vector.shape_cast %217 : vector<1x1x512xf32> to vector<1x512xf32>
      %219 = vector.broadcast %218 : vector<1x512xf32> to vector<16x512xf32>
      %220 = arith.addf %215, %219 : vector<16x512xf32>
      %cst_56 = arith.constant 0.000000e+00 : f32
      %221 = vector.broadcast %cst_56 : f32 to vector<16x512xf32>
      %222 = arith.maximumf %220, %221 : vector<16x512xf32>
      %223 = arith.truncf %222 : vector<16x512xf32> to vector<16x512xbf16>
      %224 = arith.index_cast %arg18 : i32 to index
      %c0_57 = arith.constant 0 : index
      %c0_58 = arith.constant 0 : index
      %225 = vector.load %arg15[%224, %c0_57, %c0_58] : memref<4x512x256xbf16, #tpu.memory_space<vmem>>, vector<1x512x256xbf16>
      %226 = vector.shape_cast %225 : vector<1x512x256xbf16> to vector<512x256xbf16>
      %cst_59 = arith.constant dense<0.000000e+00> : vector<16x256xf32>
      %227 = tpu.matmul %223, %226, %cst_59 {dimension_numbers = #tpu.dot_dimension_numbers<[1], [0], [0], [1], [0, 0, 1, 1], [], []>} : vector<16x512xbf16>, vector<512x256xbf16>, vector<16x256xf32> -> vector<16x256xf32>
      %228 = arith.addf %182, %227 : vector<16x256xf32>
      %229 = arith.index_cast %arg18 : i32 to index
      %c0_60 = arith.constant 0 : index
      %c0_61 = arith.constant 0 : index
      %230 = vector.load %arg16[%229, %c0_60, %c0_61] : memref<4x1x256xf32, #tpu.memory_space<vmem>>, vector<1x1x256xf32>
      %231 = vector.shape_cast %230 : vector<1x1x256xf32> to vector<1x256xf32>
      %232 = vector.broadcast %231 : vector<1x256xf32> to vector<16x256xf32>
      %233 = arith.addf %228, %232 : vector<16x256xf32>
      scf.yield %233 : vector<16x256xf32>
    }
    %c4_i32_13 = arith.constant 4 : i32
    %33 = vector.shape_cast %32 : vector<16x256xf32> to vector<2x8x256xf32>
    %cst_14 = arith.constant dense<0.000000e+00> : vector<2x256xf32>
    %34 = vector.multi_reduction <add>, %33, %cst_14 [1] : vector<2x8x256xf32> to vector<2x256xf32>
    %cst_15 = arith.constant 8.000000e+00 : f32
    %35 = vector.broadcast %cst_15 : f32 to vector<2x256xf32>
    %36 = arith.divf %34, %35 : vector<2x256xf32>
    %37 = vector.shape_cast %36 : vector<2x256xf32> to vector<2x1x256xf32>
    %c0_16 = arith.constant 0 : index
    %c0_17 = arith.constant 0 : index
    %c0_18 = arith.constant 0 : index
    %38 = vector.load %arg17[%c0_16, %c0_17, %c0_18] : memref<2x1x256xf32, #tpu.memory_space<vmem>>, vector<2x1x256xf32>
    tpu.vector_store %arg17[%c0_16, %c0_17, %c0_18], %37 {strides = array<i32>} : memref<2x1x256xf32, #tpu.memory_space<vmem>>, vector<2x1x256xf32>,
    return
  }
  func.func @transform_0(%arg0: i32) -> (i32, i32, i32) {
    %c0_i32 = arith.constant 0 : i32
    %c0_i32_0 = arith.constant 0 : i32
    %c0_i32_1 = arith.constant 0 : i32
    return %arg0, %c0_i32, %c0_i32_0 : i32, i32, i32
  }
  func.func @transform_1(%arg0: i32) -> (i32, i32, i32) {
    %c0_i32 = arith.constant 0 : i32
    %c0_i32_0 = arith.constant 0 : i32
    %c0_i32_1 = arith.constant 0 : i32
    return %arg0, %c0_i32, %c0_i32_0 : i32, i32, i32
  }
  func.func @transform_2(%arg0: i32) -> (i32, i32) {
    %c0_i32 = arith.constant 0 : i32
    %c0_i32_0 = arith.constant 0 : i32
    %c0_i32_1 = arith.constant 0 : i32
    return %c0_i32, %c0_i32_0 : i32, i32
  }
  func.func @transform_3(%arg0: i32) -> (i32, i32) {
    %c0_i32 = arith.constant 0 : i32
    %c0_i32_0 = arith.constant 0 : i32
    %c0_i32_1 = arith.constant 0 : i32
    return %c0_i32, %c0_i32_0 : i32, i32
  }
  func.func @transform_4(%arg0: i32) -> (i32, i32, i32) {
    %c0_i32 = arith.constant 0 : i32
    %c0_i32_0 = arith.constant 0 : i32
    %c0_i32_1 = arith.constant 0 : i32
    %c0_i32_2 = arith.constant 0 : i32
    return %c0_i32, %c0_i32_0, %c0_i32_1 : i32, i32, i32
  }
  func.func @transform_5(%arg0: i32) -> (i32, i32, i32) {
    %c0_i32 = arith.constant 0 : i32
    %c0_i32_0 = arith.constant 0 : i32
    %c0_i32_1 = arith.constant 0 : i32
    %c0_i32_2 = arith.constant 0 : i32
    return %c0_i32, %c0_i32_0, %c0_i32_1 : i32, i32, i32
  }
  func.func @transform_6(%arg0: i32) -> (i32, i32, i32) {
    %c0_i32 = arith.constant 0 : i32
    %c0_i32_0 = arith.constant 0 : i32
    %c0_i32_1 = arith.constant 0 : i32
    %c0_i32_2 = arith.constant 0 : i32
    return %c0_i32, %c0_i32_0, %c0_i32_1 : i32, i32, i32
  }
  func.func @transform_7(%arg0: i32) -> (i32, i32, i32) {
    %c0_i32 = arith.constant 0 : i32
    %c0_i32_0 = arith.constant 0 : i32
    %c0_i32_1 = arith.constant 0 : i32
    %c0_i32_2 = arith.constant 0 : i32
    return %c0_i32, %c0_i32_0, %c0_i32_1 : i32, i32, i32
  }
  func.func @transform_8(%arg0: i32) -> (i32, i32, i32) {
    %c0_i32 = arith.constant 0 : i32
    %c0_i32_0 = arith.constant 0 : i32
    %c0_i32_1 = arith.constant 0 : i32
    %c0_i32_2 = arith.constant 0 : i32
    return %c0_i32, %c0_i32_0, %c0_i32_1 : i32, i32, i32
  }
  func.func @transform_9(%arg0: i32) -> (i32, i32, i32) {
    %c0_i32 = arith.constant 0 : i32
    %c0_i32_0 = arith.constant 0 : i32
    %c0_i32_1 = arith.constant 0 : i32
    %c0_i32_2 = arith.constant 0 : i32
    return %c0_i32, %c0_i32_0, %c0_i32_1 : i32, i32, i32
  }
  func.func @transform_10(%arg0: i32) -> (i32, i32, i32) {
    %c0_i32 = arith.constant 0 : i32
    %c0_i32_0 = arith.constant 0 : i32
    %c0_i32_1 = arith.constant 0 : i32
    %c0_i32_2 = arith.constant 0 : i32
    return %c0_i32, %c0_i32_0, %c0_i32_1 : i32, i32, i32
  }
  func.func @transform_11(%arg0: i32) -> (i32, i32, i32) {
    %c0_i32 = arith.constant 0 : i32
    %c0_i32_0 = arith.constant 0 : i32
    %c0_i32_1 = arith.constant 0 : i32
    %c0_i32_2 = arith.constant 0 : i32
    return %c0_i32, %c0_i32_0, %c0_i32_1 : i32, i32, i32
  }
  func.func @transform_12(%arg0: i32) -> (i32, i32, i32) {
    %c0_i32 = arith.constant 0 : i32
    %c0_i32_0 = arith.constant 0 : i32
    %c0_i32_1 = arith.constant 0 : i32
    %c0_i32_2 = arith.constant 0 : i32
    return %c0_i32, %c0_i32_0, %c0_i32_1 : i32, i32, i32
  }
  func.func @transform_13(%arg0: i32) -> (i32, i32, i32) {
    %c0_i32 = arith.constant 0 : i32
    %c0_i32_0 = arith.constant 0 : i32
    %c0_i32_1 = arith.constant 0 : i32
    %c0_i32_2 = arith.constant 0 : i32
    return %c0_i32, %c0_i32_0, %c0_i32_1 : i32, i32, i32
  }
  func.func @transform_14(%arg0: i32) -> (i32, i32, i32) {
    %c0_i32 = arith.constant 0 : i32
    %c0_i32_0 = arith.constant 0 : i32
    %c0_i32_1 = arith.constant 0 : i32
    %c0_i32_2 = arith.constant 0 : i32
    return %c0_i32, %c0_i32_0, %c0_i32_1 : i32, i32, i32
  }
  func.func @transform_15(%arg0: i32) -> (i32, i32, i32) {
    %c0_i32 = arith.constant 0 : i32
    %c0_i32_0 = arith.constant 0 : i32
    %c0_i32_1 = arith.constant 0 : i32
    %c0_i32_2 = arith.constant 0 : i32
    return %c0_i32, %c0_i32_0, %c0_i32_1 : i32, i32, i32
  }
  func.func @transform_16(%arg0: i32) -> (i32, i32, i32) {
    %c0_i32 = arith.constant 0 : i32
    %c0_i32_0 = arith.constant 0 : i32
    %c0_i32_1 = arith.constant 0 : i32
    return %arg0, %c0_i32, %c0_i32_0 : i32, i32, i32
  }
}

</mosaic_0001>

<bundles_post_ra>
// kernel: forward.1
= control target key start
LH: loop header
LB: loop body
LE: loop exit
PB: predicated region body
PF: predicated region fallthrough
CT: control target
= control target key end

     0   :  { %s6771_s0 = inlined_call_operand.vmem [shape: f32[2,8,256], index: 0, kind: input, shape index: {}]   ;;  %s6772_s1 = inlined_call_operand.vmem [shape: f32[2,1,8], index: 1, kind: input, shape index: {}]   ;;  %s6773_s2 = inlined_call_operand.hbm [shape: f32[1,256], index: 2, kind: input, shape index: {}]   ;;  %s6774_s3 = inlined_call_operand.hbm [shape: f32[1,256], index: 3, kind: input, shape index: {}]   ;;  %s6775_s4 = inlined_call_operand.hbm [shape: bf16[4,256,768], index: 4, kind: input, shape index: {}]   ;;  %s6776_s5 = inlined_call_operand.hbm [shape: f32[4,1,768], index: 5, kind: input, shape index: {}]   ;;  %s6777_s6 = inlined_call_operand.hbm [shape: bf16[4,256,256], index: 6, kind: input, shape index: {}]   ;;  %s6778_s7 = inlined_call_operand.hbm [shape: f32[4,1,256], index: 7, kind: input, shape index: {}]   ;;  %s6779_s8 = inlined_call_operand.hbm [shape: f32[4,1,256], index: 8, kind: input, shape index: {}]   ;;  %s6780_s9 = inlined_call_operand.hbm [shape: f32[4,1,256], index: 9, kind: input, shape index: {}]   ;;  %s6781_s10 = inlined_call_operand.hbm [shape: f32[4,1,256], index: 10, kind: input, shape index: {}]   ;;  %s6782_s11 = inlined_call_operand.hbm [shape: f32[4,1,256], index: 11, kind: input, shape index: {}]   ;;  %s6783_s12 = inlined_call_operand.hbm [shape: bf16[4,256,512], index: 12, kind: input, shape index: {}]   ;;  %s6784_s13 = inlined_call_operand.hbm [shape: f32[4,1,512], index: 13, kind: input, shape index: {}]   ;;  %s6785_s14 = inlined_call_operand.hbm [shape: bf16[4,512,256], index: 14, kind: input, shape index: {}]   ;;  %s6786_s15 = inlined_call_operand.hbm [shape: f32[4,1,256], index: 15, kind: input, shape index: {}]   ;;  %s6787_s16 = inlined_call_operand.vmem [shape: f32[2,1,256], index: 16, kind: output, shape index: {}]  }
   0x1   :  { %6789 = sst [smem:[#allocation32_spill]] %s6771_s0 }
   0x2   :  { %21 = vsyncpa [#allocation3], 0 }
   0x3   :  { %22 = vsyncpa [#allocation5], 0 }
   0x4   :  { %23 = vsyncpa [#allocation8], 0 }
   0x5   :  { %24 = vsyncpa [#allocation11], 0 }
   0x6   :  { %25 = vsyncpa [#allocation14], 0 }
   0x7   :  { %26 = vsyncpa [#allocation17], 0 }
   0x8   :  { %27 = vsyncpa [#allocation20], 0  ;;  %s49_s23 = sshll.u32 %s6774_s3, 4  ;;  %s50_s23 = int_to_ptr.hbm [resolvable:$true] %s49_s23 }
   0x9   :  { %28 = vsyncpa [#allocation23], 0  ;;  %s5518_s24 = smov [#allocation4]   ;;  %s72_s28 = sshll.u32 %s6776_s5, 4  ;;  %s73_s28 = int_to_ptr.hbm [resolvable:$true] %s72_s28 }
   0xa   :  { %s51_s25 = sshll.u32 %s5518_s24, 4  ;;  %s5519_s29 = smov [#allocation7]   ;;  %s52_s25 = int_to_ptr.vmem [resolvable:$true] %s51_s25 }
   0xb   :  { %54 = dma.hbm_to_vmem [thread:$0]  %s50_s23, 32, %s52_s25, [#allocation5]  }
   0xc   :  { %s74_s30 = sshll.u32 %s5519_s29, 4  ;;  %s5520_s0 = smov 96   ;;  %s75_s30 = int_to_ptr.vmem [resolvable:$true] %s74_s30 }
   0xd   :  { %s5521_s17 = smov 6   ;;  %s98_s3 = sshll.u32 %s6778_s7, 4  ;;  %s99_s3 = int_to_ptr.hbm [resolvable:$true] %s98_s3 }
   0xe   :  { %80 = dma.hbm_to_vmem [thread:$0]  %s73_s28, 384, %s75_s30, [#allocation8], %s5520_s0, %s5520_s0, %s5521_s17  }
   0xf   :  { %s5522_s20 = smov [#allocation10]   ;;  %s124_s5 = sshll.u32 %s6780_s9, 4  ;;  %s125_s5 = int_to_ptr.hbm [resolvable:$true] %s124_s5 }
  0x10   :  { %s100_s21 = sshll.u32 %s5522_s20, 4  ;;  %s5523_s23 = smov 32   ;;  %s101_s21 = int_to_ptr.vmem [resolvable:$true] %s100_s21 }
  0x11   :  { %s5524_s25 = smov 2   ;;  %s5525_s26 = smov [#allocation13]  }
  0x12   :  { %106 = dma.hbm_to_vmem [thread:$0]  %s99_s3, 128, %s101_s21, [#allocation11], %s5523_s23, %s5523_s23, %s5524_s25  }
  0x13   :  { %s126_s27 = sshll.u32 %s5525_s26, 4  ;;  %s150_s7 = sshll.u32 %s6782_s11, 4  ;;  %s127_s27 = int_to_ptr.vmem [resolvable:$true] %s126_s27  ;;  %s151_s7 = int_to_ptr.hbm [resolvable:$true] %s150_s7 }
  0x14   :  { %132 = dma.hbm_to_vmem [thread:$0]  %s125_s5, 128, %s127_s27, [#allocation14], %s5523_s23, %s5523_s23, %s5524_s25  }
  0x15   :  { %s176_s0 = sshll.u32 %s6784_s13, 4  ;;  %s5526_s17 = smov [#allocation16]   ;;  %s177_s0 = int_to_ptr.hbm [resolvable:$true] %s176_s0 }
  0x16   :  { %s152_s18 = sshll.u32 %s5526_s17, 4  ;;  %s5527_s19 = smov [#allocation19]   ;;  %s153_s18 = int_to_ptr.vmem [resolvable:$true] %s152_s18 }
  0x17   :  { %158 = dma.hbm_to_vmem [thread:$0]  %s151_s7, 128, %s153_s18, [#allocation17], %s5523_s23, %s5523_s23, %s5524_s25  }
  0x18   :  { %s178_s11 = sshll.u32 %s5527_s19, 4  ;;  %s5528_s3 = smov 64   ;;  %s179_s11 = int_to_ptr.vmem [resolvable:$true] %s178_s11 }
  0x19   :  { %s5529_s20 = smov 4   ;;  %s38_s24 = sshll.u32 %s6773_s2, 4  ;;  %s39_s24 = int_to_ptr.hbm [resolvable:$true] %s38_s24 }
  0x1a   :  { %184 = dma.hbm_to_vmem [thread:$0]  %s177_s0, 256, %s179_s11, [#allocation20], %s5528_s3, %s5528_s3, %s5529_s20  }
  0x1b   :  { %s5530_s13 = smov [#allocation2]   ;;  %s59_s28 = sshll.u32 %s6775_s4, 4  ;;  %s60_s28 = int_to_ptr.hbm [resolvable:$true] %s59_s28 }
  0x1c   :  { %s40_s5 = sshll.u32 %s5530_s13, 4  ;;  %s5531_s29 = smov [#allocation6]   ;;  %s41_s5 = int_to_ptr.vmem [resolvable:$true] %s40_s5 }
  0x1d   :  { %43 = dma.hbm_to_vmem [thread:$0]  %s39_s24, 32, %s41_s5, [#allocation3]  }
  0x1e   :  { %s61_s7 = sshll.u32 %s5531_s29, 4  ;;  %s5532_s9 = smov 384   ;;  %s62_s7 = int_to_ptr.vmem [resolvable:$true] %s61_s7 }
  0x1f   :  { %s5533_s30 = smov 24   ;;  %s85_s2 = sshll.u32 %s6777_s6, 4  ;;  %s86_s2 = int_to_ptr.hbm [resolvable:$true] %s85_s2 }
  0x20   :  { %67 = dma.hbm_to_vmem [thread:$0]  %s60_s28, 49152, %s62_s7, [#allocation5], %s5532_s9, %s5532_s9, %s5533_s30  }
  0x21   :  { %s5534_s18 = smov [#allocation9]   ;;  %s111_s4 = sshll.u32 %s6779_s8, 4  ;;  %s112_s4 = int_to_ptr.hbm [resolvable:$true] %s111_s4 }
  0x22   :  { %s87_s19 = sshll.u32 %s5534_s18, 4  ;;  %s5535_s20 = smov 128   ;;  %s88_s19 = int_to_ptr.vmem [resolvable:$true] %s87_s19 }
  0x23   :  { %s5536_s21 = smov 8   ;;  %s5537_s22 = smov [#allocation12]  }
  0x24   :  { %93 = dma.hbm_to_vmem [thread:$0]  %s86_s2, 16384, %s88_s19, [#allocation8], %s5535_s20, %s5535_s20, %s5536_s21  }
  0x25   :  { %s113_s24 = sshll.u32 %s5537_s22, 4  ;;  %s137_s6 = sshll.u32 %s6781_s10, 4  ;;  %s114_s24 = int_to_ptr.vmem [resolvable:$true] %s113_s24  ;;  %s138_s6 = int_to_ptr.hbm [resolvable:$true] %s137_s6 }
  0x26   :  { %119 = dma.hbm_to_vmem [thread:$0]  %s112_s4, 128, %s114_s24, [#allocation11], %s5523_s23, %s5523_s23, %s5524_s25  }
  0x27   :  { %s163_s27 = sshll.u32 %s6783_s12, 4  ;;  %s5538_s28 = smov [#allocation15]   ;;  %s164_s27 = int_to_ptr.hbm [resolvable:$true] %s163_s27 }
  0x28   :  { %s139_s29 = sshll.u32 %s5538_s28, 4  ;;  %s5539_s7 = smov [#allocation18]   ;;  %s140_s29 = int_to_ptr.vmem [resolvable:$true] %s139_s29 }
  0x29   :  { %145 = dma.hbm_to_vmem [thread:$0]  %s138_s6, 128, %s140_s29, [#allocation14], %s5523_s23, %s5523_s23, %s5524_s25  }
  0x2a   :  { %s165_s10 = sshll.u32 %s5539_s7, 4  ;;  %s5540_s9 = smov 256   ;;  %s166_s10 = int_to_ptr.vmem [resolvable:$true] %s165_s10 }
  0x2b   :  { %s5541_s30 = smov 16   ;;  %s189_s2 = sshll.u32 %s6785_s14, 4  ;;  %s190_s2 = int_to_ptr.hbm [resolvable:$true] %s189_s2 }
  0x2c   :  { %171 = dma.hbm_to_vmem [thread:$0]  %s164_s27, 32768, %s166_s10, [#allocation17], %s5540_s9, %s5540_s9, %s5541_s30  }
  0x2d   :  { %s5542_s12 = smov [#allocation21]   ;;  %s202_s3 = sshll.u32 %s6786_s15, 4  ;;  %s203_s3 = int_to_ptr.hbm [resolvable:$true] %s202_s3 }
  0x2e   :  { %s191_s18 = sshll.u32 %s5542_s12, 4  ;;  %s5543_s4 = smov [#allocation22]   ;;  %s192_s18 = int_to_ptr.vmem [resolvable:$true] %s191_s18 }
  0x2f   :  { %197 = dma.hbm_to_vmem [thread:$0]  %s190_s2, 32768, %s192_s18, [#allocation20], %s5535_s20, %s5535_s20, %s5536_s21  }
  0x30   :  { %s204_s22 = sshll.u32 %s5543_s4, 4  ;;  %s205_s22 = int_to_ptr.vmem [resolvable:$true] %s204_s22 }
  0x31   :  { %210 = dma.hbm_to_vmem [thread:$0]  %s203_s3, 128, %s205_s22, [#allocation23], %s5523_s23, %s5523_s23, %s5524_s25  }
  0x32   :  { %5482 = dma.done.wait [#allocation3], 32  }
  0x33   :  { %5483 = vsyncadd [#allocation3], 4294967264 }
  0x34   :  { %5484 = dma.done.wait [#allocation5], 49184  }
  0x35   :  { %5485 = vsyncadd [#allocation5], 4294918112 }
  0x36   :  { %5486 = dma.done.wait [#allocation8], 16768  }
  0x37   :  { %5487 = vsyncadd [#allocation8], 4294950528 }
  0x38   :  { %5488 = dma.done.wait [#allocation11], 256  }
  0x39   :  { %5489 = vsyncadd [#allocation11], 4294967040 }
  0x3a   :  { %5490 = dma.done.wait [#allocation14], 256  }
  0x3b   :  { %5491 = vsyncadd [#allocation14], 4294967040 }
  0x3c   :  { %5492 = dma.done.wait [#allocation17], 32896  }
  0x3d   :  { %5493 = vsyncadd [#allocation17], 4294934400 }
  0x3e   :  { %5494 = dma.done.wait [#allocation20], 33024  }
  0x3f   :  { %5495 = vsyncadd [#allocation20], 4294934272 }
  0x40   :  { %5496 = dma.done.wait [#allocation23], 128  }
  0x41   :  { %5497 = vsyncadd [#allocation23], 4294967168  ;;  %v5703_v0 = vld [vmem:[%s6772_s1] sm:$0x1]  ;;  %v5708_v1 = vld [vmem:[%s6772_s1 + $0x1] sm:$0x1] }
  0x42   :  { %s6790_s24 = sld [smem:[#allocation32_spill]]  ;;  %v5544_v8 = vmov 256.0   ;;  %v274_v39 = vld [vmem:[#allocation2] sm:$0x3]  ;;  %v275_v42 = vld [vmem:[#allocation4] sm:$0x3] }
  0x43   :  { %5016 = vrcp.f32 %v5544_v8  ;;  %v334_v45 = vperm.slane %v274_v39, 0  ;;  %v335_v46 = vperm.slane %v274_v39, 1  ;;  %v343_v49 = vperm.slane %v275_v42, 0  ;;  %s5736_s1 = smov 0  }
  0x44   :  { %v344_v50 = vperm.slane %v275_v42, 1 }
  0x48   :  { %v270_v2 = vld [vmem:[%s6790_s24] sm:$0xff]  ;;  %v271_v3 = vld [vmem:[%s6790_s24 + $0x8] sm:$0xff]  ;;  %v272_v5 = vld [vmem:[%s6790_s24 + $0x10] sm:$0xff] }
  0x49   :  { %v276_v4 = vadd.f32 %v271_v3, %v270_v2  ;;  %v273_v6 = vld [vmem:[%s6790_s24 + $0x18] sm:$0xff]  ;;  %v5017_v9 = vpop.eup %5016 }
  0x4a   :  { %v279_v7 = vadd.f32 %v273_v6, %v272_v5  ;;  %v283_v10 = vmul.f32 256.0, %v5017_v9  ;;  %vm287_vm0 = vweird.f32 %v5017_v9 }
  0x4b   :  { %277 = vadd.xlane.f32.xlu0 %v276_v4 }
  0x4c   :  { %v284_v11 = vsub.f32 1.0, %v283_v10 }
  0x4e   :  { %v285_v12 = vmul.f32 %v5017_v9, %v284_v11 }
  0x50   :  { %v286_v13 = vadd.f32 %v5017_v9, %v285_v12 }
  0x52   :  { %v5722_v14 = vsel %vm287_vm0, %v5017_v9, %v286_v13 }
  0x53   :  { %280 = vadd.xlane.f32.xlu0 %v279_v7 }
  0xbe   :  { %v278_v15 = vpop.xlane.xlu0 %277 }
  0xbf   :  { %v289_v16 = vmul.f32 %v5722_v14, %v278_v15 }
  0xc1   :  { %v291_v17 = vsub.f32 %v270_v2, %v289_v16  ;;  %v292_v18 = vsub.f32 %v271_v3, %v289_v16 }
  0xc3   :  { %v295_v19 = vmul.f32 %v291_v17, %v291_v17  ;;  %v296_v20 = vmul.f32 %v292_v18, %v292_v18 }
  0xc5   :  { %v299_v21 = vadd.f32 %v296_v20, %v295_v19 }
  0xc6   :  { %v281_v22 = vpop.xlane.xlu0 %280 }
  0xc7   :  { %v290_v23 = vmul.f32 %v5722_v14, %v281_v22  ;;  %300 = vadd.xlane.f32.xlu1 %v299_v21 }
  0xc9   :  { %v293_v24 = vsub.f32 %v272_v5, %v290_v23  ;;  %v294_v25 = vsub.f32 %v273_v6, %v290_v23 }
  0xcb   :  { %v297_v26 = vmul.f32 %v293_v24, %v293_v24  ;;  %v298_v27 = vmul.f32 %v294_v25, %v294_v25 }
  0xcd   :  { %v302_v28 = vadd.f32 %v298_v27, %v297_v26 }
  0xcf   :  { %303 = vadd.xlane.f32.xlu1 %v302_v28 }
 0x13a   :  { %v301_v29 = vpop.xlane.xlu1 %300 }
 0x13b   :  { %v305_v30 = vmul.f32 %v301_v29, %v5722_v14 }
 0x13d   :  { %v307_v31 = vadd.f32 1e-05, %v305_v30 }
 0x13f   :  { %5018 = vrsqrt.f32 %v307_v31  ;;  %vm315_vm2 = vweird.f32 %v307_v31 }
 0x142   :  { %v304_v32 = vpop.xlane.xlu1 %303 }
 0x143   :  { %v306_v33 = vmul.f32 %v304_v32, %v5722_v14 }
 0x145   :  { %v5019_v34 = vpop.eup %5018  ;;  %v308_v35 = vadd.f32 1e-05, %v306_v33 }
 0x146   :  { %v310_v36 = vmul.f32 %v5019_v34, %v307_v31  ;;  %vm316_vm1 = vweird.f32 %v5019_v34 }
 0x147   :  { %5020 = vrsqrt.f32 %v308_v35  ;;  %vm317_vm3 = vmor %vm315_vm2, %vm316_vm1  ;;  %vm325_vm5 = vweird.f32 %v308_v35 }
 0x148   :  { %v311_v37 = vmul.f32 %v5019_v34, %v310_v36 }
 0x14a   :  { %v312_v38 = vmul.f32 0.5, %v311_v37 }
 0x14c   :  { %v313_v40 = vsub.f32 1.5, %v312_v38 }
 0x14d   :  { %v5021_v41 = vpop.eup %5020 }
 0x14e   :  { %v314_v43 = vmul.f32 %v5019_v34, %v313_v40  ;;  %v320_v44 = vmul.f32 %v5021_v41, %v308_v35  ;;  %vm326_vm4 = vweird.f32 %v5021_v41 }
 0x14f   :  { %vm327_vm6 = vmor %vm325_vm5, %vm326_vm4 }
 0x150   :  { %v318_v47 = vsel %vm317_vm3, %v5019_v34, %v314_v43  ;;  %v321_v48 = vmul.f32 %v5021_v41, %v320_v44 }
 0x151   :  { %v329_v51 = vmul.f32 %v318_v47, %v291_v17  ;;  %v330_v52 = vmul.f32 %v318_v47, %v292_v18 }
 0x152   :  { %v322_v53 = vmul.f32 0.5, %v321_v48 }
 0x153   :  { %v338_v54 = vmul.f32 %v334_v45, %v329_v51  ;;  %v339_v55 = vmul.f32 %v335_v46, %v330_v52 }
 0x154   :  { %v323_v56 = vsub.f32 1.5, %v322_v53 }
 0x155   :  { %v347_v57 = vadd.f32 %v343_v49, %v338_v54   ;;  %v348_v58 = vadd.f32 %v344_v50, %v339_v55  }
 0x156   :  { %v324_v59 = vmul.f32 %v5021_v41, %v323_v56 }
 0x158   :  { %v328_v60 = vsel %vm327_vm6, %v5021_v41, %v324_v59 }
 0x159   :  { %v331_v61 = vmul.f32 %v328_v60, %v293_v24  ;;  %v332_v62 = vmul.f32 %v328_v60, %v294_v25 }
 0x15b   :  { %v340_v63 = vmul.f32 %v334_v45, %v331_v61  ;;  %v341_v2 = vmul.f32 %v335_v46, %v332_v62 }
 0x15d   :  { %v349_v3 = vadd.f32 %v343_v49, %v340_v63   ;;  %v350_v4 = vadd.f32 %v344_v50, %v341_v2  }
 0x15e LB: > { %v366_v5 = vadd.f32 %v5508_v58, %v5512_v57  ;;  %v369_v6 = vadd.f32 %v5500_v4, %v5504_v3  ;;  %s4685_s28 = smul.u32 768, %s5516_s1  ;;  %s5913_s7 = sshll.u32 %s5516_s1, 1  ;;  %vm1277_vm13 = vcmask 261120   ;;  %vm1582_vm14 = vcmask 64512   ;;  %s5516_s1 = sphi %s5736_s1, %s356_s1   ;;  %v5512_v57 = vphi %v347_v57, %v6794_v57   ;;  %v5508_v58 = vphi %v348_v58, %v6793_v58   ;;  %v5504_v3 = vphi %v349_v3, %v6792_v3   ;;  %v5500_v4 = vphi %v350_v4, %v6791_v4  }
 0x15f   : > { %s362_s10 = scalar_lea.vmem [#allocation12], %s5913_s7  ;;  %s364_s9 = scalar_lea.vmem [#allocation13], %s5913_s7  ;;  %vm1778_vm15 = vcmask 1043456   ;;  %vm2130_vm0 = vcmask 523264   ;;  %vm2133_vm1 = vcmask 785408  }
 0x160   : > { %367 = vadd.xlane.f32.xlu0 %v366_v5  ;;  %s5758_s29 = scalar_lea.vmem [#allocation6], %s4685_s28  ;;  %s535_s30 = smul.u32 6, %s5516_s1 }
 0x161   : > { %v3793_v7 = vld [vmem:[%s5758_s29 + $0x150] sm:$0xf]  ;;  %v4731_v8 = vld [vmem:[%s5758_s29 + $0x164] sm:$0xf0]  ;;  %v4728_v12 = vld [vmem:[%s5758_s29 + $0x154] sm:$0xf] }
 0x162   : > { %v3985_v9 = vld [vmem:[%s5758_s29 + $0x2d0] sm:$0xf]  ;;  %v3794_v10 = vor.u32 %v4731_v8, %v3793_v7  ;;  %v4779_v11 = vld [vmem:[%s5758_s29 + $0x2e4] sm:$0xf0]  ;;  %v3795_v13 = vld [vmem:[%s5758_s29 + $0x168] sm:$0xf0] }
 0x163   : > { %v3986_v15 = vor.u32 %v4779_v11, %v3985_v9  ;;  %v3798_v16 = vor.u32 %v4728_v12, %v3795_v13  ;;  %v4776_v17 = vld [vmem:[%s5758_s29 + $0x2d4] sm:$0xf]  ;;  %v3987_v18 = vld [vmem:[%s5758_s29 + $0x2e8] sm:$0xf0]  ;;  %v3769_v19 = vld [vmem:[%s5758_s29 + $0x120] sm:$0xf] }
 0x164   : > { %1031 = vmatpush.bf16.msra.mxu0 %v3794_v10  ;;  %v3990_v20 = vor.u32 %v4776_v17, %v3987_v18  ;;  %v4725_v21 = vld [vmem:[%s5758_s29 + $0x134] sm:$0xf0]  ;;  %v3961_v22 = vld [vmem:[%s5758_s29 + $0x2a0] sm:$0xf]  ;;  %v4722_v26 = vld [vmem:[%s5758_s29 + $0x124] sm:$0xf] }
 0x165   : > { %v4773_v23 = vld [vmem:[%s5758_s29 + $0x2b4] sm:$0xf0]  ;;  %1045 = vmatpush.bf16.msra.mxu1 %v3986_v15  ;;  %1059 = vmatpush.bf16.msra.mxu2 %v3798_v16  ;;  %v3770_v24 = vor.u32 %v4725_v21, %v3769_v19  ;;  %v3771_v27 = vld [vmem:[%s5758_s29 + $0x138] sm:$0xf0]  ;;  %v4770_v28 = vld [vmem:[%s5758_s29 + $0x2a4] sm:$0xf] }
 0x166   : > { %v3962_v25 = vor.u32 %v4773_v23, %v3961_v22  ;;  %1073 = vmatpush.bf16.msra.mxu3 %v3990_v20  ;;  %v3774_v29 = vor.u32 %v4722_v26, %v3771_v27  ;;  %v3963_v30 = vld [vmem:[%s5758_s29 + $0x2b8] sm:$0xf0]  ;;  %v3745_v31 = vld [vmem:[%s5758_s29 + $0xf0] sm:$0xf]  ;;  %v4719_v32 = vld [vmem:[%s5758_s29 + $0x104] sm:$0xf0] }
 0x167   : > { %v3966_v33 = vor.u32 %v4770_v28, %v3963_v30  ;;  %v3937_v34 = vld [vmem:[%s5758_s29 + $0x270] sm:$0xf]  ;;  %v4767_v35 = vld [vmem:[%s5758_s29 + $0x284] sm:$0xf0]  ;;  %v4716_v36 = vld [vmem:[%s5758_s29 + $0xf4] sm:$0xf]  ;;  %v3746_v37 = vor.u32 %v4719_v32, %v3745_v31 }
 0x168   : > { %370 = vadd.xlane.f32.xlu0 %v369_v6  ;;  %1032 = vmatpush.bf16.msra.mxu0 %v3770_v24  ;;  %v3747_v38 = vld [vmem:[%s5758_s29 + $0x108] sm:$0xf0]  ;;  %v4764_v39 = vld [vmem:[%s5758_s29 + $0x274] sm:$0xf]  ;;  %v3938_v41 = vor.u32 %v4767_v35, %v3937_v34  ;;  %v3721_v43 = vld [vmem:[%s5758_s29 + $0xc0] sm:$0xf] }
 0x169   : > { %v3939_v40 = vld [vmem:[%s5758_s29 + $0x288] sm:$0xf0]  ;;  %1046 = vmatpush.bf16.msra.mxu1 %v3962_v25  ;;  %1060 = vmatpush.bf16.msra.mxu2 %v3774_v29  ;;  %v3750_v42 = vor.u32 %v4716_v36, %v3747_v38  ;;  %v4713_v44 = vld [vmem:[%s5758_s29 + $0xd4] sm:$0xf0]  ;;  %v3913_v45 = vld [vmem:[%s5758_s29 + $0x240] sm:$0xf] }
 0x16a   : > { %1074 = vmatpush.bf16.msra.mxu3 %v3966_v33  ;;  %v3942_v46 = vor.u32 %v4764_v39, %v3939_v40  ;;  %v4761_v47 = vld [vmem:[%s5758_s29 + $0x254] sm:$0xf0]  ;;  %v4710_v48 = vld [vmem:[%s5758_s29 + $0xc4] sm:$0xf]  ;;  %v3723_v49 = vld [vmem:[%s5758_s29 + $0xd8] sm:$0xf0]  ;;  %v3722_v52 = vor.u32 %v4713_v44, %v3721_v43 }
 0x16b   : > { %v4758_v50 = vld [vmem:[%s5758_s29 + $0x244] sm:$0xf]  ;;  %v3915_v51 = vld [vmem:[%s5758_s29 + $0x258] sm:$0xf0]  ;;  %v3914_v53 = vor.u32 %v4761_v47, %v3913_v45  ;;  %v3726_v54 = vor.u32 %v4710_v48, %v3723_v49  ;;  %v3697_v55 = vld [vmem:[%s5758_s29 + $0x90] sm:$0xf] }
 0x16c   : > { %1033 = vmatpush.bf16.msra.mxu0 %v3746_v37  ;;  %v4707_v56 = vld [vmem:[%s5758_s29 + $0xa4] sm:$0xf0]  ;;  %v3889_v59 = vld [vmem:[%s5758_s29 + $0x210] sm:$0xf]  ;;  %v3918_v60 = vor.u32 %v4758_v50, %v3915_v51  ;;  %v4704_v62 = vld [vmem:[%s5758_s29 + $0x94] sm:$0xf] }
 0x16d   : > { %1047 = vmatpush.bf16.msra.mxu1 %v3938_v41  ;;  %1061 = vmatpush.bf16.msra.mxu2 %v3750_v42  ;;  %v4755_v61 = vld [vmem:[%s5758_s29 + $0x224] sm:$0xf0]  ;;  %v3699_v63 = vld [vmem:[%s5758_s29 + $0xa8] sm:$0xf0]  ;;  %v4752_v2 = vld [vmem:[%s5758_s29 + $0x214] sm:$0xf]  ;;  %v3698_v7 = vor.u32 %v4707_v56, %v3697_v55 }
 0x16e   : > { %1075 = vmatpush.bf16.msra.mxu3 %v3942_v46  ;;  %v3891_v5 = vld [vmem:[%s5758_s29 + $0x228] sm:$0xf0]  ;;  %v3890_v9 = vor.u32 %v4755_v61, %v3889_v59  ;;  %v3702_v10 = vor.u32 %v4704_v62, %v3699_v63  ;;  %v3673_v25 = vld [vmem:[%s5758_s29 + $0x60] sm:$0xf]  ;;  %v4701_v26 = vld [vmem:[%s5758_s29 + $0x74] sm:$0xf0] }
 0x16f   : > { %v3894_v11 = vor.u32 %v4752_v2, %v3891_v5  ;;  %v3865_v27 = vld [vmem:[%s5758_s29 + $0x1e0] sm:$0xf]  ;;  %v3674_v28 = vor.u32 %v4701_v26, %v3673_v25  ;;  %v4749_v29 = vld [vmem:[%s5758_s29 + $0x1f4] sm:$0xf0]  ;;  %v4698_v30 = vld [vmem:[%s5758_s29 + $0x64] sm:$0xf] }
 0x170   : > { %1034 = vmatpush.bf16.msra.mxu0 %v3722_v52  ;;  %v3675_v31 = vld [vmem:[%s5758_s29 + $0x78] sm:$0xf0]  ;;  %v3866_v32 = vor.u32 %v4749_v29, %v3865_v27  ;;  %v4746_v34 = vld [vmem:[%s5758_s29 + $0x1e4] sm:$0xf]  ;;  %v3649_v37 = vld [vmem:[%s5758_s29 + $0x30] sm:$0xf] }
 0x171   : > { %1048 = vmatpush.bf16.msra.mxu1 %v3914_v53  ;;  %1062 = vmatpush.bf16.msra.mxu2 %v3726_v54  ;;  %v3678_v33 = vor.u32 %v4698_v30, %v3675_v31  ;;  %v3867_v35 = vld [vmem:[%s5758_s29 + $0x1f8] sm:$0xf0]  ;;  %v4695_v38 = vld [vmem:[%s5758_s29 + $0x44] sm:$0xf0]  ;;  %v3841_v39 = vld [vmem:[%s5758_s29 + $0x1b0] sm:$0xf] }
 0x172   : > { %1076 = vmatpush.bf16.msra.mxu3 %v3918_v60  ;;  %v3870_v36 = vor.u32 %v4746_v34, %v3867_v35  ;;  %v3650_v40 = vor.u32 %v4695_v38, %v3649_v37  ;;  %v4743_v41 = vld [vmem:[%s5758_s29 + $0x1c4] sm:$0xf0]  ;;  %v4692_v42 = vld [vmem:[%s5758_s29 + $0x34] sm:$0xf]  ;;  %v3651_v43 = vld [vmem:[%s5758_s29 + $0x48] sm:$0xf0] }
 0x173   : > { %v3842_v44 = vor.u32 %v4743_v41, %v3841_v39  ;;  %v3654_v45 = vor.u32 %v4692_v42, %v3651_v43  ;;  %v4740_v46 = vld [vmem:[%s5758_s29 + $0x1b4] sm:$0xf]  ;;  %v3843_v47 = vld [vmem:[%s5758_s29 + $0x1c8] sm:$0xf0]  ;;  %v3625_v49 = vld [vmem:[%s5758_s29] sm:$0xf] }
 0x174   : > { %1035 = vmatpush.bf16.msra.mxu0 %v3698_v7  ;;  %v3846_v48 = vor.u32 %v4740_v46, %v3843_v47  ;;  %v4689_v50 = vld [vmem:[%s5758_s29 + $0x14] sm:$0xf0]  ;;  %v3817_v51 = vld [vmem:[%s5758_s29 + $0x180] sm:$0xf]  ;;  %v4686_v54 = vld [vmem:[%s5758_s29 + $0x4] sm:$0xf] }
 0x175   : > { %1049 = vmatpush.bf16.msra.mxu1 %v3890_v9  ;;  %1063 = vmatpush.bf16.msra.mxu2 %v3702_v10  ;;  %v3626_v52 = vor.u32 %v4689_v50, %v3625_v49  ;;  %v4737_v53 = vld [vmem:[%s5758_s29 + $0x194] sm:$0xf0]  ;;  %v3627_v55 = vld [vmem:[%s5758_s29 + $0x18] sm:$0xf0]  ;;  %v4734_v60 = vld [vmem:[%s5758_s29 + $0x184] sm:$0xf] }
 0x176   : > { %1077 = vmatpush.bf16.msra.mxu3 %v3894_v11  ;;  %v3818_v56 = vor.u32 %v4737_v53, %v3817_v51  ;;  %v3630_v59 = vor.u32 %v4686_v54, %v3627_v55  ;;  %v3819_v61 = vld [vmem:[%s5758_s29 + $0x198] sm:$0xf0]  ;;  %v3801_v62 = vld [vmem:[%s5758_s29 + $0x158] sm:$0xf]  ;;  %v4732_v2 = vld [vmem:[%s5758_s29 + $0x16c] sm:$0xf0] }
 0x177   : > { %v3822_v63 = vor.u32 %v4734_v60, %v3819_v61  ;;  %v3993_v5 = vld [vmem:[%s5758_s29 + $0x2d8] sm:$0xf]  ;;  %v3802_v7 = vor.u32 %v4732_v2, %v3801_v62  ;;  %v4729_v9 = vld [vmem:[%s5758_s29 + $0x15c] sm:$0xf]  ;;  %v3803_v10 = vld [vmem:[%s5758_s29 + $0x170] sm:$0xf0] }
 0x178   : > { %1036 = vmatpush.bf16.msra.mxu0 %v3674_v28  ;;  %v4777_v11 = vld [vmem:[%s5758_s29 + $0x2dc] sm:$0xf]  ;;  %v4723_v25 = vld [vmem:[%s5758_s29 + $0x12c] sm:$0xf]  ;;  %v3779_v27 = vld [vmem:[%s5758_s29 + $0x140] sm:$0xf0] }
 0x179   : > { %1050 = vmatpush.bf16.msra.mxu1 %v3866_v32  ;;  %1064 = vmatpush.bf16.msra.mxu2 %v3678_v33  ;;  %v4771_v28 = vld [vmem:[%s5758_s29 + $0x2ac] sm:$0xf]  ;;  %v3971_v29 = vld [vmem:[%s5758_s29 + $0x2c0] sm:$0xf0]  ;;  %v3782_v30 = vor.u32 %v4723_v25, %v3779_v27  ;;  %v3753_v32 = vld [vmem:[%s5758_s29 + $0xf8] sm:$0xf] }
 0x17a   : > { %1078 = vmatpush.bf16.msra.mxu3 %v3870_v36  ;;  %v3974_v31 = vor.u32 %v4771_v28, %v3971_v29  ;;  %v4720_v33 = vld [vmem:[%s5758_s29 + $0x10c] sm:$0xf0]  ;;  %v3945_v34 = vld [vmem:[%s5758_s29 + $0x278] sm:$0xf]  ;;  %v4717_v37 = vld [vmem:[%s5758_s29 + $0xfc] sm:$0xf] }
 0x17b   : > { %v3754_v35 = vor.u32 %v4720_v33, %v3753_v32  ;;  %v4768_v36 = vld [vmem:[%s5758_s29 + $0x28c] sm:$0xf0]  ;;  %v3755_v38 = vld [vmem:[%s5758_s29 + $0x110] sm:$0xf0]  ;;  %v4765_v41 = vld [vmem:[%s5758_s29 + $0x27c] sm:$0xf] }
 0x17c   : > { %1037 = vmatpush.bf16.msra.mxu0 %v3650_v40  ;;  %v3946_v39 = vor.u32 %v4768_v36, %v3945_v34  ;;  %v3758_v40 = vor.u32 %v4717_v37, %v3755_v38  ;;  %v3947_v42 = vld [vmem:[%s5758_s29 + $0x290] sm:$0xf0]  ;;  %v3921_v46 = vld [vmem:[%s5758_s29 + $0x248] sm:$0xf]  ;;  %v4711_v49 = vld [vmem:[%s5758_s29 + $0xcc] sm:$0xf] }
 0x17d   : > { %1051 = vmatpush.bf16.msra.mxu1 %v3842_v44  ;;  %1065 = vmatpush.bf16.msra.mxu2 %v3654_v45  ;;  %v3950_v43 = vor.u32 %v4765_v41, %v3947_v42  ;;  %v3729_v44 = vld [vmem:[%s5758_s29 + $0xc8] sm:$0xf]  ;;  %v4714_v45 = vld [vmem:[%s5758_s29 + $0xdc] sm:$0xf0]  ;;  %v3731_v50 = vld [vmem:[%s5758_s29 + $0xe0] sm:$0xf0] }
 0x17e   : > { %1079 = vmatpush.bf16.msra.mxu3 %v3846_v48  ;;  %v3730_v47 = vor.u32 %v4714_v45, %v3729_v44  ;;  %v4762_v48 = vld [vmem:[%s5758_s29 + $0x25c] sm:$0xf0]  ;;  %v4759_v53 = vld [vmem:[%s5758_s29 + $0x24c] sm:$0xf]  ;;  %v3923_v54 = vld [vmem:[%s5758_s29 + $0x260] sm:$0xf0] }
 0x17f   : > { %v3922_v51 = vor.u32 %v4762_v48, %v3921_v46  ;;  %v3926_v55 = vor.u32 %v4759_v53, %v3923_v54  ;;  %v3897_v60 = vld [vmem:[%s5758_s29 + $0x218] sm:$0xf]  ;;  %v4756_v62 = vld [vmem:[%s5758_s29 + $0x22c] sm:$0xf0]  ;;  %v3707_v2 = vld [vmem:[%s5758_s29 + $0xb0] sm:$0xf0] }
 0x180   : > { %1038 = vmatpush.bf16.msra.mxu0 %v3626_v52  ;;  %v3734_v52 = vor.u32 %v4711_v49, %v3731_v50  ;;  %v3875_v25 = vld [vmem:[%s5758_s29 + $0x200] sm:$0xf0]  ;;  %v3657_v28 = vld [vmem:[%s5758_s29 + $0x38] sm:$0xf]  ;;  %v4696_v29 = vld [vmem:[%s5758_s29 + $0x4c] sm:$0xf0] }
 0x181   : > { %1052 = vmatpush.bf16.msra.mxu1 %v3818_v56  ;;  %1066 = vmatpush.bf16.msra.mxu2 %v3630_v59  ;;  %v3705_v56 = vld [vmem:[%s5758_s29 + $0x98] sm:$0xf]  ;;  %v4708_v59 = vld [vmem:[%s5758_s29 + $0xac] sm:$0xf0]  ;;  %v3658_v32 = vor.u32 %v4696_v29, %v3657_v28  ;;  %v4693_v34 = vld [vmem:[%s5758_s29 + $0x3c] sm:$0xf] }
 0x182   : > { %1080 = vmatpush.bf16.msra.mxu3 %v3822_v63  ;;  %v3706_v61 = vor.u32 %v4708_v59, %v3705_v56  ;;  %v4705_v63 = vld [vmem:[%s5758_s29 + $0x9c] sm:$0xf]  ;;  %v4744_v33 = vld [vmem:[%s5758_s29 + $0x1cc] sm:$0xf0]  ;;  %v3633_v42 = vld [vmem:[%s5758_s29 + $0x8] sm:$0xf] }
 0x183   : > { %v4741_v38 = vld [vmem:[%s5758_s29 + $0x1bc] sm:$0xf]  ;;  %v3825_v44 = vld [vmem:[%s5758_s29 + $0x188] sm:$0xf]  ;;  %v4738_v46 = vld [vmem:[%s5758_s29 + $0x19c] sm:$0xf0] }
 0x184   : > { %1087 = vmatpush.bf16.msrb.mxu0 %v3802_v7  ;;  %v4753_v7 = vld [vmem:[%s5758_s29 + $0x21c] sm:$0xf]  ;;  %v3635_v48 = vld [vmem:[%s5758_s29 + $0x20] sm:$0xf0]  ;;  %v3826_v49 = vor.u32 %v4738_v46, %v3825_v44  ;;  %v3785_v44 = vld [vmem:[%s5758_s29 + $0x130] sm:$0xf] }
 0x185   : > { %s536_s0 = scalar_lea.vmem [#allocation7], %s535_s30  ;;  %s5545_s17 = smov 96  }
 0x186   : > { %s5546_s2 = smov 32   ;;  %s5547_s12 = smov 64  }
 0x187   : > { %s4782_s18 = sshll.u32 %s5516_s1, 8  ;;  %s2179_s11 = scalar_lea.vmem [#allocation10], %s5913_s7 }
 0x188   : > { %s6333_s19 = scalar_lea.vmem [#allocation9], %s4782_s18  ;;  %s4815_s3 = sshll.u32 %s5516_s1, 9 }
 0x189   : > { %s6438_s4 = scalar_lea.vmem [#allocation18], %s4815_s3  ;;  %s2406_s22 = scalar_lea.vmem [#allocation15], %s5913_s7 }
 0x18a   : > { %s2408_s14 = scalar_lea.vmem [#allocation16], %s5913_s7  ;;  %s6610_s15 = scalar_lea.vmem [#allocation21], %s4815_s3 }
 0x18b   : > { %s4171_s23 = sshll.u32 %s5516_s1, 2  ;;  %s3505_s20 = scalar_lea.vmem [#allocation22], %s5913_s7 }
 0x18c   : > { %s2548_s25 = scalar_lea.vmem [#allocation19], %s4171_s23  ;;  %s356_s1 = sadd.s32 1, %s5516_s1  }
 0x18d   : > { %p353_p0 = scmp.ge.s32.totalorder %s356_s1, 4  }
 0x1d3   : > { %v368_v6 = vpop.xlane.xlu0 %367 }
 0x1d4   : > { %v372_v8 = vmul.f32 %v368_v6, %v5722_v14  ;;  %v4780_v6 = vld [vmem:[%s5758_s29 + $0x2ec] sm:$0xf0] }
 0x1d6   : > { %v5802_v12 = vsub.f32 %v5512_v57, %v372_v8  ;;  %v5805_v13 = vsub.f32 %v5508_v58, %v372_v8  ;;  %v3994_v8 = vor.u32 %v4780_v6, %v3993_v5  ;;  %v3898_v5 = vor.u32 %v4756_v62, %v3897_v60 }
 0x1d7   : > { %v3710_v6 = vor.u32 %v4705_v63, %v3707_v2 }
 0x1d8   : > { %v378_v15 = vmul.f32 %v5802_v12, %v5802_v12  ;;  %v379_v16 = vmul.f32 %v5805_v13, %v5805_v13  ;;  %1101 = vmatpush.bf16.msrb.mxu1 %v3994_v8  ;;  %v3899_v8 = vld [vmem:[%s5758_s29 + $0x230] sm:$0xf0] }
 0x1da   : > { %v382_v17 = vadd.f32 %v379_v16, %v378_v15  ;;  %v3806_v15 = vor.u32 %v4729_v9, %v3803_v10  ;;  %v3995_v16 = vld [vmem:[%s5758_s29 + $0x2f0] sm:$0xf0]  ;;  %v3902_v9 = vor.u32 %v4753_v7, %v3899_v8  ;;  %v3681_v10 = vld [vmem:[%s5758_s29 + $0x68] sm:$0xf]  ;;  %v363_v8 = vld [vmem:[%s362_s10] sm:$0x3] }
 0x1db   : > { %v371_v18 = vpop.xlane.xlu0 %370 }
 0x1dc   : > { %v373_v19 = vmul.f32 %v371_v18, %v5722_v14  ;;  %383 = vadd.xlane.f32.xlu1 %v382_v17  ;;  %v3777_v17 = vld [vmem:[%s5758_s29 + $0x128] sm:$0xf]  ;;  %v4726_v18 = vld [vmem:[%s5758_s29 + $0x13c] sm:$0xf0]  ;;  %1115 = vmatpush.bf16.msrb.mxu2 %v3806_v15 }
 0x1dd   : > { %v3873_v15 = vld [vmem:[%s5758_s29 + $0x1e8] sm:$0xf] }
 0x1de   : > { %v5813_v20 = vsub.f32 %v5504_v3, %v373_v19  ;;  %v5816_v21 = vsub.f32 %v5500_v4, %v373_v19  ;;  %v3998_v19 = vor.u32 %v4777_v11, %v3995_v16  ;;  %v4702_v11 = vld [vmem:[%s5758_s29 + $0x7c] sm:$0xf0] }
 0x1df   : > { %v3682_v16 = vor.u32 %v4702_v11, %v3681_v10 }
 0x1e0   : > { %v380_v22 = vmul.f32 %v5813_v20, %v5813_v20  ;;  %v381_v23 = vmul.f32 %v5816_v21, %v5816_v21  ;;  %1129 = vmatpush.bf16.msrb.mxu3 %v3998_v19  ;;  %1116 = vmatpush.bf16.msrb.mxu2 %v3782_v30  ;;  %v3683_v19 = vld [vmem:[%s5758_s29 + $0x80] sm:$0xf0]  ;;  %v3849_v30 = vld [vmem:[%s5758_s29 + $0x1b8] sm:$0xf] }
 0x1e1   : > { %v3850_v36 = vor.u32 %v4744_v33, %v3849_v30  ;;  %v4781_v33 = vld [vmem:[%s5758_s29 + $0x2f4] sm:$0xf0] }
 0x1e2   : > { %v385_v24 = vadd.f32 %v381_v23, %v380_v22  ;;  %v3778_v22 = vor.u32 %v4726_v18, %v3777_v17  ;;  %v3969_v23 = vld [vmem:[%s5758_s29 + $0x2a8] sm:$0xf]  ;;  %v4750_v17 = vld [vmem:[%s5758_s29 + $0x1fc] sm:$0xf0]  ;;  %v4699_v18 = vld [vmem:[%s5758_s29 + $0x6c] sm:$0xf] }
 0x1e4   : > { %386 = vadd.xlane.f32.xlu1 %v385_v24  ;;  %v4774_v24 = vld [vmem:[%s5758_s29 + $0x2bc] sm:$0xf0]  ;;  %1088 = vmatpush.bf16.msrb.mxu0 %v3778_v22  ;;  %v3874_v22 = vor.u32 %v4750_v17, %v3873_v15  ;;  %v418_v17 = vperm.slane %v363_v8, 1 }
 0x1e5   : > { %v3970_v26 = vor.u32 %v4774_v24, %v3969_v23  ;;  %1130 = vmatpush.bf16.msrb.mxu3 %v3974_v31  ;;  %1117 = vmatpush.bf16.msrb.mxu2 %v3758_v40  ;;  %v3686_v23 = vor.u32 %v4699_v18, %v3683_v19  ;;  %v4747_v24 = vld [vmem:[%s5758_s29 + $0x1ec] sm:$0xf]  ;;  %v365_v15 = vld [vmem:[%s364_s9] sm:$0x3] }
 0x1e7   : > { %1102 = vmatpush.bf16.msrb.mxu1 %v3970_v26  ;;  %v3878_v26 = vor.u32 %v4747_v24, %v3875_v25  ;;  %v427_v24 = vperm.slane %v365_v15, 1 }
 0x1e8   : > { %1089 = vmatpush.bf16.msrb.mxu0 %v3754_v35  ;;  %v3659_v35 = vld [vmem:[%s5758_s29 + $0x50] sm:$0xf0] }
 0x1e9   : > { %1131 = vmatpush.bf16.msrb.mxu3 %v3950_v43  ;;  %1118 = vmatpush.bf16.msrb.mxu2 %v3734_v52  ;;  %v3662_v37 = vor.u32 %v4693_v34, %v3659_v35  ;;  %v4690_v43 = vld [vmem:[%s5758_s29 + $0x1c] sm:$0xf0]  ;;  %v3827_v52 = vld [vmem:[%s5758_s29 + $0x1a0] sm:$0xf0] }
 0x1ea   : > { %v3634_v45 = vor.u32 %v4690_v43, %v3633_v42  ;;  %v4730_v34 = vld [vmem:[%s5758_s29 + $0x164] sm:$0xf] }
 0x1eb   : > { %1103 = vmatpush.bf16.msrb.mxu1 %v3946_v39  ;;  %v3851_v39 = vld [vmem:[%s5758_s29 + $0x1d0] sm:$0xf0] }
 0x1ec   : > { %1090 = vmatpush.bf16.msrb.mxu0 %v3730_v47  ;;  %v3854_v41 = vor.u32 %v4741_v38, %v3851_v39  ;;  %v4687_v47 = vld [vmem:[%s5758_s29 + $0xc] sm:$0xf]  ;;  %v3811_v39 = vld [vmem:[%s5758_s29 + $0x178] sm:$0xf0] }
 0x1ed   : > { %1132 = vmatpush.bf16.msrb.mxu3 %v3926_v55  ;;  %1119 = vmatpush.bf16.msrb.mxu2 %v3710_v6  ;;  %v3638_v50 = vor.u32 %v4687_v47, %v3635_v48  ;;  %v3814_v46 = vor.u32 %v4730_v34, %v3811_v39  ;;  %v3977_v48 = vld [vmem:[%s5758_s29 + $0x2b0] sm:$0xf]  ;;  %v3907_v34 = vld [vmem:[%s5758_s29 + $0x238] sm:$0xf0] }
 0x1ef   : > { %1104 = vmatpush.bf16.msrb.mxu1 %v3922_v51  ;;  %v4735_v51 = vld [vmem:[%s5758_s29 + $0x18c] sm:$0xf] }
 0x1f0   : > { %1091 = vmatpush.bf16.msrb.mxu0 %v3706_v61  ;;  %v3830_v54 = vor.u32 %v4735_v51, %v3827_v52  ;;  %v3787_v51 = vld [vmem:[%s5758_s29 + $0x148] sm:$0xf0]  ;;  %v4772_v52 = vld [vmem:[%s5758_s29 + $0x2b4] sm:$0xf] }
 0x1f1   : > { %1133 = vmatpush.bf16.msrb.mxu3 %v3902_v9  ;;  %1120 = vmatpush.bf16.msrb.mxu2 %v3686_v23  ;;  %v426_v23 = vperm.slane %v365_v15, 0 }
 0x1f3   : > { %1105 = vmatpush.bf16.msrb.mxu1 %v3898_v5 }
 0x1f4   : > { %1092 = vmatpush.bf16.msrb.mxu0 %v3682_v16  ;;  %v417_v16 = vperm.slane %v363_v8, 0 }
 0x1f5   : > { %1134 = vmatpush.bf16.msrb.mxu3 %v3878_v26  ;;  %1121 = vmatpush.bf16.msrb.mxu2 %v3662_v37 }
 0x1f7   : > { %1106 = vmatpush.bf16.msrb.mxu1 %v3874_v22 }
 0x1f8   : > { %1093 = vmatpush.bf16.msrb.mxu0 %v3658_v32  ;;  %v4001_v32 = vld [vmem:[%s5758_s29 + $0x2e0] sm:$0xf] }
 0x1f9   : > { %1135 = vmatpush.bf16.msrb.mxu3 %v3854_v41  ;;  %1122 = vmatpush.bf16.msrb.mxu2 %v3638_v50  ;;  %v4002_v43 = vor.u32 %v4781_v33, %v4001_v32  ;;  %v4724_v50 = vld [vmem:[%s5758_s29 + $0x134] sm:$0xf]  ;;  %v3715_v32 = vld [vmem:[%s5758_s29 + $0xb8] sm:$0xf0]  ;;  %v4754_v33 = vld [vmem:[%s5758_s29 + $0x224] sm:$0xf] }
 0x1fb   : > { %1107 = vmatpush.bf16.msrb.mxu1 %v3850_v36 }
 0x1fc   : > { %1094 = vmatpush.bf16.msrb.mxu0 %v3634_v45  ;;  %v4727_v45 = vld [vmem:[%s5758_s29 + $0x144] sm:$0xf0] }
 0x1fd   : > { %1136 = vmatpush.bf16.msrb.mxu3 %v3830_v54  ;;  %v3786_v54 = vor.u32 %v4727_v45, %v3785_v44  ;;  %v3691_v44 = vld [vmem:[%s5758_s29 + $0x88] sm:$0xf0]  ;;  %v4748_v45 = vld [vmem:[%s5758_s29 + $0x1f4] sm:$0xf] }
 0x1ff   : > { %1108 = vmatpush.bf16.msrb.mxu1 %v3826_v49  ;;  %v4775_v49 = vld [vmem:[%s5758_s29 + $0x2c4] sm:$0xf0] }
 0x24f   : > { %v384_v27 = vpop.xlane.xlu1 %383 }
 0x250   : > { %v388_v31 = vmul.f32 %v384_v27, %v5722_v14 }
 0x252   : > { %v390_v40 = vadd.f32 1e-05, %v388_v31  ;;  %v4733_v31 = vld [vmem:[%s5758_s29 + $0x174] sm:$0xf0] }
 0x254   : > { %5052 = vrsqrt.f32 %v390_v40  ;;  %vm398_vm8 = vweird.f32 %v390_v40 }
 0x257   : > { %v387_v53 = vpop.xlane.xlu1 %386 }
 0x258   : > { %v389_v55 = vmul.f32 %v387_v53, %v5722_v14  ;;  %v3979_v53 = vld [vmem:[%s5758_s29 + $0x2c8] sm:$0xf0] }
 0x25a   : > { %v5053_v56 = vpop.eup %5052  ;;  %v391_v59 = vadd.f32 1e-05, %v389_v55  ;;  %v3978_v55 = vor.u32 %v4775_v49, %v3977_v48  ;;  %v3665_v49 = vld [vmem:[%s5758_s29 + $0x40] sm:$0xf] }
 0x25b   : > { %v393_v60 = vmul.f32 %v5053_v56, %v390_v40  ;;  %vm399_vm7 = vweird.f32 %v5053_v56 }
 0x25c   : > { %5054 = vrsqrt.f32 %v391_v59  ;;  %vm400_vm9 = vmor %vm398_vm8, %vm399_vm7  ;;  %vm408_vm11 = vweird.f32 %v391_v59 }
 0x25d   : > { %v394_v61 = vmul.f32 %v5053_v56, %v393_v60  ;;  %v3790_v60 = vor.u32 %v4724_v50, %v3787_v51  ;;  %v4697_v50 = vld [vmem:[%s5758_s29 + $0x54] sm:$0xf0] }
 0x25f   : > { %v395_v62 = vmul.f32 0.5, %v394_v61  ;;  %v3982_v61 = vor.u32 %v4772_v52, %v3979_v53  ;;  %v3857_v53 = vld [vmem:[%s5758_s29 + $0x1c0] sm:$0xf] }
 0x261   : > { %v396_v63 = vsub.f32 1.5, %v395_v62  ;;  %v3953_v62 = vld [vmem:[%s5758_s29 + $0x280] sm:$0xf] }
 0x262   : > { %v5055_v2 = vpop.eup %5054 }
 0x263   : > { %v397_v5 = vmul.f32 %v5053_v56, %v396_v63  ;;  %v403_v6 = vmul.f32 %v5055_v2, %v391_v59  ;;  %vm409_vm10 = vweird.f32 %v5055_v2  ;;  %v4721_v59 = vld [vmem:[%s5758_s29 + $0x114] sm:$0xf0] }
 0x264   : > { %vm410_vm12 = vmor %vm408_vm11, %vm409_vm10  ;;  %v4769_v63 = vld [vmem:[%s5758_s29 + $0x294] sm:$0xf0] }
 0x265   : > { %v404_v7 = vmul.f32 %v5055_v2, %v403_v6  ;;  %v401_v9 = vsel %vm400_vm9, %v5053_v56, %v397_v5  ;;  %v3761_v56 = vld [vmem:[%s5758_s29 + $0x100] sm:$0xf]  ;;  %v3763_v5 = vld [vmem:[%s5758_s29 + $0x118] sm:$0xf0]  ;;  %v4766_v6 = vld [vmem:[%s5758_s29 + $0x284] sm:$0xf] }
 0x266   : > { %v412_v18 = vmul.f32 %v401_v9, %v5802_v12  ;;  %v413_v19 = vmul.f32 %v401_v9, %v5805_v13  ;;  %v3809_v13 = vld [vmem:[%s5758_s29 + $0x160] sm:$0xf]  ;;  %v3762_v8 = vor.u32 %v4721_v59, %v3761_v56  ;;  %v3954_v9 = vor.u32 %v4769_v63, %v3953_v62  ;;  %v3667_v56 = vld [vmem:[%s5758_s29 + $0x58] sm:$0xf0]  ;;  %v4742_v59 = vld [vmem:[%s5758_s29 + $0x1c4] sm:$0xf] }
 0x267   : > { %v405_v10 = vmul.f32 0.5, %v404_v7  ;;  %v3810_v42 = vor.u32 %v4733_v31, %v3809_v13  ;;  %v3955_v7 = vld [vmem:[%s5758_s29 + $0x298] sm:$0xf0]  ;;  %v4757_v13 = vld [vmem:[%s5758_s29 + $0x234] sm:$0xf0]  ;;  %vm3557_vm9 = vcmask (%p353_p0), 1040384  }
 0x268   : > { %v421_v26 = vmul.f32 %v417_v16, %v412_v18  ;;  %v422_v27 = vmul.f32 %v418_v17, %v413_v19  ;;  %v4763_v18 = vld [vmem:[%s5758_s29 + $0x264] sm:$0xf0]  ;;  %v4712_v19 = vld [vmem:[%s5758_s29 + $0xd4] sm:$0xf]  ;;  %v4706_v31 = vld [vmem:[%s5758_s29 + $0xa4] sm:$0xf] }
 0x269   : > { %v406_v11 = vsub.f32 1.5, %v405_v10  ;;  %v3737_v10 = vld [vmem:[%s5758_s29 + $0xd0] sm:$0xf]  ;;  %v3718_v39 = vor.u32 %v4706_v31, %v3715_v32 }
 0x26a   : > { %v430_v35 = vadd.f32 %v426_v23, %v421_v26  ;;  %v431_v36 = vadd.f32 %v427_v24, %v422_v27  ;;  %v3713_v27 = vld [vmem:[%s5758_s29 + $0xa0] sm:$0xf]  ;;  %v3641_v63 = vld [vmem:[%s5758_s29 + $0x10] sm:$0xf] }
 0x26b   : > { %v407_v22 = vmul.f32 %v5055_v2, %v406_v11  ;;  %v4715_v11 = vld [vmem:[%s5758_s29 + $0xe4] sm:$0xf0] }
 0x26d   : > { %v411_v25 = vsel %vm410_vm12, %v5055_v2, %v407_v22  ;;  %v4718_v2 = vld [vmem:[%s5758_s29 + $0x104] sm:$0xf]  ;;  %v3739_v22 = vld [vmem:[%s5758_s29 + $0xe8] sm:$0xf0] }
 0x26e   : > { %v414_v28 = vmul.f32 %v411_v25, %v5813_v20  ;;  %v415_v12 = vmul.f32 %v411_v25, %v5816_v21  ;;  %v4778_v20 = vld [vmem:[%s5758_s29 + $0x2e4] sm:$0xf]  ;;  %v4003_v21 = vld [vmem:[%s5758_s29 + $0x2f8] sm:$0xf0]  ;;  %v3766_v15 = vor.u32 %v4718_v2, %v3763_v5  ;;  %v3738_v25 = vor.u32 %v4715_v11, %v3737_v10  ;;  %v4691_v2 = vld [vmem:[%s5758_s29 + $0x24] sm:$0xf0] }
 0x26f   : > { %v4006_v47 = vor.u32 %v4778_v20, %v4003_v21  ;;  %v3910_v20 = vor.u32 %v4754_v33, %v3907_v34  ;;  %v3881_v21 = vld [vmem:[%s5758_s29 + $0x1f0] sm:$0xf]  ;;  %v3643_v10 = vld [vmem:[%s5758_s29 + $0x28] sm:$0xf0]  ;;  %v4736_v11 = vld [vmem:[%s5758_s29 + $0x194] sm:$0xf] }
 0x270   : > { %v423_v29 = vmul.f32 %v417_v16, %v414_v28  ;;  %v424_v30 = vmul.f32 %v418_v17, %v415_v12  ;;  %v3958_v16 = vor.u32 %v4766_v6, %v3955_v7  ;;  %v3929_v17 = vld [vmem:[%s5758_s29 + $0x250] sm:$0xf]  ;;  %v4709_v28 = vld [vmem:[%s5758_s29 + $0xb4] sm:$0xf0]  ;;  %v3742_v12 = vor.u32 %v4712_v19, %v3739_v22  ;;  %v6002_v22 = vld [vmem:[%s536_s0] sm:$0x3f] }
 0x271   : > { %v3930_v26 = vor.u32 %v4763_v18, %v3929_v17  ;;  %v3833_v7 = vld [vmem:[%s5758_s29 + $0x190] sm:$0xf] }
 0x272   : > { %v432_v37 = vadd.f32 %v426_v23, %v423_v29  ;;  %v433_v38 = vadd.f32 %v427_v24, %v424_v30  ;;  %v4760_v23 = vld [vmem:[%s5758_s29 + $0x254] sm:$0xf]  ;;  %v3931_v24 = vld [vmem:[%s5758_s29 + $0x268] sm:$0xf0]  ;;  %v3905_v30 = vld [vmem:[%s5758_s29 + $0x220] sm:$0xf] }
 0x273   : > { %v3934_v29 = vor.u32 %v4760_v23, %v3931_v24  ;;  %v539_v24 = vperm.slane %v6002_v22, 0 }
 0x274   : > { %v5929_v40 = vpack.c.bf16 %v432_v37, %v430_v35  ;;  %v5931_v41 = vpack.c.bf16 %v433_v38, %v431_v36  ;;  %v3714_v35 = vor.u32 %v4709_v28, %v3713_v27  ;;  %v3906_v36 = vor.u32 %v4757_v13, %v3905_v30  ;;  %v3689_v37 = vld [vmem:[%s5758_s29 + $0x70] sm:$0xf]  ;;  %v4703_v38 = vld [vmem:[%s5758_s29 + $0x84] sm:$0xf0] }
 0x276   : > { %1039 = vmatmul.bf16.vlgmr.msra.gmra.mxu0 %v5929_v40  ;;  %1053 = vmatmul.bf16.vlgmr.msra.gmra.mxu1 %v5931_v41 }
 0x277   : > { %1067 = vmatmul.bf16.vlgmr.msra.gmra.mxu2 %v5929_v40  ;;  %1081 = vmatmul.bf16.vlgmr.msra.gmra.mxu3 %v5931_v41 }
 0x278   : > { %1143 = vmatpush.bf16.msra.mxu0 %v3810_v42  ;;  %1157 = vmatpush.bf16.msra.mxu1 %v4002_v43  ;;  %v4751_v42 = vld [vmem:[%s5758_s29 + $0x204] sm:$0xf0]  ;;  %v4700_v43 = vld [vmem:[%s5758_s29 + $0x74] sm:$0xf] }
 0x279   : > { %1171 = vmatpush.bf16.msra.mxu2 %v3814_v46  ;;  %1185 = vmatpush.bf16.msra.mxu3 %v4006_v47  ;;  %v3883_v46 = vld [vmem:[%s5758_s29 + $0x208] sm:$0xf0]  ;;  %v3690_v47 = vor.u32 %v4703_v38, %v3689_v37  ;;  %v3882_v48 = vor.u32 %v4751_v42, %v3881_v21  ;;  %v3694_v51 = vor.u32 %v4700_v43, %v3691_v44  ;;  %v542_v21 = vperm.slane %v6002_v22, 3 }
 0x27a   : > { %v3886_v52 = vor.u32 %v4748_v45, %v3883_v46 }
 0x27c   : > { %1144 = vmatpush.bf16.msra.mxu0 %v3786_v54  ;;  %1158 = vmatpush.bf16.msra.mxu1 %v3978_v55  ;;  %v4745_v54 = vld [vmem:[%s5758_s29 + $0x1d4] sm:$0xf0]  ;;  %v4694_v55 = vld [vmem:[%s5758_s29 + $0x44] sm:$0xf] }
 0x27d   : > { %1172 = vmatpush.bf16.msra.mxu2 %v3790_v60  ;;  %1186 = vmatpush.bf16.msra.mxu3 %v3982_v61  ;;  %v3859_v60 = vld [vmem:[%s5758_s29 + $0x1d8] sm:$0xf0]  ;;  %v3666_v61 = vor.u32 %v4697_v50, %v3665_v49  ;;  %v3858_v62 = vor.u32 %v4745_v54, %v3857_v53  ;;  %v3670_v5 = vor.u32 %v4694_v55, %v3667_v56 }
 0x27e   : > { %v3862_v6 = vor.u32 %v4742_v59, %v3859_v60 }
 0x280   : > { %1145 = vmatpush.bf16.msra.mxu0 %v3762_v8  ;;  %1159 = vmatpush.bf16.msra.mxu1 %v3954_v9  ;;  %v4739_v8 = vld [vmem:[%s5758_s29 + $0x1a4] sm:$0xf0]  ;;  %v4688_v9 = vld [vmem:[%s5758_s29 + $0x14] sm:$0xf] }
 0x281   : > { %1173 = vmatpush.bf16.msra.mxu2 %v3766_v15  ;;  %1187 = vmatpush.bf16.msra.mxu3 %v3958_v16  ;;  %v3835_v15 = vld [vmem:[%s5758_s29 + $0x1a8] sm:$0xf0]  ;;  %v3642_v16 = vor.u32 %v4691_v2, %v3641_v63  ;;  %v3834_v17 = vor.u32 %v4739_v8, %v3833_v7  ;;  %v3646_v18 = vor.u32 %v4688_v9, %v3643_v10 }
 0x282   : > { %v3838_v19 = vor.u32 %v4736_v11, %v3835_v15 }
 0x284   : > { %1146 = vmatpush.bf16.msra.mxu0 %v3738_v25  ;;  %1160 = vmatpush.bf16.msra.mxu1 %v3930_v26  ;;  %v540_v26 = vperm.slane %v6002_v22, 1 }
 0x285   : > { %1174 = vmatpush.bf16.msra.mxu2 %v3742_v12  ;;  %1188 = vmatpush.bf16.msra.mxu3 %v3934_v29 }
 0x286   : > { %1095 = vmatmul.bf16.vlgmr.msrb.gmra.mxu0 %v5929_v40  ;;  %1109 = vmatmul.bf16.vlgmr.msrb.gmra.mxu1 %v5931_v41 }
 0x287   : > { %1123 = vmatmul.bf16.vlgmr.msrb.gmra.mxu2 %v5929_v40  ;;  %1137 = vmatmul.bf16.vlgmr.msrb.gmra.mxu3 %v5931_v41 }
 0x288   : > { %1147 = vmatpush.bf16.msra.mxu0 %v3714_v35  ;;  %1161 = vmatpush.bf16.msra.mxu1 %v3906_v36 }
 0x289   : > { %1175 = vmatpush.bf16.msra.mxu2 %v3718_v39  ;;  %1189 = vmatpush.bf16.msra.mxu3 %v3910_v20  ;;  %v541_v39 = vperm.slane %v6002_v22, 2 }
 0x28c   : > { %1148 = vmatpush.bf16.msra.mxu0 %v3690_v47  ;;  %1162 = vmatpush.bf16.msra.mxu1 %v3882_v48 }
 0x28d   : > { %1176 = vmatpush.bf16.msra.mxu2 %v3694_v51  ;;  %1190 = vmatpush.bf16.msra.mxu3 %v3886_v52 }
 0x290   : > { %1149 = vmatpush.bf16.msra.mxu0 %v3666_v61  ;;  %1163 = vmatpush.bf16.msra.mxu1 %v3858_v62 }
 0x291   : > { %1177 = vmatpush.bf16.msra.mxu2 %v3670_v5  ;;  %1191 = vmatpush.bf16.msra.mxu3 %v3862_v6 }
 0x294   : > { %1150 = vmatpush.bf16.msra.mxu0 %v3642_v16  ;;  %1164 = vmatpush.bf16.msra.mxu1 %v3834_v17 }
 0x295   : > { %1178 = vmatpush.bf16.msra.mxu2 %v3646_v18  ;;  %1192 = vmatpush.bf16.msra.mxu3 %v3838_v19 }
 0x297   : > { %1151 = vmatmul.bf16.vlgmr.msra.gmra.mxu0 %v5929_v40  ;;  %1165 = vmatmul.bf16.vlgmr.msra.gmra.mxu1 %v5931_v41 }
 0x298   : > { %1179 = vmatmul.bf16.vlgmr.msra.gmra.mxu2 %v5929_v40  ;;  %1193 = vmatmul.bf16.vlgmr.msra.gmra.mxu3 %v5931_v41 }
 0x2f3   : > { %v1040_v23 = vpop.f32.mrf.mxu0  ;;  %v1054_v25 = vpop.f32.mrf.mxu1 }
 0x2f4   : > { %v1041_v27 = vadd.f32 %v1040_v23, %v539_v24 }
 0x2f6   : > { %v1055_v13 = vadd.f32 %v1054_v25, %v1041_v27 }
 0x2fa   : > { %v1068_v28 = vpop.f32.mrf.mxu2  ;;  %v1082_v12 = vpop.f32.mrf.mxu3 }
 0x2fb   : > { %v1069_v29 = vadd.f32 %v1068_v28, %v540_v26  ;;  %v1042_v30 = vpop.f32.mrf.mxu0  ;;  %v1056_v41 = vpop.f32.mrf.mxu1 }
 0x2fc   : > { %v1043_v32 = vadd.f32 %v1042_v30, %v539_v24 }
 0x2fd   : > { %v1083_v31 = vadd.f32 %v1082_v12, %v1069_v29 }
 0x2fe   : > { %v1057_v37 = vadd.f32 %v1056_v41, %v1043_v32 }
 0x2ff   : > { %v6006_v40 = vpack.c.bf16 %v1083_v31, %v1055_v13 }
 0x301   : > { %1209 = vrot.lane.b32.xlu0 %v6006_v40, %s5545_s17 }
 0x302   : > { %v1070_v33 = vpop.f32.mrf.mxu2  ;;  %v1084_v34 = vpop.f32.mrf.mxu3 }
 0x303   : > { %v1071_v35 = vadd.f32 %v1070_v33, %v540_v26  ;;  %v1096_v36 = vpop.f32.mrf.mxu0  ;;  %v1110_v43 = vpop.f32.mrf.mxu1 }
 0x304   : > { %v1097_v42 = vadd.f32 %v1096_v36, %v541_v39 }
 0x305   : > { %v1085_v38 = vadd.f32 %v1084_v34, %v1071_v35 }
 0x306   : > { %v1111_v47 = vadd.f32 %v1110_v43, %v1097_v42 }
 0x307   : > { %v6011_v20 = vpack.c.bf16 %v1085_v38, %v1057_v37  ;;  %v6068_v37 = vperm.slane %v5703_v0, 0 }
 0x309   : > { %1211 = vrot.lane.b32.xlu1 %v6011_v20, %s5545_s17  ;;  %1223 = vrot.lane.b32.xlu0 %v6011_v20, %s5546_s2 }
 0x30a   : > { %v1124_v44 = vpop.f32.mrf.mxu2  ;;  %v1138_v45 = vpop.f32.mrf.mxu3 }
 0x30b   : > { %v1125_v46 = vadd.f32 %v1124_v44, %v542_v21  ;;  %v1098_v49 = vpop.f32.mrf.mxu0  ;;  %v1112_v55 = vpop.f32.mrf.mxu1 }
 0x30c   : > { %v1099_v51 = vadd.f32 %v1098_v49, %v541_v39 }
 0x30d   : > { %v1139_v48 = vadd.f32 %v1138_v45, %v1125_v46 }
 0x30e   : > { %v1113_v59 = vadd.f32 %v1112_v55, %v1099_v51  ;;  %v6078_v51 = vperm.slane %v5708_v1, 0 }
 0x30f   : > { %v6018_v50 = vpack.c.bf16 %v1139_v48, %v1111_v47 }
 0x311   : > { %1231 = vrot.lane.b32.xlu2 %v6018_v50, %s5545_s17  ;;  %1215 = vrot.lane.b32.xlu0 %v6006_v40, %s5547_s12  ;;  %v1282_v52 = vsel %vm1277_vm13, %v6018_v50, 0  ;;  %v1229_v33 = vrot.slane %v6018_v50, 4 }
 0x312   : > { %v1126_v53 = vpop.f32.mrf.mxu2  ;;  %1291 = vmatpush.bf16.xpose.msrb.mxu0 %v1282_v52  ;;  %v1140_v56 = vpop.f32.mrf.mxu3  ;;  %v544_v52 = vperm.slane %v6002_v22, 5 }
 0x313   : > { %v1127_v54 = vadd.f32 %v1126_v53, %v542_v21  ;;  %v1434_v38 = vsel %vm1277_vm13, %v1229_v33, 0 }
 0x314   : > { %v1152_v19 = vpop.f32.mrf.mxu0  ;;  %v1166_v29 = vpop.f32.mrf.mxu1 }
 0x315   : > { %v1141_v60 = vadd.f32 %v1140_v56, %v1127_v54 }
 0x317   : > { %v1203_v61 = vpack.c.bf16 %v1141_v60, %v1113_v59  ;;  %v543_v59 = vperm.slane %v6002_v22, 4 }
 0x319   : > { %1233 = vrot.lane.b32.xlu2 %v1203_v61, %s5545_s17  ;;  %1239 = vrot.lane.b32.xlu1 %v1203_v61, %s5547_s12  ;;  %v1301_v62 = vsel %vm1277_vm13, %v1203_v61, 0  ;;  %v1230_v26 = vrot.slane %v1203_v61, 4 }
 0x31a   : > { %4007 = vmatmul.msk.bf16.vlgmr.msrb.gmra.mxu0 %vm1277_vm13, %v6006_v40  ;;  %1310 = vmatpush.bf16.xpose.msrb.mxu1 %v1301_v62 }
 0x31b   : > { %v1453_v41 = vsel %vm1277_vm13, %v1230_v26, 0  ;;  %v1180_v35 = vpop.f32.mrf.mxu2  ;;  %v1194_v45 = vpop.f32.mrf.mxu3 }
 0x31c   : > { %v1154_v32 = vpop.f32.mrf.mxu0  ;;  %v1168_v39 = vpop.f32.mrf.mxu1  ;;  %v1181_v62 = vadd.f32 %v1180_v35, %v544_v52 }
 0x321   : > { %1243 = vrot.lane.b32.xlu2 %v6018_v50, %s5546_s2  ;;  %4008 = vmatmul.msk.bf16.vlgmr.msrb.gmra.mxu1 %vm1277_vm13, %v6011_v20 }
 0x323   : > { %v1182_v55 = vpop.f32.mrf.mxu2 }
 0x329   : > { %1245 = vrot.lane.b32.xlu2 %v1203_v61, %s5546_s2 }
 0x331   : > { %1221 = vrot.lane.b32.xlu2 %v6006_v40, %s5546_s2 }
 0x339   : > { %1237 = vrot.lane.b32.xlu2 %v6018_v50, %s5547_s12 }
 0x341   : > { %1217 = vrot.lane.b32.xlu2 %v6011_v20, %s5547_s12 }
 0x36b   : > { %v1232_v63 = vpop.permute.xlu2 %1231 }
 0x36c   : > { %v1320_v2 = vsel %vm1277_vm13, %v1232_v63, 0  ;;  %v1235_v8 = vrot.slane %v1232_v63, 4  ;;  %v1183_v63 = vadd.f32 %v1182_v55, %v544_v52 }
 0x36d   : > { %1329 = vmatpush.bf16.xpose.msrb.mxu2 %v1320_v2 }
 0x36e   : > { %v1472_v15 = vsel %vm1277_vm13, %v1235_v8, 0  ;;  %v1195_v8 = vadd.f32 %v1194_v45, %v1181_v62 }
 0x373   : > { %v1234_v5 = vpop.permute.xlu2 %1233  ;;  %v6043_v6 = vpop.permute.xlu0 %1209 }
 0x374   : > { %v1339_v7 = vsel %vm1277_vm13, %v1234_v5, 0  ;;  %4009 = vmatmul.msk.bf16.vlgmr.msrb.gmra.mxu2 %vm1277_vm13, %v6043_v6  ;;  %v1236_v16 = vrot.slane %v1234_v5, 4  ;;  %v1213_v47 = vrot.slane %v6043_v6, 4  ;;  %v1153_v5 = vadd.f32 %v1152_v19, %v543_v59 }
 0x375   : > { %1348 = vmatpush.bf16.xpose.msrb.mxu3 %v1339_v7  ;;  %v1155_v6 = vadd.f32 %v1154_v32, %v543_v59  ;;  %v1196_v7 = vpop.f32.mrf.mxu3 }
 0x376   : > { %v1491_v23 = vsel %vm1277_vm13, %v1236_v16, 0 }
 0x37b   : > { %v1244_v9 = vpop.permute.xlu2 %1243  ;;  %v1212_v10 = vpop.permute.xlu1 %1211 }
 0x37c   : > { %v1396_v11 = vsel %vm1277_vm13, %v1244_v9, 0  ;;  %4010 = vmatmul.msk.bf16.vlgmr.msrb.gmra.mxu3 %vm1277_vm13, %v1212_v10  ;;  %v1247_v24 = vrot.slane %v1244_v9, 4  ;;  %v6053_v27 = vpop.permute.xlu0 %1223  ;;  %v1214_v48 = vrot.slane %v1212_v10, 4  ;;  %v1197_v9 = vadd.f32 %v1196_v7, %v1183_v63 }
 0x37d   : > { %1405 = vmatpush.bf16.xpose.msra.mxu2 %v1396_v11  ;;  %v1167_v11 = vadd.f32 %v1166_v29, %v1153_v5 }
 0x37e   : > { %v1548_v13 = vsel %vm1277_vm13, %v1247_v24, 0 }
 0x37f   : > { %v6093_v16 = vpack.c.bf16 %v1195_v8, %v1167_v11 }
 0x381   : > { %v1780_v24 = vsel %vm1778_vm15, %v6093_v16, 0 }
 0x383   : > { %v1246_v17 = vpop.permute.xlu2 %1245 }
 0x384   : > { %v1415_v18 = vsel %vm1277_vm13, %v1246_v17, 0  ;;  %v1248_v25 = vrot.slane %v1246_v17, 4  ;;  %v1216_v49 = vpop.permute.xlu0 %1215  ;;  %v1207_v17 = vrot.slane %v6006_v40, 4 }
 0x385   : > { %1481 = vmatpush.bf16.xpose.msrb.mxu2 %v1472_v15  ;;  %1424 = vmatpush.bf16.xpose.msra.mxu3 %v1415_v18  ;;  %v1169_v15 = vadd.f32 %v1168_v39, %v1155_v6  ;;  %v1208_v18 = vrot.slane %v6011_v20, 4  ;;  %v1219_v20 = vrot.slane %v1216_v49, 4 }
 0x386   : > { %v1567_v31 = vsel %vm1277_vm13, %v1248_v25, 0 }
 0x387   : > { %v6095_v22 = vpack.c.bf16 %v1197_v9, %v1169_v15 }
 0x389   : > { %v1799_v40 = vsel %vm1778_vm15, %v6095_v22, 0 }
 0x38b   : > { %v1240_v28 = vpop.permute.xlu1 %1239  ;;  %v6055_v12 = vpop.permute.xlu2 %1221 }
 0x38c   : > { %v1377_v30 = vsel %vm1277_vm13, %v1240_v28, 0  ;;  %4013 = vmatmul.msk.bf16.vlgmr.msra.gmra.mxu2 %vm1277_vm13, %v6055_v12  ;;  %4014 = vmatmul.msk.bf16.vlgmr.msra.gmra.mxu3 %vm1277_vm13, %v6053_v27  ;;  %v1242_v43 = vrot.slane %v1240_v28, 4  ;;  %v1225_v19 = vrot.slane %v6055_v12, 4 }
 0x38d   : > { %1500 = vmatpush.bf16.xpose.msrb.mxu3 %v1491_v23  ;;  %1557 = vmatpush.bf16.xpose.msra.mxu2 %v1548_v13  ;;  %v1226_v23 = vrot.slane %v6053_v27, 4 }
 0x38e   : > { %1386 = vmatpush.bf16.xpose.msra.mxu1 %v1377_v30  ;;  %v1529_v53 = vsel %vm1277_vm13, %v1242_v43, 0 }
 0x393   : > { %v1238_v34 = vpop.permute.xlu2 %1237 }
 0x394   : > { %v1358_v36 = vsel %vm1277_vm13, %v1238_v34, 0  ;;  %v1241_v44 = vrot.slane %v1238_v34, 4 }
 0x395   : > { %1576 = vmatpush.bf16.xpose.msra.mxu3 %v1567_v31  ;;  %1367 = vmatpush.bf16.xpose.msra.mxu0 %v1358_v36 }
 0x396   : > { %1462 = vmatpush.bf16.xpose.msrb.mxu1 %v1453_v41  ;;  %v1510_v54 = vsel %vm1277_vm13, %v1241_v44, 0 }
 0x397   : > { %v1293_v21 = vpop.f32.mrf.mxu0 }
 0x398   : > { %v6072_v42 = vadd.f32 %v1293_v21, %v6068_v37 }
 0x39a   : > { %v1583_v46 = vsel %vm1582_vm14, %v6072_v42, -inf }
 0x39b   : > { %1584 = vmax.xlane.f32.xlu2 %v1583_v46  ;;  %v1218_v50 = vpop.permute.xlu2 %1217 }
 0x39c   : > { %4011 = vmatmul.msk.bf16.vlgmr.msra.gmra.mxu0 %vm1277_vm13, %v1216_v49  ;;  %4012 = vmatmul.msk.bf16.vlgmr.msra.gmra.mxu1 %vm1277_vm13, %v1218_v50  ;;  %v1220_v25 = vrot.slane %v1218_v50, 4 }
 0x39d   : > { %1443 = vmatpush.bf16.xpose.msrb.mxu0 %v1434_v38  ;;  %4017 = vmatmul.msk.bf16.vlgmr.msrb.gmra.mxu2 %vm1277_vm13, %v1213_v47 }
 0x39e   : > { %4018 = vmatmul.msk.bf16.vlgmr.msrb.gmra.mxu3 %vm1277_vm13, %v1214_v48  ;;  %1538 = vmatpush.bf16.xpose.msra.mxu1 %v1529_v53  ;;  %v1312_v56 = vpop.f32.mrf.mxu1 }
 0x39f   : > { %v1295_v60 = vpop.f32.mrf.mxu0  ;;  %v6089_v61 = vadd.f32 %v1312_v56, %v6078_v51 }
 0x3a1   : > { %v1586_v2 = vsel %vm1582_vm14, %v6089_v61, -inf }
 0x3a2   : > { %1587 = vmax.xlane.f32.xlu1 %v1586_v2 }
 0x3a5   : > { %1519 = vmatpush.bf16.xpose.msra.mxu0 %v1510_v54 }
 0x3a6   : > { %v1314_v10 = vpop.f32.mrf.mxu1 }
 0x3ac   : > { %4015 = vmatmul.msk.bf16.vlgmr.msrb.gmra.mxu0 %vm1277_vm13, %v1207_v17  ;;  %4016 = vmatmul.msk.bf16.vlgmr.msrb.gmra.mxu1 %vm1277_vm13, %v1208_v18 }
 0x3ad   : > { %4021 = vmatmul.msk.bf16.vlgmr.msra.gmra.mxu2 %vm1277_vm13, %v1225_v19  ;;  %1789 = vmatpush.bf16.msrb.mxu0 %v1780_v24 }
 0x3ae   : > { %4022 = vmatmul.msk.bf16.vlgmr.msra.gmra.mxu3 %vm1277_vm13, %v1226_v23  ;;  %1808 = vmatpush.bf16.msrb.mxu1 %v1799_v40 }
 0x3bc   : > { %4019 = vmatmul.msk.bf16.vlgmr.msra.gmra.mxu0 %vm1277_vm13, %v1219_v20  ;;  %4020 = vmatmul.msk.bf16.vlgmr.msra.gmra.mxu1 %vm1277_vm13, %v1220_v25 }
 0x3f7   : > { %v1331_v26 = vpop.f32.mrf.mxu2 }
 0x3f8   : > { %v6123_v44 = vadd.f32 %v1331_v26, %v6068_v37 }
 0x3fa   : > { %v1589_v52 = vsel %vm1582_vm14, %v6123_v44, -inf }
 0x3ff   : > { %v1333_v27 = vpop.f32.mrf.mxu2  ;;  %v1350_v28 = vpop.f32.mrf.mxu3 }
 0x400   : > { %v6126_v45 = vadd.f32 %v1350_v28, %v6078_v51 }
 0x402   : > { %v1592_v50 = vsel %vm1582_vm14, %v6126_v45, -inf }
 0x407   : > { %v1352_v12 = vpop.f32.mrf.mxu3 }
 0x40e   : > { %v1585_v41 = vpop.xlane.xlu2 %1584 }
 0x40f   : > { %v1407_v29 = vpop.f32.mrf.mxu2  ;;  %v1426_v30 = vpop.f32.mrf.mxu3  ;;  %v1631_v36 = vsub.f32 %v6072_v42, %v1585_v41 }
 0x410   : > { %v6148_v6 = vadd.f32 %v1426_v30, %v6078_v51  ;;  %v1408_v25 = vadd.f32 %v1407_v29, %v6068_v37 }
 0x411   : > { %v1647_v21 = vmul.f32 1.442695, %v1631_v36 }
 0x412   : > { %v1604_v17 = vsel %vm1582_vm14, %v6148_v6, -inf  ;;  %v1601_v30 = vsel %vm1582_vm14, %v1408_v25, -inf }
 0x413   : > { %5056 = vpow2.f32 %v1647_v21 }
 0x415   : > { %v1588_v43 = vpop.xlane.xlu1 %1587 }
 0x416   : > { %v1632_v49 = vsub.f32 %v6089_v61, %v1588_v43 }
 0x417   : > { %v1409_v13 = vpop.f32.mrf.mxu2  ;;  %v1428_v31 = vpop.f32.mrf.mxu3 }
 0x418   : > { %v1649_v53 = vmul.f32 1.442695, %v1632_v49 }
 0x419   : > { %v1369_v32 = vpop.f32.mrf.mxu0  ;;  %v1388_v33 = vpop.f32.mrf.mxu1 }
 0x41a   : > { %v6112_v34 = vadd.f32 %v1369_v32, %v6068_v37  ;;  %v6115_v35 = vadd.f32 %v1388_v33, %v6078_v51  ;;  %v6133_v56 = vpop.eup %5056  ;;  %5058 = vpow2.f32 %v1649_v53 }
 0x41b   : > { %v1679_v2 = vsel %vm1582_vm14, %v6133_v56, 0.0 }
 0x41c   : > { %v1598_v38 = vsel %vm1582_vm14, %v6115_v35, -inf  ;;  %v1595_v39 = vsel %vm1582_vm14, %v6112_v34, -inf }
 0x41d   : > { %1599 = vmax.xlane.f32.xlu0 %v1598_v38  ;;  %1596 = vmax.xlane.f32.xlu1 %v1595_v39 }
 0x420   : > { %v1483_v46 = vpop.f32.mrf.mxu2  ;;  %v6153_v15 = vpop.eup %5058 }
 0x421   : > { %v1502_v47 = vpop.f32.mrf.mxu3  ;;  %v1371_v48 = vpop.f32.mrf.mxu0  ;;  %v1682_v23 = vsel %vm1582_vm14, %v6153_v15, 0.0  ;;  %v6162_v19 = vadd.f32 %v1483_v46, %v6068_v37 }
 0x422   : > { %v1390_v42 = vpop.f32.mrf.mxu1  ;;  %v6151_v7 = vadd.f32 %v1502_v47, %v6078_v51 }
 0x423   : > { %v1613_v28 = vsel %vm1582_vm14, %v6162_v19, -inf }
 0x424   : > { %v1616_v18 = vsel %vm1582_vm14, %v6151_v7, -inf }
 0x425   : > { %1593 = vmax.xlane.f32.xlu0 %v1592_v50  ;;  %1590 = vmax.xlane.f32.xlu1 %v1589_v52 }
 0x428   : > { %v1485_v54 = vpop.f32.mrf.mxu2 }
 0x429   : > { %v1504_v55 = vpop.f32.mrf.mxu3  ;;  %v1445_v59 = vpop.f32.mrf.mxu0 }
 0x42a   : > { %v1464_v60 = vpop.f32.mrf.mxu1  ;;  %v6136_v62 = vadd.f32 %v1445_v59, %v6068_v37 }
 0x42b   : > { %v6139_v61 = vadd.f32 %v1464_v60, %v6078_v51 }
 0x42c   : > { %v1607_v5 = vsel %vm1582_vm14, %v6136_v62, -inf }
 0x42d   : > { %v1610_v63 = vsel %vm1582_vm14, %v6139_v61, -inf  ;;  %1680 = vadd.xlane.f32.xlu1 %v1679_v2  ;;  %1608 = vmax.xlane.f32.xlu0 %v1607_v5 }
 0x42e   : > { %1611 = vmax.xlane.f32.xlu2 %v1610_v63 }
 0x430   : > { %v1559_v8 = vpop.f32.mrf.mxu2 }
 0x431   : > { %v1578_v9 = vpop.f32.mrf.mxu3  ;;  %v1447_v10 = vpop.f32.mrf.mxu0  ;;  %v6165_v24 = vadd.f32 %v1559_v8, %v6068_v37 }
 0x432   : > { %v1466_v11 = vpop.f32.mrf.mxu1  ;;  %v6184_v36 = vadd.f32 %v1578_v9, %v6078_v51 }
 0x433   : > { %v1625_v12 = vsel %vm1582_vm14, %v6165_v24, -inf }
 0x434   : > { %v1628_v38 = vsel %vm1582_vm14, %v6184_v36, -inf }
 0x435   : > { %1617 = vmax.xlane.f32.xlu1 %v1616_v18  ;;  %1683 = vadd.xlane.f32.xlu0 %v1682_v23 }
 0x436   : > { %1605 = vmax.xlane.f32.xlu2 %v1604_v17 }
 0x438   : > { %v1561_v40 = vpop.f32.mrf.mxu2 }
 0x439   : > { %v1580_v20 = vpop.f32.mrf.mxu3  ;;  %v1521_v26 = vpop.f32.mrf.mxu0 }
 0x43a   : > { %v1540_v27 = vpop.f32.mrf.mxu1  ;;  %v6177_v31 = vadd.f32 %v1521_v26, %v6068_v37 }
 0x43b   : > { %v6174_v13 = vadd.f32 %v1540_v27, %v6078_v51 }
 0x43c   : > { %v1619_v33 = vsel %vm1582_vm14, %v6177_v31, -inf }
 0x43d   : > { %1626 = vmax.xlane.f32.xlu1 %v1625_v12  ;;  %1602 = vmax.xlane.f32.xlu0 %v1601_v30  ;;  %v1622_v32 = vsel %vm1582_vm14, %v6174_v13, -inf }
 0x43e   : > { %1614 = vmax.xlane.f32.xlu2 %v1613_v28 }
 0x441   : > { %v1523_v29 = vpop.f32.mrf.mxu0 }
 0x442   : > { %v1542_v41 = vpop.f32.mrf.mxu1 }
 0x445   : > { %1620 = vmax.xlane.f32.xlu0 %v1619_v33 }
 0x446   : > { %1623 = vmax.xlane.f32.xlu2 %v1622_v32 }
 0x44d   : > { %1629 = vmax.xlane.f32.xlu0 %v1628_v38 }
 0x456   : > { %1255 = vrot.lane.b32.xlu1 %v6095_v22, %s5545_s17 }
 0x45e   : > { %1265 = vrot.lane.b32.xlu1 %v6093_v16, %s5546_s2 }
 0x490   : > { %v1600_v37 = vpop.xlane.xlu0 %1599  ;;  %v1597_v39 = vpop.xlane.xlu1 %1596 }
 0x491   : > { %v1635_v21 = vsub.f32 %v6112_v34, %v1597_v39  ;;  %v1636_v30 = vsub.f32 %v6115_v35, %v1600_v37 }
 0x493   : > { %v1655_v43 = vmul.f32 1.442695, %v1635_v21  ;;  %v1657_v29 = vmul.f32 1.442695, %v1636_v30 }
 0x495   : > { %5060 = vpow2.f32 %v1655_v43 }
 0x498   : > { %v1594_v46 = vpop.xlane.xlu0 %1593  ;;  %v1591_v47 = vpop.xlane.xlu1 %1590 }
 0x499   : > { %v1634_v51 = vsub.f32 %v6126_v45, %v1594_v46  ;;  %v1633_v48 = vsub.f32 %v6123_v44, %v1591_v47 }
 0x49b   : > { %v1653_v42 = vmul.f32 1.442695, %v1634_v51  ;;  %v1651_v49 = vmul.f32 1.442695, %v1633_v48  ;;  %v6195_v50 = vpop.eup %5060 }
 0x49c   : > { %v1691_v52 = vsel %vm1582_vm14, %v6195_v50, 0.0 }
 0x49d   : > { %5062 = vpow2.f32 %v1653_v42  ;;  %1692 = vadd.xlane.f32.xlu0 %v1691_v52 }
 0x49e   : > { %5064 = vpow2.f32 %v1651_v49 }
 0x4a0   : > { %v1681_v53 = vpop.xlane.xlu1 %1680  ;;  %v1609_v34 = vpop.xlane.xlu0 %1608 }
 0x4a1   : > { %5066 = vrcp.f32 %v1681_v53  ;;  %v1612_v63 = vpop.xlane.xlu2 %1611  ;;  %v1639_v32 = vsub.f32 %v6136_v62, %v1609_v34 }
 0x4a2   : > { %v1640_v46 = vsub.f32 %v6139_v61, %v1612_v63 }
 0x4a3   : > { %v6199_v54 = vpop.eup %5062  ;;  %v1663_v38 = vmul.f32 1.442695, %v1639_v32 }
 0x4a4   : > { %v6201_v55 = vpop.eup %5064  ;;  %v1688_v44 = vsel %vm1582_vm14, %v6199_v54, 0.0  ;;  %v1665_v51 = vmul.f32 1.442695, %v1640_v46 }
 0x4a5   : > { %v1685_v45 = vsel %vm1582_vm14, %v6201_v55, 0.0  ;;  %1689 = vadd.xlane.f32.xlu1 %v1688_v44 }
 0x4a6   : > { %1686 = vadd.xlane.f32.xlu2 %v1685_v45 }
 0x4a7   : > { %v5067_v59 = vpop.eup %5066 }
 0x4a8   : > { %v1743_v60 = vmul.f32 %v5067_v59, %v6133_v56  ;;  %v1684_v2 = vpop.xlane.xlu0 %1683  ;;  %v1618_v20 = vpop.xlane.xlu1 %1617 }
 0x4a9   : > { %5068 = vrcp.f32 %v1684_v2  ;;  %v1606_v11 = vpop.xlane.xlu2 %1605  ;;  %v1642_v33 = vsub.f32 %v6151_v7, %v1618_v20 }
 0x4aa   : > { %v1759_v5 = vpack.c.bf16 %v1743_v60, %v1743_v60  ;;  %v1638_v40 = vsub.f32 %v6148_v6, %v1606_v11 }
 0x4ab   : > { %v1669_v39 = vmul.f32 1.442695, %v1642_v33 }
 0x4ac   : > { %4023 = vmatmul.msk.bf16.vlgmr.msrb.gmra.mxu0 %vm1582_vm14, %v1759_v5  ;;  %v1661_v56 = vmul.f32 1.442695, %v1638_v40 }
 0x4af   : > { %v5069_v8 = vpop.eup %5068 }
 0x4b0   : > { %v1744_v9 = vmul.f32 %v5069_v8, %v6153_v15  ;;  %v1603_v10 = vpop.xlane.xlu0 %1602 }
 0x4b1   : > { %v1637_v17 = vsub.f32 %v1408_v25, %v1603_v10  ;;  %v1627_v25 = vpop.xlane.xlu1 %1626  ;;  %v1615_v41 = vpop.xlane.xlu2 %1614 }
 0x4b2   : > { %v1760_v18 = vpack.c.bf16 %v1744_v9, %v1744_v9  ;;  %v1645_v42 = vsub.f32 %v6165_v24, %v1627_v25  ;;  %v1641_v34 = vsub.f32 %v6162_v19, %v1615_v41 }
 0x4b3   : > { %v1659_v23 = vmul.f32 1.442695, %v1637_v17 }
 0x4b4   : > { %4024 = vmatmul.msk.bf16.vlgmr.msrb.gmra.mxu1 %vm1582_vm14, %v1760_v18  ;;  %v1675_v49 = vmul.f32 1.442695, %v1645_v42  ;;  %v1667_v59 = vmul.f32 1.442695, %v1641_v34 }
 0x4b5   : > { %5070 = vpow2.f32 %v1659_v23 }
 0x4b6   : > { %5072 = vpow2.f32 %v1661_v56 }
 0x4b7   : > { %5074 = vpow2.f32 %v1657_v29 }
 0x4b8   : > { %5076 = vpow2.f32 %v1663_v38  ;;  %v1621_v47 = vpop.xlane.xlu0 %1620 }
 0x4b9   : > { %v1624_v43 = vpop.xlane.xlu2 %1623  ;;  %5078 = vpow2.f32 %v1669_v39  ;;  %v1643_v19 = vsub.f32 %v6177_v31, %v1621_v47  ;;  %v1251_v39 = vrot.slane %v6093_v16, 4 }
 0x4ba   : > { %v1644_v35 = vsub.f32 %v6174_v13, %v1624_v43  ;;  %5080 = vpow2.f32 %v1665_v51 }
 0x4bb   : > { %v6212_v26 = vpop.eup %5070  ;;  %v1932_v42 = vsel %vm1778_vm15, %v1251_v39, 0 }
 0x4bc   : > { %v1697_v15 = vsel %vm1582_vm14, %v6212_v26, 0.0  ;;  %v6220_v6 = vpop.eup %5072  ;;  %v1673_v62 = vmul.f32 1.442695, %v1644_v35 }
 0x4bd   : > { %1698 = vadd.xlane.f32.xlu0 %v1697_v15  ;;  %v1700_v27 = vsel %vm1582_vm14, %v6220_v6, 0.0  ;;  %v6235_v21 = vpop.eup %5074 }
 0x4be   : > { %1253 = vrot.lane.b32.xlu2 %v6093_v16, %s5545_s17  ;;  %1259 = vrot.lane.b32.xlu1 %v6093_v16, %s5547_s12  ;;  %v1694_v37 = vsel %vm1582_vm14, %v6235_v21, 0.0  ;;  %v6241_v48 = vpop.eup %5076  ;;  %5082 = vpow2.f32 %v1673_v62 }
 0x4bf   : > { %v6243_v7 = vpop.eup %5078  ;;  %v1703_v61 = vsel %vm1582_vm14, %v6241_v48, 0.0  ;;  %5084 = vpow2.f32 %v1675_v49 }
 0x4c0   : > { %v1712_v13 = vsel %vm1582_vm14, %v6243_v7, 0.0  ;;  %v1630_v52 = vpop.xlane.xlu0 %1629  ;;  %v6250_v53 = vpop.eup %5080  ;;  %5086 = vpow2.f32 %v1667_v59 }
 0x4c1   : > { %v1646_v24 = vsub.f32 %v6184_v36, %v1630_v52  ;;  %v1706_v45 = vsel %vm1582_vm14, %v6250_v53, 0.0  ;;  %v1671_v36 = vmul.f32 1.442695, %v1643_v19 }
 0x4c3   : > { %v1677_v63 = vmul.f32 1.442695, %v1646_v24 }
 0x4c4   : > { %v6253_v44 = vpop.eup %5082 }
 0x4c5   : > { %1701 = vadd.xlane.f32.xlu0 %v1700_v27  ;;  %v1718_v60 = vsel %vm1582_vm14, %v6253_v44, 0.0  ;;  %v6260_v2 = vpop.eup %5084  ;;  %5088 = vpow2.f32 %v1677_v63 }
 0x4c6   : > { %1261 = vrot.lane.b32.xlu1 %v6095_v22, %s5547_s12  ;;  %v1721_v5 = vsel %vm1582_vm14, %v6260_v2, 0.0  ;;  %v6265_v8 = vpop.eup %5086  ;;  %5090 = vpow2.f32 %v1671_v36 }
 0x4c7   : > { %v1709_v10 = vsel %vm1582_vm14, %v6265_v8, 0.0 }
 0x4c8   : > { %v6226_v28 = vpop.permute.xlu1 %1255 }
 0x4c9   : > { %v1837_v12 = vsel %vm1778_vm15, %v6226_v28, 0 }
 0x4ca   : > { %1846 = vmatpush.bf16.msrb.mxu3 %v1837_v12 }
 0x4cb   : > { %v6267_v9 = vpop.eup %5088 }
 0x4cc   : > { %v1724_v11 = vsel %vm1582_vm14, %v6267_v9, 0.0  ;;  %v6273_v31 = vpop.eup %5090 }
 0x4cd   : > { %v1715_v17 = vsel %vm1582_vm14, %v6273_v31, 0.0 }
 0x4d0   : > { %v1266_v18 = vpop.permute.xlu1 %1265 }
 0x4d1   : > { %v1894_v41 = vsel %vm1778_vm15, %v1266_v18, 0  ;;  %v1269_v34 = vrot.slane %v1266_v18, 4 }
 0x4d3   : > { %v2046_v63 = vsel %vm1778_vm15, %v1269_v34, 0 }
 0x4d9   : > { %1267 = vrot.lane.b32.xlu0 %v6095_v22, %s5546_s2 }
 0x4e7   : > { %1695 = vadd.xlane.f32.xlu2 %v1694_v37 }
 0x4ef   : > { %1704 = vadd.xlane.f32.xlu2 %v1703_v61 }
 0x4f0   : > { %1713 = vadd.xlane.f32.xlu1 %v1712_v13 }
 0x4f7   : > { %1707 = vadd.xlane.f32.xlu2 %v1706_v45 }
 0x4f8   : > { %1719 = vadd.xlane.f32.xlu1 %v1718_v60 }
 0x4ff   : > { %1722 = vadd.xlane.f32.xlu2 %v1721_v5  ;;  %v1258_v5 = vrot.slane %v6226_v28, 4 }
 0x503   : > { %1710 = vadd.xlane.f32.xlu0 %v1709_v10 }
 0x507   : > { %1725 = vadd.xlane.f32.xlu2 %v1724_v11 }
 0x50b   : > { %1716 = vadd.xlane.f32.xlu0 %v1715_v17  ;;  %v1989_v17 = vsel %vm1778_vm15, %v1258_v5, 0 }
 0x510   : > { %v1693_v32 = vpop.xlane.xlu0 %1692 }
 0x518   : > { %v1690_v23 = vpop.xlane.xlu1 %1689 }
 0x519   : > { %5092 = vrcp.f32 %v1690_v23  ;;  %v1687_v40 = vpop.xlane.xlu2 %1686 }
 0x51a   : > { %5094 = vrcp.f32 %v1687_v40 }
 0x51b   : > { %5096 = vrcp.f32 %v1693_v32 }
 0x51f   : > { %v5093_v20 = vpop.eup %5092 }
 0x520   : > { %v5095_v56 = vpop.eup %5094  ;;  %v1746_v15 = vmul.f32 %v5093_v20, %v6199_v54 }
 0x521   : > { %v1745_v25 = vmul.f32 %v5095_v56, %v6201_v55  ;;  %v1254_v27 = vpop.permute.xlu2 %1253  ;;  %v5097_v38 = vpop.eup %5096 }
 0x522   : > { %v1762_v12 = vpack.c.bf16 %v1746_v15, %v1746_v15  ;;  %v1257_v30 = vrot.slane %v1254_v27, 4  ;;  %v1818_v29 = vsel %vm1778_vm15, %v1254_v27, 0  ;;  %v1747_v43 = vmul.f32 %v5097_v38, %v6195_v50 }
 0x523   : > { %v1761_v33 = vpack.c.bf16 %v1745_v25, %v1745_v25  ;;  %1827 = vmatpush.bf16.msrb.mxu2 %v1818_v29  ;;  %v1252_v50 = vrot.slane %v6095_v22, 4 }
 0x524   : > { %4026 = vmatmul.msk.bf16.vlgmr.msrb.gmra.mxu3 %vm1582_vm14, %v1762_v12  ;;  %v1970_v54 = vsel %vm1778_vm15, %v1257_v30, 0  ;;  %v1763_v61 = vpack.c.bf16 %v1747_v43, %v1747_v43 }
 0x525   : > { %v1951_v59 = vsel %vm1778_vm15, %v1252_v50, 0 }
 0x526   : > { %4025 = vmatmul.msk.bf16.vlgmr.msrb.gmra.mxu2 %vm1582_vm14, %v1761_v33 }
 0x527   : > { %1903 = vmatpush.bf16.msra.mxu2 %v1894_v41 }
 0x529   : > { %v6284_v55 = vpop.f32.mrf.mxu0 }
 0x52b   : > { %1979 = vmatpush.bf16.msrb.mxu2 %v1970_v54 }
 0x530   : > { %v1260_v46 = vpop.permute.xlu1 %1259  ;;  %v1699_v51 = vpop.xlane.xlu0 %1698 }
 0x531   : > { %v1263_v35 = vrot.slane %v1260_v46, 4  ;;  %v1856_v37 = vsel %vm1778_vm15, %v1260_v46, 0  ;;  %v1793_v47 = vpop.f32.mrf.mxu0  ;;  %v6289_v62 = vpop.f32.mrf.mxu1  ;;  %5098 = vrcp.f32 %v1699_v51 }
 0x532   : > { %1865 = vmatpush.bf16.msra.mxu0 %v1856_v37 }
 0x533   : > { %v2008_v16 = vsel %vm1778_vm15, %v1263_v35, 0 }
 0x535   : > { %4027 = vmatmul.msk.bf16.vlgmr.msra.gmra.mxu0 %vm1582_vm14, %v1763_v61 }
 0x536   : > { %1941 = vmatpush.bf16.msrb.mxu0 %v1932_v42 }
 0x537   : > { %v5099_v49 = vpop.eup %5098 }
 0x538   : > { %v1262_v13 = vpop.permute.xlu1 %1261  ;;  %v1749_v24 = vmul.f32 %v5099_v49, %v6212_v26  ;;  %v1702_v19 = vpop.xlane.xlu0 %1701 }
 0x539   : > { %v1875_v52 = vsel %vm1778_vm15, %v1262_v13, 0  ;;  %v1812_v45 = vpop.f32.mrf.mxu1  ;;  %5100 = vrcp.f32 %v1702_v19  ;;  %v1264_v28 = vrot.slane %v1262_v13, 4 }
 0x53a   : > { %2017 = vmatpush.bf16.msra.mxu0 %v2008_v16  ;;  %1884 = vmatpush.bf16.msra.mxu1 %v1875_v52  ;;  %v1765_v60 = vpack.c.bf16 %v1749_v24, %v1749_v24 }
 0x53b   : > { %v2027_v27 = vsel %vm1778_vm15, %v1264_v28, 0 }
 0x53c   : > { %4029 = vmatmul.msk.bf16.vlgmr.msra.gmra.mxu2 %vm1582_vm14, %v1765_v60 }
 0x53d   : > { %2055 = vmatpush.bf16.msra.mxu2 %v2046_v63 }
 0x53e   : > { %1960 = vmatpush.bf16.msrb.mxu1 %v1951_v59 }
 0x53f   : > { %v5101_v22 = vpop.eup %5100 }
 0x540   : > { %v1750_v36 = vmul.f32 %v5101_v22, %v6220_v6 }
 0x542   : > { %v1766_v18 = vpack.c.bf16 %v1750_v36, %v1750_v36 }
 0x54b   : > { %v1268_v10 = vpop.permute.xlu0 %1267 }
 0x54c   : > { %v1270_v26 = vrot.slane %v1268_v10, 4  ;;  %v1913_v11 = vsel %vm1778_vm15, %v1268_v10, 0 }
 0x54d   : > { %1922 = vmatpush.bf16.msra.mxu3 %v1913_v11 }
 0x54e   : > { %v2065_v23 = vsel %vm1778_vm15, %v1270_v26, 0 }
 0x550   : > { %4030 = vmatmul.msk.bf16.vlgmr.msra.gmra.mxu3 %vm1582_vm14, %v1766_v18 }
 0x551   : > { %1998 = vmatpush.bf16.msrb.mxu3 %v1989_v17 }
 0x555   : > { %2074 = vmatpush.bf16.msra.mxu3 %v2065_v23 }
 0x55a   : > { %v1696_v40 = vpop.xlane.xlu2 %1695 }
 0x55b   : > { %5102 = vrcp.f32 %v1696_v40 }
 0x561   : > { %v5103_v20 = vpop.eup %5102 }
 0x562   : > { %v1748_v6 = vmul.f32 %v5103_v20, %v6235_v21  ;;  %v1705_v56 = vpop.xlane.xlu2 %1704 }
 0x563   : > { %5104 = vrcp.f32 %v1705_v56  ;;  %v1714_v15 = vpop.xlane.xlu1 %1713  ;;  %v4099_v56 = vld [vmem:[%s6333_s19 + $0x70] sm:$0xf] }
 0x564   : > { %v1764_v25 = vpack.c.bf16 %v1748_v6, %v1748_v6  ;;  %5106 = vrcp.f32 %v1714_v15  ;;  %v4798_v15 = vld [vmem:[%s6333_s19 + $0x74] sm:$0xf0] }
 0x566   : > { %4028 = vmatmul.msk.bf16.vlgmr.msra.gmra.mxu1 %vm1582_vm14, %v1764_v25  ;;  %v4797_v25 = vld [vmem:[%s6333_s19 + $0x74] sm:$0xf] }
 0x567   : > { %2036 = vmatpush.bf16.msra.mxu1 %v2027_v27  ;;  %v4100_v27 = vor.u32 %v4798_v15, %v4099_v56 }
 0x569   : > { %v5105_v12 = vpop.eup %5104 }
 0x56a   : > { %v5107_v30 = vpop.eup %5106  ;;  %v1751_v29 = vmul.f32 %v5105_v12, %v6241_v48  ;;  %v1708_v41 = vpop.xlane.xlu2 %1707  ;;  %v4101_v12 = vld [vmem:[%s6333_s19 + $0x78] sm:$0xf0] }
 0x56b   : > { %v1754_v32 = vmul.f32 %v5107_v30, %v6243_v7  ;;  %5108 = vrcp.f32 %v1708_v41  ;;  %v1720_v46 = vpop.xlane.xlu1 %1719  ;;  %v4091_v30 = vld [vmem:[%s6333_s19 + $0x60] sm:$0xf]  ;;  %v4104_v41 = vor.u32 %v4797_v25, %v4101_v12  ;;  %v4783_v12 = vld [vmem:[%s6333_s19 + $0x4] sm:$0xf] }
 0x56c   : > { %v1767_v33 = vpack.c.bf16 %v1751_v29, %v1751_v29  ;;  %5110 = vrcp.f32 %v1720_v46  ;;  %v4796_v29 = vld [vmem:[%s6333_s19 + $0x64] sm:$0xf0]  ;;  %v4793_v46 = vld [vmem:[%s6333_s19 + $0x54] sm:$0xf]  ;;  %v4043_v25 = vld [vmem:[%s6333_s19] sm:$0xf] }
 0x56d   : > { %v1770_v21 = vpack.c.bf16 %v1754_v32, %v1754_v32  ;;  %v4795_v32 = vld [vmem:[%s6333_s19 + $0x64] sm:$0xf] }
 0x56e   : > { %4031 = vmatmul.msk.bf16.vlgmr.msrb.gmra.mxu0 %vm1582_vm14, %v1767_v33  ;;  %v4093_v33 = vld [vmem:[%s6333_s19 + $0x68] sm:$0xf0] }
 0x56f   : > { %4034 = vmatmul.msk.bf16.vlgmr.msrb.gmra.mxu3 %vm1582_vm14, %v1770_v21  ;;  %2346 = vmatpush.bf16.msrb.mxu0 %v4100_v27  ;;  %v4092_v21 = vor.u32 %v4796_v29, %v4091_v30  ;;  %v4784_v27 = vld [vmem:[%s6333_s19 + $0x4] sm:$0xf0]  ;;  %v4045_v29 = vld [vmem:[%s6333_s19 + $0x8] sm:$0xf0] }
 0x570   : > { %v4044_v30 = vor.u32 %v4784_v27, %v4043_v25  ;;  %v4125_v25 = vld [vmem:[%s6333_s19 + $0xa8] sm:$0xf0] }
 0x571   : > { %v5109_v54 = vpop.eup %5108 }
 0x572   : > { %v1752_v38 = vmul.f32 %v5109_v54, %v6250_v53  ;;  %v1723_v39 = vpop.xlane.xlu2 %1722  ;;  %v5111_v7 = vpop.eup %5110 }
 0x573   : > { %v1756_v47 = vmul.f32 %v5111_v7, %v6253_v44  ;;  %2347 = vmatpush.bf16.msrb.mxu0 %v4092_v21  ;;  %v4813_v21 = vld [vmem:[%s6333_s19 + $0xf4] sm:$0xf] }
 0x574   : > { %v1768_v43 = vpack.c.bf16 %v1752_v38, %v1752_v38  ;;  %v4096_v38 = vor.u32 %v4795_v32, %v4093_v33  ;;  %v4163_v32 = vld [vmem:[%s6333_s19 + $0xf0] sm:$0xf]  ;;  %v4814_v33 = vld [vmem:[%s6333_s19 + $0xf4] sm:$0xf0] }
 0x575   : > { %v1772_v50 = vpack.c.bf16 %v1756_v47, %v1756_v47 }
 0x576   : > { %4032 = vmatmul.msk.bf16.vlgmr.msrb.gmra.mxu1 %vm1582_vm14, %v1768_v43  ;;  %v1711_v48 = vpop.xlane.xlu0 %1710  ;;  %v4794_v43 = vld [vmem:[%s6333_s19 + $0x54] sm:$0xf0] }
 0x577   : > { %5112 = vrcp.f32 %v1711_v48  ;;  %v4085_v48 = vld [vmem:[%s6333_s19 + $0x58] sm:$0xf0] }
 0x57a   : > { %v1726_v35 = vpop.xlane.xlu2 %1725 }
 0x57b   : > { %5114 = vrcp.f32 %v1726_v35 }
 0x57d   : > { %v5113_v37 = vpop.eup %5112 }
 0x57e   : > { %v1753_v51 = vmul.f32 %v5113_v37, %v6265_v8  ;;  %v1717_v42 = vpop.xlane.xlu0 %1716  ;;  %v4088_v37 = vor.u32 %v4793_v46, %v4085_v48  ;;  %v4811_v48 = vld [vmem:[%s6333_s19 + $0xe4] sm:$0xf] }
 0x57f   : > { %5116 = vrcp.f32 %v1717_v42 }
 0x580   : > { %v1769_v53 = vpack.c.bf16 %v1753_v51, %v1753_v51  ;;  %5118 = vrcp.f32 %v1723_v39  ;;  %v4083_v39 = vld [vmem:[%s6333_s19 + $0x50] sm:$0xf] }
 0x581   : > { %v5115_v61 = vpop.eup %5114  ;;  %v4084_v35 = vor.u32 %v4794_v43, %v4083_v39  ;;  %v4155_v39 = vld [vmem:[%s6333_s19 + $0xe0] sm:$0xf]  ;;  %v4812_v43 = vld [vmem:[%s6333_s19 + $0xe4] sm:$0xf0] }
 0x582   : > { %v1758_v16 = vmul.f32 %v5115_v61, %v6267_v9  ;;  %4033 = vmatmul.msk.bf16.vlgmr.msrb.gmra.mxu2 %vm1582_vm14, %v1769_v53 }
 0x583   : > { %2374 = vmatpush.bf16.msrb.mxu2 %v4104_v41  ;;  %2348 = vmatpush.bf16.msrb.mxu0 %v4084_v35  ;;  %v4048_v41 = vor.u32 %v4783_v12, %v4045_v29  ;;  %v4157_v35 = vld [vmem:[%s6333_s19 + $0xe8] sm:$0xf0]  ;;  %v4802_v29 = vld [vmem:[%s6333_s19 + $0x94] sm:$0xf0] }
 0x584   : > { %v1774_v13 = vpack.c.bf16 %v1758_v16, %v1758_v16 }
 0x585   : > { %v5117_v49 = vpop.eup %5116 }
 0x586   : > { %4036 = vmatmul.msk.bf16.vlgmr.msra.gmra.mxu1 %vm1582_vm14, %v1772_v50  ;;  %4038 = vmatmul.msk.bf16.vlgmr.msra.gmra.mxu3 %vm1582_vm14, %v1774_v13  ;;  %v1755_v44 = vmul.f32 %v5117_v49, %v6273_v31  ;;  %v5119_v8 = vpop.eup %5118 }
 0x587   : > { %v1757_v34 = vmul.f32 %v5119_v8, %v6260_v2  ;;  %2375 = vmatpush.bf16.msrb.mxu2 %v4096_v38  ;;  %v4075_v8 = vld [vmem:[%s6333_s19 + $0x40] sm:$0xf]  ;;  %v4165_v38 = vld [vmem:[%s6333_s19 + $0xf8] sm:$0xf0] }
 0x588   : > { %v1771_v52 = vpack.c.bf16 %v1755_v44, %v1755_v44  ;;  %v4168_v46 = vor.u32 %v4813_v21, %v4165_v38  ;;  %v4800_v38 = vld [vmem:[%s6333_s19 + $0x84] sm:$0xf0] }
 0x589   : > { %v1773_v24 = vpack.c.bf16 %v1757_v34, %v1757_v34  ;;  %v4792_v34 = vld [vmem:[%s6333_s19 + $0x44] sm:$0xf0] }
 0x58a   : > { %4035 = vmatmul.msk.bf16.vlgmr.msra.gmra.mxu0 %vm1582_vm14, %v1771_v52  ;;  %2388 = vmatpush.bf16.msrb.mxu3 %v4168_v46  ;;  %v4109_v46 = vld [vmem:[%s6333_s19 + $0x88] sm:$0xf0] }
 0x58b   : > { %2376 = vmatpush.bf16.msrb.mxu2 %v4088_v37  ;;  %v4160_v37 = vor.u32 %v4811_v48, %v4157_v35 }
 0x58e   : > { %2389 = vmatpush.bf16.msrb.mxu3 %v4160_v37 }
 0x592   : > { %4037 = vmatmul.msk.bf16.vlgmr.msra.gmra.mxu2 %vm1582_vm14, %v1773_v24  ;;  %v4791_v24 = vld [vmem:[%s6333_s19 + $0x44] sm:$0xf] }
 0x5a7   : > { %v1848_v9 = vpop.f32.mrf.mxu3 }
 0x5a9   : > { %v1829_v45 = vpop.f32.mrf.mxu2 }
 0x5aa   : > { %v5027_v59 = vpack.i.bf16 %v1848_v9, %v1829_v45  ;;  %v4076_v9 = vor.u32 %v4792_v34, %v4075_v8  ;;  %v4077_v45 = vld [vmem:[%s6333_s19 + $0x48] sm:$0xf0] }
 0x5ac   : > { %5028 = vrot.lane.b32.xlu2 %v5027_v59, %s5546_s2  ;;  %v4067_v59 = vld [vmem:[%s6333_s19 + $0x30] sm:$0xf]  ;;  %2349 = vmatpush.bf16.msrb.mxu0 %v4076_v9 }
 0x5af   : > { %v1850_v60 = vpop.f32.mrf.mxu3 }
 0x5b0   : > { %v4790_v60 = vld [vmem:[%s6333_s19 + $0x34] sm:$0xf0] }
 0x5b1   : > { %v1831_v63 = vpop.f32.mrf.mxu2 }
 0x5b2   : > { %v1867_v19 = vpop.f32.mrf.mxu0  ;;  %v4080_v63 = vor.u32 %v4791_v24, %v4077_v45 }
 0x5b4   : > { %2377 = vmatpush.bf16.msrb.mxu2 %v4080_v63 }
 0x5ba   : > { %v1869_v22 = vpop.f32.mrf.mxu0 }
 0x5bb   : > { %v4069_v22 = vld [vmem:[%s6333_s19 + $0x38] sm:$0xf0] }
 0x5bf   : > { %v1905_v31 = vpop.f32.mrf.mxu2 }
 0x5c7   : > { %v1907_v5 = vpop.f32.mrf.mxu2 }
 0x5d3   : > { %v1924_v36 = vpop.f32.mrf.mxu3 }
 0x5d4   : > { %v5032_v10 = vpack.i.bf16 %v1924_v36, %v1905_v31  ;;  %v4068_v31 = vor.u32 %v4790_v60, %v4067_v59  ;;  %v4059_v36 = vld [vmem:[%s6333_s19 + $0x20] sm:$0xf] }
 0x5d6   : > { %5033 = vrot.lane.b32.xlu1 %v5032_v10, %s5545_s17  ;;  %v4788_v10 = vld [vmem:[%s6333_s19 + $0x24] sm:$0xf0]  ;;  %2350 = vmatpush.bf16.msrb.mxu0 %v4068_v31 }
 0x5db   : > { %v1926_v2 = vpop.f32.mrf.mxu3 }
 0x5dc   : > { %v4787_v2 = vld [vmem:[%s6333_s19 + $0x24] sm:$0xf] }
 0x5e3   : > { %v1886_v26 = vpop.f32.mrf.mxu1 }
 0x5e4   : > { %v5022_v11 = vpack.i.bf16 %v1886_v26, %v1867_v19  ;;  %v4789_v19 = vld [vmem:[%s6333_s19 + $0x34] sm:$0xf]  ;;  %v4061_v26 = vld [vmem:[%s6333_s19 + $0x28] sm:$0xf0] }
 0x5e5   : > { %v4072_v5 = vor.u32 %v4789_v19, %v4069_v22 }
 0x5e6   : > { %5023 = vrot.lane.b32.xlu0 %v5022_v11, %s5547_s12  ;;  %v4060_v11 = vor.u32 %v4788_v10, %v4059_v36  ;;  %v4141_v10 = vld [vmem:[%s6333_s19 + $0xc8] sm:$0xf0] }
 0x5e7   : > { %2378 = vmatpush.bf16.msrb.mxu2 %v4072_v5  ;;  %v4139_v5 = vld [vmem:[%s6333_s19 + $0xc0] sm:$0xf] }
 0x5e8   : > { %2351 = vmatpush.bf16.msrb.mxu0 %v4060_v11  ;;  %v4806_v11 = vld [vmem:[%s6333_s19 + $0xb4] sm:$0xf0] }
 0x5eb   : > { %v1888_v17 = vpop.f32.mrf.mxu1  ;;  %v6328_v18 = vpop.f32.mrf.mxu0 }
 0x5ec   : > { %v4064_v17 = vor.u32 %v4787_v2, %v4061_v26  ;;  %v4131_v26 = vld [vmem:[%s6333_s19 + $0xb0] sm:$0xf] }
 0x5ee   : > { %2379 = vmatpush.bf16.msrb.mxu2 %v4064_v17  ;;  %v4805_v17 = vld [vmem:[%s6333_s19 + $0xb4] sm:$0xf] }
 0x5f2   : > { %v2000_v23 = vpop.f32.mrf.mxu3 }
 0x5f3   : > { %v1945_v40 = vpop.f32.mrf.mxu0  ;;  %v6330_v20 = vpop.f32.mrf.mxu1 }
 0x5f4   : > { %v4786_v40 = vld [vmem:[%s6333_s19 + $0x14] sm:$0xf0] }
 0x5fa   : > { %v2002_v28 = vpop.f32.mrf.mxu3 }
 0x5fb   : > { %v1964_v6 = vpop.f32.mrf.mxu1  ;;  %v4785_v28 = vld [vmem:[%s6333_s19 + $0x14] sm:$0xf] }
 0x5fc   : > { %v4053_v6 = vld [vmem:[%s6333_s19 + $0x18] sm:$0xf0] }
 0x5fd   : > { %v4056_v15 = vor.u32 %v4785_v28, %v4053_v6  ;;  %v4123_v6 = vld [vmem:[%s6333_s19 + $0xa0] sm:$0xf] }
 0x5ff   : > { %2380 = vmatpush.bf16.msrb.mxu2 %v4056_v15  ;;  %v4803_v15 = vld [vmem:[%s6333_s19 + $0xa4] sm:$0xf] }
 0x600   : > { %v4128_v12 = vor.u32 %v4803_v15, %v4125_v25  ;;  %v4878_v15 = vld [vmem:[%s6438_s4 + $0x1ec] sm:$0xf0]  ;;  %v4844_v25 = vld [vmem:[%s6438_s4 + $0xe4] sm:$0xf] }
 0x603   : > { %v2038_v54 = vpop.f32.mrf.mxu1  ;;  %2381 = vmatpush.bf16.msrb.mxu2 %v4048_v41  ;;  %v4801_v41 = vld [vmem:[%s6333_s19 + $0x94] sm:$0xf] }
 0x605   : > { %v1981_v7 = vpop.f32.mrf.mxu2 }
 0x606   : > { %v5037_v47 = vpack.i.bf16 %v2000_v23, %v1981_v7  ;;  %v4051_v23 = vld [vmem:[%s6333_s19 + $0x10] sm:$0xf]  ;;  %v4156_v7 = vor.u32 %v4812_v43, %v4155_v39  ;;  %v4799_v39 = vld [vmem:[%s6333_s19 + $0x84] sm:$0xf] }
 0x607   : > { %v2019_v51 = vpop.f32.mrf.mxu0  ;;  %v4052_v56 = vor.u32 %v4786_v40, %v4051_v23  ;;  %v4132_v23 = vor.u32 %v4806_v11, %v4131_v26  ;;  %v4133_v40 = vld [vmem:[%s6333_s19 + $0xb8] sm:$0xf0]  ;;  %v4112_v48 = vor.u32 %v4799_v39, %v4109_v46  ;;  %v4840_v46 = vld [vmem:[%s6438_s4 + $0xc4] sm:$0xf] }
 0x608   : > { %v5042_v61 = vpack.i.bf16 %v2038_v54, %v2019_v51  ;;  %5038 = vrot.lane.b32.xlu0 %v5037_v47, %s5546_s2  ;;  %v4164_v54 = vor.u32 %v4814_v33, %v4163_v32  ;;  %v4147_v47 = vld [vmem:[%s6333_s19 + $0xd0] sm:$0xf]  ;;  %v4810_v51 = vld [vmem:[%s6333_s19 + $0xd4] sm:$0xf0]  ;;  %v4136_v28 = vor.u32 %v4805_v17, %v4133_v40  ;;  %v4117_v32 = vld [vmem:[%s6333_s19 + $0x98] sm:$0xf0] }
 0x609   : > { %v2076_v42 = vpop.f32.mrf.mxu3  ;;  %2352 = vmatpush.bf16.msrb.mxu0 %v4052_v56  ;;  %v4804_v56 = vld [vmem:[%s6333_s19 + $0xa4] sm:$0xf0]  ;;  %v4120_v21 = vor.u32 %v4801_v41, %v4117_v32  ;;  %v4416_v41 = vld [vmem:[%s6438_s4 + $0x1f0] sm:$0xf0]  ;;  %v4270_v32 = vld [vmem:[%s6438_s4 + $0xc0] sm:$0xf] }
 0x60a   : > { %5043 = vrot.lane.b32.xlu2 %v5042_v61, %s5547_s12  ;;  %2360 = vmatpush.bf16.msrb.mxu1 %v4164_v54  ;;  %v4149_v61 = vld [vmem:[%s6333_s19 + $0xd8] sm:$0xf0]  ;;  %v4124_v27 = vor.u32 %v4804_v56, %v4123_v6  ;;  %v4107_v54 = vld [vmem:[%s6333_s19 + $0x80] sm:$0xf] }
 0x60b   : > { %v2040_v53 = vpop.f32.mrf.mxu1  ;;  %v4108_v43 = vor.u32 %v4800_v38, %v4107_v54  ;;  %v4414_v6 = vld [vmem:[%s6438_s4 + $0x1e0] sm:$0xf]  ;;  %v4874_v38 = vld [vmem:[%s6438_s4 + $0x1cc] sm:$0xf0] }
 0x60c   : > { %v4148_v53 = vor.u32 %v4810_v51, %v4147_v47  ;;  %v4398_v54 = vld [vmem:[%s6438_s4 + $0x1c0] sm:$0xf] }
 0x60d   : > { %v1983_v16 = vpop.f32.mrf.mxu2  ;;  %2353 = vmatpush.bf16.msrb.mxu0 %v4044_v30  ;;  %v4115_v30 = vld [vmem:[%s6333_s19 + $0x90] sm:$0xf] }
 0x60e   : > { %2361 = vmatpush.bf16.msrb.mxu1 %v4156_v7  ;;  %v4116_v33 = vor.u32 %v4802_v29, %v4115_v30  ;;  %v4876_v29 = vld [vmem:[%s6438_s4 + $0x1e4] sm:$0xf] }
 0x60f   : > { %v2021_v50 = vpop.f32.mrf.mxu0 }
 0x610   : > { %v5029_v50 = vpop.permute.xlu2 %5028 }
 0x611   : > { %v2078_v13 = vpop.f32.mrf.mxu3 }
 0x612   : > { %2362 = vmatpush.bf16.msrb.mxu1 %v4148_v53  ;;  %v5031_v13 = vunpack.i.h.bf16 %v5029_v50 }
 0x614   : > { %v2129_v24 = vsel %vm1277_vm13, %v6289_v62, %v5031_v13  ;;  %v4808_v62 = vld [vmem:[%s6333_s19 + $0xc4] sm:$0xf0] }
 0x615   : > { %v2057_v49 = vpop.f32.mrf.mxu2  ;;  %v4140_v36 = vor.u32 %v4808_v62, %v4139_v5 }
 0x616   : > { %v5047_v44 = vpack.i.bf16 %v2076_v42, %v2057_v49  ;;  %v4809_v42 = vld [vmem:[%s6333_s19 + $0xd4] sm:$0xf]  ;;  %v5030_v49 = vunpack.i.l.bf16 %v5029_v50 }
 0x617   : > { %v4152_v16 = vor.u32 %v4809_v42, %v4149_v61  ;;  %2363 = vmatpush.bf16.msrb.mxu1 %v4140_v36 }
 0x618   : > { %5048 = vrot.lane.b32.xlu1 %v5047_v44, %s5545_s17  ;;  %v2128_v9 = vsel %vm1277_vm13, %v6284_v55, %v5030_v49  ;;  %v4807_v55 = vld [vmem:[%s6333_s19 + $0xc4] sm:$0xf] }
 0x619   : > { %2390 = vmatpush.bf16.msrb.mxu3 %v4152_v16  ;;  %v4144_v2 = vor.u32 %v4807_v55, %v4141_v10 }
 0x61b   : > { %2364 = vmatpush.bf16.msrb.mxu1 %v4132_v23 }
 0x61d   : > { %v2059_v52 = vpop.f32.mrf.mxu2  ;;  %2391 = vmatpush.bf16.msrb.mxu3 %v4144_v2 }
 0x61f   : > { %2365 = vmatpush.bf16.msrb.mxu1 %v4124_v27  ;;  %v4288_v27 = vld [vmem:[%s6438_s4 + $0xf0] sm:$0xf0] }
 0x620   : > { %v4291_v30 = vor.u32 %v4844_v25, %v4288_v27  ;;  %v4222_v25 = vld [vmem:[%s6438_s4 + $0x60] sm:$0xf]  ;;  %v4830_v27 = vld [vmem:[%s6438_s4 + $0x6c] sm:$0xf0] }
 0x621   : > { %2392 = vmatpush.bf16.msrb.mxu3 %v4136_v28 }
 0x622   : > { %2907 = vmatpush.bf16.msra.mxu2 %v4291_v30  ;;  %v4223_v30 = vor.u32 %v4830_v27, %v4222_v25  ;;  %v4845_v27 = vld [vmem:[%s6438_s4 + $0xec] sm:$0xf] }
 0x623   : > { %2366 = vmatpush.bf16.msrb.mxu1 %v4116_v33  ;;  %v4419_v33 = vor.u32 %v4876_v29, %v4416_v41  ;;  %v4862_v29 = vld [vmem:[%s6438_s4 + $0x16c] sm:$0xf0]  ;;  %v4828_v41 = vld [vmem:[%s6438_s4 + $0x64] sm:$0xf] }
 0x625   : > { %2393 = vmatpush.bf16.msrb.mxu3 %v4128_v12  ;;  %v4415_v12 = vor.u32 %v4878_v15, %v4414_v6  ;;  %v4864_v6 = vld [vmem:[%s6438_s4 + $0x184] sm:$0xf] }
 0x627   : > { %2367 = vmatpush.bf16.msrb.mxu1 %v4108_v43  ;;  %v4399_v43 = vor.u32 %v4874_v38, %v4398_v54  ;;  %v4860_v54 = vld [vmem:[%s6438_s4 + $0x164] sm:$0xf]  ;;  %v4352_v38 = vld [vmem:[%s6438_s4 + $0x170] sm:$0xf0] }
 0x629   : > { %2394 = vmatpush.bf16.msrb.mxu3 %v4120_v21  ;;  %v4842_v21 = vld [vmem:[%s6438_s4 + $0xcc] sm:$0xf0] }
 0x62a   : > { %v4271_v39 = vor.u32 %v4842_v21, %v4270_v32  ;;  %v4224_v32 = vld [vmem:[%s6438_s4 + $0x70] sm:$0xf0] }
 0x62b   : > { %2893 = vmatpush.bf16.msra.mxu1 %v4415_v12  ;;  %v4350_v12 = vld [vmem:[%s6438_s4 + $0x160] sm:$0xf]  ;;  %v4227_v21 = vor.u32 %v4828_v41, %v4224_v32  ;;  %v4424_v41 = vld [vmem:[%s6438_s4 + $0x1f8] sm:$0xf0]  ;;  %v4278_v32 = vld [vmem:[%s6438_s4 + $0xc8] sm:$0xf] }
 0x62d   : > { %2395 = vmatpush.bf16.msrb.mxu3 %v4112_v48  ;;  %v4272_v48 = vld [vmem:[%s6438_s4 + $0xd0] sm:$0xf0] }
 0x62f   : > { %2894 = vmatpush.bf16.msra.mxu1 %v4399_v43  ;;  %v4206_v43 = vld [vmem:[%s6438_s4 + $0x40] sm:$0xf] }
 0x631   : > { %2921 = vmatpush.bf16.msra.mxu3 %v4419_v33  ;;  %v4351_v33 = vor.u32 %v4862_v29, %v4350_v12  ;;  %v4296_v12 = vld [vmem:[%s6438_s4 + $0xf8] sm:$0xf0] }
 0x632   : > { %v4299_v29 = vor.u32 %v4845_v27, %v4296_v12 }
 0x648   : > { %v5034_v44 = vpop.permute.xlu1 %5033 }
 0x649   : > { %v5036_v45 = vunpack.i.h.bf16 %v5034_v44  ;;  %v5035_v59 = vunpack.i.l.bf16 %v5034_v44 }
 0x658   : > { %v5024_v52 = vpop.permute.xlu0 %5023 }
 0x659   : > { %v5026_v8 = vunpack.i.h.bf16 %v5024_v52  ;;  %v5025_v34 = vunpack.i.l.bf16 %v5024_v52 }
 0x65b   : > { %v2132_v60 = vsel %vm2130_vm0, %v2129_v24, %v5026_v8  ;;  %v2131_v63 = vsel %vm2130_vm0, %v2128_v9, %v5025_v34 }
 0x65c   : > { %v2134_v19 = vsel %vm2133_vm1, %v2131_v63, %v5035_v59  ;;  %v2135_v22 = vsel %vm2133_vm1, %v2132_v60, %v5036_v45 }
 0x65d   : > { %v2142_v31 = vpack.c.bf16 %v2135_v22, %v2134_v19 }
 0x65f   : > { %2354 = vmatmul.bf16.vlgmr.msrb.gmra.mxu0 %v2142_v31  ;;  %2382 = vmatmul.bf16.vlgmr.msrb.gmra.mxu2 %v2142_v31 }
 0x664   : > { %v5044_v47 = vpop.permute.xlu2 %5043 }
 0x665   : > { %v5046_v61 = vunpack.i.h.bf16 %v5044_v47  ;;  %v5045_v53 = vunpack.i.l.bf16 %v5044_v47 }
 0x67a   : > { %v5039_v35 = vpop.permute.xlu0 %5038 }
 0x67b   : > { %v5041_v7 = vunpack.i.h.bf16 %v5039_v35  ;;  %v5040_v37 = vunpack.i.l.bf16 %v5039_v35  ;;  %v4872_v35 = vld [vmem:[%s6438_s4 + $0x1c4] sm:$0xf] }
 0x67d   : > { %v2137_v51 = vsel %vm1277_vm13, %v6330_v20, %v5041_v7  ;;  %v2136_v42 = vsel %vm1277_vm13, %v6328_v18, %v5040_v37  ;;  %v2180_v20 = vld [vmem:[%s2179_s11] sm:$0x3]  ;;  %v4275_v7 = vor.u32 %v4840_v46, %v4272_v48  ;;  %v4400_v37 = vld [vmem:[%s6438_s4 + $0x1d0] sm:$0xf0]  ;;  %v4826_v46 = vld [vmem:[%s6438_s4 + $0x4c] sm:$0xf0] }
 0x67e   : > { %v2138_v49 = vsel %vm2130_vm0, %v2136_v42, %v5045_v53  ;;  %v2139_v44 = vsel %vm2130_vm0, %v2137_v51, %v5046_v61  ;;  %v2182_v18 = vperm.slane %v2180_v20, 0  ;;  %v2183_v59 = vperm.slane %v2180_v20, 1  ;;  %v4334_v48 = vld [vmem:[%s6438_s4 + $0x140] sm:$0xf] }
 0x67f   : > { %v4403_v47 = vor.u32 %v4872_v35, %v4400_v37  ;;  %2908 = vmatpush.bf16.msra.mxu2 %v4275_v7  ;;  %v4207_v35 = vor.u32 %v4826_v46, %v4206_v43  ;;  %v4858_v7 = vld [vmem:[%s6438_s4 + $0x14c] sm:$0xf0]  ;;  %v4824_v37 = vld [vmem:[%s6438_s4 + $0x44] sm:$0xf]  ;;  %v4841_v43 = vld [vmem:[%s6438_s4 + $0xcc] sm:$0xf] }
 0x681   : > { %2922 = vmatpush.bf16.msra.mxu3 %v4403_v47  ;;  %v4208_v47 = vld [vmem:[%s6438_s4 + $0x50] sm:$0xf0] }
 0x68a   : > { %v5049_v16 = vpop.permute.xlu1 %5048 }
 0x68b   : > { %v5051_v50 = vunpack.i.h.bf16 %v5049_v16  ;;  %v5050_v13 = vunpack.i.l.bf16 %v5049_v16 }
 0x68d   : > { %v2140_v52 = vsel %vm2133_vm1, %v2138_v49, %v5050_v13  ;;  %v2141_v8 = vsel %vm2133_vm1, %v2139_v44, %v5051_v50 }
 0x68e   : > { %v2143_v34 = vpack.c.bf16 %v2141_v8, %v2140_v52 }
 0x690   : > { %2368 = vmatmul.bf16.vlgmr.msrb.gmra.mxu1 %v2143_v34  ;;  %2396 = vmatmul.bf16.vlgmr.msrb.gmra.mxu3 %v2143_v34 }
 0x6dc   : > { %v2355_v24 = vpop.f32.mrf.mxu0 }
 0x6dd   : > { %v2356_v60 = vadd.f32 %v2355_v24, %v2182_v18 }
 0x6e2   : > { %v2383_v9 = vpop.f32.mrf.mxu2 }
 0x6e3   : > { %v2384_v63 = vadd.f32 %v2383_v9, %v2183_v59  ;;  %v4838_v9 = vld [vmem:[%s6438_s4 + $0xac] sm:$0xf0] }
 0x6e4   : > { %v2357_v5 = vpop.f32.mrf.mxu0 }
 0x6e5   : > { %v2358_v2 = vadd.f32 %v2357_v5, %v2182_v18  ;;  %v4254_v18 = vld [vmem:[%s6438_s4 + $0xa0] sm:$0xf]  ;;  %v4868_v5 = vld [vmem:[%s6438_s4 + $0x1a4] sm:$0xf] }
 0x6ea   : > { %v2385_v36 = vpop.f32.mrf.mxu2 }
 0x6eb   : > { %v2386_v11 = vadd.f32 %v2385_v36, %v2183_v59  ;;  %v4255_v59 = vor.u32 %v4838_v9, %v4254_v18  ;;  %v4384_v36 = vld [vmem:[%s6438_s4 + $0x1b0] sm:$0xf0]  ;;  %v4820_v18 = vld [vmem:[%s6438_s4 + $0x24] sm:$0xf] }
 0x6ec   : > { %v4192_v9 = vld [vmem:[%s6438_s4 + $0x30] sm:$0xf0] }
 0x70d   : > { %v2369_v45 = vpop.f32.mrf.mxu1 }
 0x70e   : > { %v2370_v19 = vadd.f32 %v2369_v45, %v2356_v60  ;;  %v4382_v45 = vld [vmem:[%s6438_s4 + $0x1a0] sm:$0xf]  ;;  %v4870_v60 = vld [vmem:[%s6438_s4 + $0x1ac] sm:$0xf0] }
 0x710   : > { %v6420_v62 = vadd.f32 %v5512_v57, %v2370_v19  ;;  %v4256_v19 = vld [vmem:[%s6438_s4 + $0xb0] sm:$0xf0] }
 0x713   : > { %v2397_v22 = vpop.f32.mrf.mxu3 }
 0x714   : > { %v2398_v31 = vadd.f32 %v2397_v22, %v2384_v63  ;;  %v4836_v63 = vld [vmem:[%s6438_s4 + $0xa4] sm:$0xf]  ;;  %v4383_v22 = vor.u32 %v4870_v60, %v4382_v45 }
 0x715   : > { %v2371_v10 = vpop.f32.mrf.mxu1  ;;  %v4852_v60 = vld [vmem:[%s6438_s4 + $0x124] sm:$0xf] }
 0x716   : > { %v6423_v55 = vadd.f32 %v5508_v58, %v2398_v31  ;;  %v2372_v17 = vadd.f32 %v2371_v10, %v2358_v2  ;;  %v4259_v31 = vor.u32 %v4836_v63, %v4256_v19  ;;  %v4387_v10 = vor.u32 %v4868_v5, %v4384_v36  ;;  %2895 = vmatpush.bf16.msra.mxu1 %v4383_v22  ;;  %v4238_v2 = vld [vmem:[%s6438_s4 + $0x80] sm:$0xf]  ;;  %v4320_v63 = vld [vmem:[%s6438_s4 + $0x130] sm:$0xf0] }
 0x717   : > { %v4323_v19 = vor.u32 %v4852_v60, %v4320_v63  ;;  %v4174_v22 = vld [vmem:[%s6438_s4] sm:$0xf]  ;;  %v4246_v60 = vld [vmem:[%s6438_s4 + $0x88] sm:$0xf]  ;;  %v4835_v63 = vld [vmem:[%s6438_s4 + $0x94] sm:$0xf0] }
 0x718   : > { %v2410_v26 = vadd.f32 %v6423_v55, %v6420_v62  ;;  %v6428_v28 = vadd.f32 %v5504_v3, %v2372_v17  ;;  %v4286_v3 = vld [vmem:[%s6438_s4 + $0xe0] sm:$0xf]  ;;  %2909 = vmatpush.bf16.msra.mxu2 %v4259_v31  ;;  %2923 = vmatpush.bf16.msra.mxu3 %v4387_v10  ;;  %v4818_v31 = vld [vmem:[%s6438_s4 + $0xc] sm:$0xf0] }
 0x719   : > { %v4302_v5 = vld [vmem:[%s6438_s4 + $0x100] sm:$0xf]  ;;  %v4175_v36 = vor.u32 %v4818_v31, %v4174_v22  ;;  %v4850_v10 = vld [vmem:[%s6438_s4 + $0x10c] sm:$0xf0]  ;;  %v4247_v31 = vor.u32 %v4835_v63, %v4246_v60  ;;  %v4182_v60 = vld [vmem:[%s6438_s4 + $0x8] sm:$0xf] }
 0x71a   : > { %2411 = vadd.xlane.f32.xlu0 %v2410_v26  ;;  %v4834_v26 = vld [vmem:[%s6438_s4 + $0x8c] sm:$0xf0]  ;;  %v4819_v63 = vld [vmem:[%s6438_s4 + $0x14] sm:$0xf0] }
 0x71b   : > { %v2399_v23 = vpop.f32.mrf.mxu3  ;;  %v4239_v17 = vor.u32 %v4834_v26, %v4238_v2  ;;  %v4816_v2 = vld [vmem:[%s6438_s4 + $0x4] sm:$0xf]  ;;  %v4176_v26 = vld [vmem:[%s6438_s4 + $0x10] sm:$0xf0] }
 0x71c   : > { %v2400_v40 = vadd.f32 %v2399_v23, %v2386_v11  ;;  %v4366_v11 = vld [vmem:[%s6438_s4 + $0x180] sm:$0xf]  ;;  %v4866_v23 = vld [vmem:[%s6438_s4 + $0x18c] sm:$0xf0] }
 0x71e   : > { %v6431_v57 = vadd.f32 %v5500_v4, %v2400_v40  ;;  %v4846_v4 = vld [vmem:[%s6438_s4 + $0xec] sm:$0xf0]  ;;  %v4832_v40 = vld [vmem:[%s6438_s4 + $0x84] sm:$0xf] }
 0x71f   : > { %v4287_v56 = vor.u32 %v4846_v4, %v4286_v3  ;;  %v4367_v3 = vor.u32 %v4866_v23, %v4366_v11  ;;  %v4303_v11 = vor.u32 %v4850_v10, %v4302_v5  ;;  %v4848_v23 = vld [vmem:[%s6438_s4 + $0x104] sm:$0xf]  ;;  %v4867_v5 = vld [vmem:[%s6438_s4 + $0x194] sm:$0xf0] }
 0x720   : > { %v2413_v58 = vadd.f32 %v6431_v57, %v6428_v28 }
 0x721   : > { %2879 = vmatpush.bf16.msra.mxu0 %v4287_v56  ;;  %v4368_v56 = vld [vmem:[%s6438_s4 + $0x190] sm:$0xf0]  ;;  %2896 = vmatpush.bf16.msra.mxu1 %v4367_v3 }
 0x722   : > { %2414 = vadd.xlane.f32.xlu2 %v2413_v58  ;;  %v4240_v58 = vld [vmem:[%s6438_s4 + $0x90] sm:$0xf0]  ;;  %v4371_v15 = vor.u32 %v4864_v6, %v4368_v56  ;;  %v4422_v6 = vld [vmem:[%s6438_s4 + $0x1e8] sm:$0xf]  ;;  %v4879_v56 = vld [vmem:[%s6438_s4 + $0x1f4] sm:$0xf0] }
 0x723   : > { %v4243_v4 = vor.u32 %v4832_v40, %v4240_v58  ;;  %v4304_v40 = vld [vmem:[%s6438_s4 + $0x110] sm:$0xf0]  ;;  %v4294_v58 = vld [vmem:[%s6438_s4 + $0xe8] sm:$0xf]  ;;  %v4423_v25 = vor.u32 %v4879_v56, %v4422_v6  ;;  %v4863_v6 = vld [vmem:[%s6438_s4 + $0x174] sm:$0xf0] }
 0x724   : > { %2924 = vmatpush.bf16.msra.mxu3 %v4371_v15  ;;  %v4307_v3 = vor.u32 %v4848_v23, %v4304_v40  ;;  %v4230_v40 = vld [vmem:[%s6438_s4 + $0x68] sm:$0xf]  ;;  %v4829_v56 = vld [vmem:[%s6438_s4 + $0x6c] sm:$0xf] }
 0x725   : > { %2880 = vmatpush.bf16.msra.mxu0 %v4271_v39  ;;  %2910 = vmatpush.bf16.msra.mxu2 %v4243_v4  ;;  %v4355_v39 = vor.u32 %v4860_v54, %v4352_v38  ;;  %v4847_v4 = vld [vmem:[%s6438_s4 + $0xf4] sm:$0xf0]  ;;  %v4406_v38 = vld [vmem:[%s6438_s4 + $0x1c8] sm:$0xf] }
 0x726   : > { %2897 = vmatpush.bf16.msra.mxu1 %v4351_v33  ;;  %v4295_v15 = vor.u32 %v4847_v4, %v4294_v58  ;;  %v4843_v33 = vld [vmem:[%s6438_s4 + $0xd4] sm:$0xf0] }
 0x727   : > { %v4279_v54 = vor.u32 %v4843_v33, %v4278_v32  ;;  %v4831_v58 = vld [vmem:[%s6438_s4 + $0x74] sm:$0xf0] }
 0x728   : > { %2925 = vmatpush.bf16.msra.mxu3 %v4355_v39  ;;  %v4875_v39 = vld [vmem:[%s6438_s4 + $0x1d4] sm:$0xf0]  ;;  %v4231_v4 = vor.u32 %v4831_v58, %v4230_v40  ;;  %v4183_v58 = vor.u32 %v4819_v63, %v4182_v60  ;;  %v4543_v60 = vld [vmem:[%s6610_s15 + $0xe0] sm:$0xf]  ;;  %v4910_v63 = vld [vmem:[%s6610_s15 + $0xe4] sm:$0xf0] }
 0x729   : > { %2881 = vmatpush.bf16.msra.mxu0 %v4255_v59  ;;  %2911 = vmatpush.bf16.msra.mxu2 %v4227_v21  ;;  %v4195_v59 = vor.u32 %v4820_v18, %v4192_v9  ;;  %v4407_v46 = vor.u32 %v4875_v39, %v4406_v38  ;;  %v4869_v18 = vld [vmem:[%s6438_s4 + $0x1ac] sm:$0xf]  ;;  %v4392_v9 = vld [vmem:[%s6438_s4 + $0x1b8] sm:$0xf0]  ;;  %v4859_v38 = vld [vmem:[%s6438_s4 + $0x154] sm:$0xf0] }
 0x72a   : > { %v4825_v39 = vld [vmem:[%s6438_s4 + $0x4c] sm:$0xf] }
 0x72d   : > { %2882 = vmatpush.bf16.msra.mxu0 %v4239_v17  ;;  %v4179_v17 = vor.u32 %v4816_v2, %v4176_v26  ;;  %v4248_v2 = vld [vmem:[%s6438_s4 + $0x98] sm:$0xf0]  ;;  %v4865_v26 = vld [vmem:[%s6438_s4 + $0x18c] sm:$0xf] }
 0x731   : > { %2883 = vmatpush.bf16.msra.mxu0 %v4223_v30  ;;  %v4877_v30 = vld [vmem:[%s6438_s4 + $0x1ec] sm:$0xf] }
 0x732   : > { %v4427_v21 = vor.u32 %v4877_v30, %v4424_v41  ;;  %v4861_v30 = vld [vmem:[%s6438_s4 + $0x16c] sm:$0xf]  ;;  %v4214_v41 = vld [vmem:[%s6438_s4 + $0x48] sm:$0xf] }
 0x735   : > { %2884 = vmatpush.bf16.msra.mxu0 %v4207_v35  ;;  %v4873_v35 = vld [vmem:[%s6438_s4 + $0x1cc] sm:$0xf] }
 0x78d   : > { %v2412_v51 = vpop.xlane.xlu0 %2411 }
 0x78e   : > { %v2416_v42 = vmul.f32 %v2412_v51, %v5722_v14  ;;  %v4335_v51 = vor.u32 %v4858_v7, %v4334_v48  ;;  %v4280_v48 = vld [vmem:[%s6438_s4 + $0xd8] sm:$0xf0] }
 0x78f   : > { %v4408_v7 = vld [vmem:[%s6438_s4 + $0x1d8] sm:$0xf0] }
 0x790   : > { %v6458_v61 = vsub.f32 %v6420_v62, %v2416_v42  ;;  %v6461_v53 = vsub.f32 %v6423_v55, %v2416_v42  ;;  %v4211_v42 = vor.u32 %v4824_v37, %v4208_v47  ;;  %2898 = vmatpush.bf16.msra.mxu1 %v4335_v51  ;;  %v4283_v37 = vor.u32 %v4841_v43, %v4280_v48  ;;  %v4262_v51 = vld [vmem:[%s6438_s4 + $0xa8] sm:$0xf]  ;;  %v4216_v43 = vld [vmem:[%s6438_s4 + $0x58] sm:$0xf0] }
 0x791   : > { %v4411_v47 = vor.u32 %v4873_v35, %v4408_v7 }
 0x792   : > { %v2422_v16 = vmul.f32 %v6458_v61, %v6458_v61  ;;  %v2423_v50 = vmul.f32 %v6461_v53, %v6461_v53  ;;  %2912 = vmatpush.bf16.msra.mxu2 %v4211_v42  ;;  %v4839_v42 = vld [vmem:[%s6438_s4 + $0xb4] sm:$0xf0] }
 0x794   : > { %v2426_v13 = vadd.f32 %v2423_v50, %v2422_v16  ;;  %v4856_v16 = vld [vmem:[%s6438_s4 + $0x144] sm:$0xf]  ;;  %v4336_v50 = vld [vmem:[%s6438_s4 + $0x150] sm:$0xf0] }
 0x795   : > { %v2415_v49 = vpop.xlane.xlu2 %2414 }
 0x796   : > { %v2417_v44 = vmul.f32 %v2415_v49, %v5722_v14  ;;  %2427 = vadd.xlane.f32.xlu1 %v2426_v13  ;;  %v4339_v13 = vor.u32 %v4856_v16, %v4336_v50  ;;  %v4190_v49 = vld [vmem:[%s6438_s4 + $0x20] sm:$0xf]  ;;  %2913 = vmatpush.bf16.msra.mxu2 %v4195_v59  ;;  %v4390_v16 = vld [vmem:[%s6438_s4 + $0x1a8] sm:$0xf]  ;;  %v4263_v50 = vor.u32 %v4839_v42, %v4262_v51 }
 0x797   : > { %v4395_v59 = vor.u32 %v4869_v18, %v4392_v9  ;;  %v4198_v51 = vld [vmem:[%s6438_s4 + $0x28] sm:$0xf]  ;;  %v4853_v18 = vld [vmem:[%s6438_s4 + $0x12c] sm:$0xf]  ;;  %v4328_v9 = vld [vmem:[%s6438_s4 + $0x138] sm:$0xf0] }
 0x798   : > { %v6469_v52 = vsub.f32 %v6428_v28, %v2417_v44  ;;  %v6472_v8 = vsub.f32 %v6431_v57, %v2417_v44  ;;  %v4822_v44 = vld [vmem:[%s6438_s4 + $0x2c] sm:$0xf0]  ;;  %2926 = vmatpush.bf16.msra.mxu3 %v4339_v13  ;;  %v4871_v13 = vld [vmem:[%s6438_s4 + $0x1b4] sm:$0xf0] }
 0x79a   : > { %v2424_v34 = vmul.f32 %v6469_v52, %v6469_v52  ;;  %v2425_v20 = vmul.f32 %v6472_v8, %v6472_v8  ;;  %2914 = vmatpush.bf16.msra.mxu2 %v4179_v17 }
 0x79c   : > { %v2429_v24 = vadd.f32 %v2425_v20, %v2424_v34  ;;  %v4318_v34 = vld [vmem:[%s6438_s4 + $0x120] sm:$0xf]  ;;  %v4191_v20 = vor.u32 %v4822_v44, %v4190_v49  ;;  %2927 = vmatpush.bf16.msra.mxu3 %v4323_v19  ;;  %v4837_v49 = vld [vmem:[%s6438_s4 + $0xac] sm:$0xf]  ;;  %v4264_v44 = vld [vmem:[%s6438_s4 + $0xb8] sm:$0xf0] }
 0x79d   : > { %v4374_v19 = vld [vmem:[%s6438_s4 + $0x188] sm:$0xf] }
 0x79e   : > { %2430 = vadd.xlane.f32.xlu0 %v2429_v24  ;;  %v4854_v24 = vld [vmem:[%s6438_s4 + $0x12c] sm:$0xf0]  ;;  %2885 = vmatpush.bf16.msra.mxu0 %v4191_v20  ;;  %v4391_v20 = vor.u32 %v4871_v13, %v4390_v16  ;;  %v4375_v10 = vor.u32 %v4867_v5, %v4374_v19  ;;  %v4219_v16 = vor.u32 %v4825_v39, %v4216_v43  ;;  %v4326_v13 = vld [vmem:[%s6438_s4 + $0x128] sm:$0xf] }
 0x79f   : > { %v4319_v45 = vor.u32 %v4854_v24, %v4318_v34  ;;  %2963 = vmatpush.bf16.msrb.mxu2 %v4299_v29  ;;  %v4267_v24 = vor.u32 %v4837_v49, %v4264_v44  ;;  %v4360_v29 = vld [vmem:[%s6438_s4 + $0x178] sm:$0xf0]  ;;  %v4855_v49 = vld [vmem:[%s6438_s4 + $0x134] sm:$0xf0]  ;;  %v4310_v5 = vld [vmem:[%s6438_s4 + $0x108] sm:$0xf] }
 0x7a0   : > { %2928 = vmatpush.bf16.msra.mxu3 %v4307_v3  ;;  %v4358_v3 = vld [vmem:[%s6438_s4 + $0x168] sm:$0xf]  ;;  %v4363_v33 = vor.u32 %v4861_v30, %v4360_v29 }
 0x7a1   : > { %2899 = vmatpush.bf16.msra.mxu1 %v4319_v45  ;;  %v4359_v27 = vor.u32 %v4863_v6, %v4358_v3 }
 0x7a2   : > { %2886 = vmatpush.bf16.msra.mxu0 %v4175_v36  ;;  %v4833_v36 = vld [vmem:[%s6438_s4 + $0x8c] sm:$0xf] }
 0x7a3   : > { %2964 = vmatpush.bf16.msrb.mxu2 %v4283_v37  ;;  %v4251_v17 = vor.u32 %v4833_v36, %v4248_v2  ;;  %v4851_v36 = vld [vmem:[%s6438_s4 + $0x114] sm:$0xf0]  ;;  %v4817_v2 = vld [vmem:[%s6438_s4 + $0xc] sm:$0xf] }
 0x7a4   : > { %2977 = vmatpush.bf16.msrb.mxu3 %v4427_v21  ;;  %v4827_v21 = vld [vmem:[%s6438_s4 + $0x54] sm:$0xf0]  ;;  %v4311_v3 = vor.u32 %v4851_v36, %v4310_v5  ;;  %v4926_v36 = vld [vmem:[%s6610_s15 + $0x164] sm:$0xf0] }
 0x7a5   : > { %2900 = vmatpush.bf16.msra.mxu1 %v4303_v11  ;;  %v4376_v11 = vld [vmem:[%s6438_s4 + $0x198] sm:$0xf0]  ;;  %v4215_v7 = vor.u32 %v4827_v21, %v4214_v41  ;;  %v2409_v41 = vld [vmem:[%s2408_s14] sm:$0x3] }
 0x7a6   : > { %2935 = vmatpush.bf16.msrb.mxu0 %v4295_v15  ;;  %v4379_v23 = vor.u32 %v4865_v26, %v4376_v11  ;;  %v4232_v15 = vld [vmem:[%s6438_s4 + $0x78] sm:$0xf0]  ;;  %v2471_v39 = vperm.slane %v2409_v41, 1 }
 0x7a7   : > { %2965 = vmatpush.bf16.msrb.mxu2 %v4267_v24  ;;  %v4235_v12 = vor.u32 %v4829_v56, %v4232_v15  ;;  %v4184_v26 = vld [vmem:[%s6438_s4 + $0x18] sm:$0xf0] }
 0x7a8   : > { %2978 = vmatpush.bf16.msrb.mxu3 %v4411_v47  ;;  %v4344_v47 = vld [vmem:[%s6438_s4 + $0x158] sm:$0xf0]  ;;  %v4187_v56 = vor.u32 %v4817_v2, %v4184_v26  ;;  %v4942_v2 = vld [vmem:[%s6610_s15 + $0x1e4] sm:$0xf0] }
 0x7a9   : > { %2949 = vmatpush.bf16.msrb.mxu1 %v4423_v25 }
 0x7aa   : > { %2936 = vmatpush.bf16.msrb.mxu0 %v4279_v54  ;;  %v4342_v54 = vld [vmem:[%s6438_s4 + $0x148] sm:$0xf] }
 0x7ab   : > { %2966 = vmatpush.bf16.msrb.mxu2 %v4251_v17  ;;  %v4343_v37 = vor.u32 %v4859_v38, %v4342_v54  ;;  %v4849_v17 = vld [vmem:[%s6438_s4 + $0x10c] sm:$0xf]  ;;  %v2470_v38 = vperm.slane %v2409_v41, 0 }
 0x7ac   : > { %2979 = vmatpush.bf16.msrb.mxu3 %v4395_v59  ;;  %v4327_v59 = vor.u32 %v4855_v49, %v4326_v13  ;;  %v4928_v49 = vld [vmem:[%s6610_s15 + $0x174] sm:$0xf0] }
 0x7ad   : > { %2950 = vmatpush.bf16.msrb.mxu1 %v4407_v46  ;;  %v4857_v46 = vld [vmem:[%s6438_s4 + $0x14c] sm:$0xf] }
 0x7ae   : > { %2937 = vmatpush.bf16.msrb.mxu0 %v4263_v50  ;;  %v4823_v50 = vld [vmem:[%s6438_s4 + $0x34] sm:$0xf0]  ;;  %v4347_v44 = vor.u32 %v4857_v46, %v4344_v47 }
 0x7af   : > { %2967 = vmatpush.bf16.msrb.mxu2 %v4235_v12 }
 0x7b0   : > { %2980 = vmatpush.bf16.msrb.mxu3 %v4379_v23  ;;  %v4312_v23 = vld [vmem:[%s6438_s4 + $0x118] sm:$0xf0] }
 0x7b1   : > { %2951 = vmatpush.bf16.msrb.mxu1 %v4391_v20  ;;  %v4200_v20 = vld [vmem:[%s6438_s4 + $0x38] sm:$0xf0]  ;;  %v4315_v15 = vor.u32 %v4849_v17, %v4312_v23  ;;  %v4544_v17 = vor.u32 %v4910_v63, %v4543_v60  ;;  %v4892_v23 = vld [vmem:[%s6610_s15 + $0x54] sm:$0xf0]  ;;  %v4583_v60 = vld [vmem:[%s6610_s15 + $0x130] sm:$0xf] }
 0x7b2   : > { %2938 = vmatpush.bf16.msrb.mxu0 %v4247_v31  ;;  %v4920_v63 = vld [vmem:[%s6610_s15 + $0x134] sm:$0xf0] }
 0x7b3   : > { %2968 = vmatpush.bf16.msrb.mxu2 %v4219_v16 }
 0x7b4   : > { %2981 = vmatpush.bf16.msrb.mxu3 %v4363_v33 }
 0x7b5   : > { %2952 = vmatpush.bf16.msrb.mxu1 %v4375_v10  ;;  %v4331_v10 = vor.u32 %v4853_v18, %v4328_v9  ;;  %v4479_v9 = vld [vmem:[%s6610_s15 + $0x60] sm:$0xf] }
 0x7b6   : > { %2939 = vmatpush.bf16.msrb.mxu0 %v4231_v4 }
 0x7b8   : > { %2982 = vmatpush.bf16.msrb.mxu3 %v4347_v44  ;;  %v4679_v44 = vld [vmem:[%s6610_s15 + $0x1f0] sm:$0xf] }
 0x7b9   : > { %2953 = vmatpush.bf16.msrb.mxu1 %v4359_v27  ;;  %v2407_v27 = vld [vmem:[%s2406_s22] sm:$0x3] }
 0x7ba   : > { %2940 = vmatpush.bf16.msrb.mxu0 %v4215_v7  ;;  %v2462_v33 = vperm.slane %v2407_v27, 1 }
 0x7bc   : > { %2983 = vmatpush.bf16.msrb.mxu3 %v4331_v10  ;;  %v4671_v10 = vld [vmem:[%s6610_s15 + $0x1e0] sm:$0xf] }
 0x7bd   : > { %2954 = vmatpush.bf16.msrb.mxu1 %v4343_v37 }
 0x7c0   : > { %2984 = vmatpush.bf16.msrb.mxu3 %v4315_v15 }
 0x7c1   : > { %2955 = vmatpush.bf16.msrb.mxu1 %v4327_v59 }
 0x7c5   : > { %2956 = vmatpush.bf16.msrb.mxu1 %v4311_v3 }
 0x809   : > { %v2428_v34 = vpop.xlane.xlu1 %2427 }
 0x80a   : > { %v2432_v45 = vmul.f32 %v2428_v34, %v5722_v14  ;;  %v4821_v34 = vld [vmem:[%s6438_s4 + $0x2c] sm:$0xf] }
 0x80b   : > { %v4203_v31 = vor.u32 %v4821_v34, %v4200_v20  ;;  %v4944_v34 = vld [vmem:[%s6610_s15 + $0x1f4] sm:$0xf0] }
 0x80c   : > { %v6554_v22 = vadd.f32 1e-05, %v2432_v45  ;;  %v4199_v45 = vor.u32 %v4823_v50, %v4198_v51  ;;  %v4680_v5 = vor.u32 %v4944_v34, %v4679_v44 }
 0x80d   : > { %2969 = vmatpush.bf16.msrb.mxu2 %v4203_v31  ;;  %v4607_v31 = vld [vmem:[%s6610_s15 + $0x160] sm:$0xf] }
 0x80e   : > { %5120 = vrsqrt.f32 %v6554_v22  ;;  %2941 = vmatpush.bf16.msrb.mxu0 %v4199_v45  ;;  %vm2442_vm3 = vweird.f32 %v6554_v22  ;;  %v4894_v45 = vld [vmem:[%s6610_s15 + $0x64] sm:$0xf0]  ;;  %v4608_v3 = vor.u32 %v4926_v36, %v4607_v31  ;;  %v4893_v31 = vld [vmem:[%s6610_s15 + $0x64] sm:$0xf] }
 0x80f   : > { %v4480_v26 = vor.u32 %v4894_v45, %v4479_v9  ;;  %v4940_v45 = vld [vmem:[%s6610_s15 + $0x1d4] sm:$0xf0] }
 0x811   : > { %v2431_v25 = vpop.xlane.xlu0 %2430  ;;  %2970 = vmatpush.bf16.msrb.mxu2 %v4187_v56  ;;  %v4924_v56 = vld [vmem:[%s6610_s15 + $0x154] sm:$0xf0] }
 0x812   : > { %v2433_v32 = vmul.f32 %v2431_v25, %v5722_v14  ;;  %2942 = vmatpush.bf16.msrb.mxu0 %v4183_v58  ;;  %v4908_v58 = vld [vmem:[%s6610_s15 + $0xd4] sm:$0xf0] }
 0x814   : > { %v5121_v48 = vpop.eup %5120  ;;  %v6578_v35 = vadd.f32 1e-05, %v2433_v32  ;;  %v2461_v32 = vperm.slane %v2407_v27, 0 }
 0x815   : > { %v2437_v42 = vmul.f32 %v5121_v48, %v6554_v22  ;;  %vm2443_vm2 = vweird.f32 %v5121_v48 }
 0x816   : > { %5122 = vrsqrt.f32 %v6578_v35  ;;  %vm2444_vm4 = vmor %vm2442_vm3, %vm2443_vm2  ;;  %vm2452_vm6 = vweird.f32 %v6578_v35 }
 0x817   : > { %v2438_v24 = vmul.f32 %v5121_v48, %v2437_v42 }
 0x819   : > { %v2439_v19 = vmul.f32 0.5, %v2438_v24 }
 0x81b   : > { %v2440_v11 = vsub.f32 1.5, %v2439_v19 }
 0x81c   : > { %v5123_v40 = vpop.eup %5122 }
 0x81d   : > { %v2441_v4 = vmul.f32 %v5121_v48, %v2440_v11  ;;  %v2447_v6 = vmul.f32 %v5123_v40, %v6578_v35  ;;  %vm2453_vm5 = vweird.f32 %v5123_v40  ;;  %v4615_v35 = vld [vmem:[%s6610_s15 + $0x170] sm:$0xf] }
 0x81e   : > { %vm2454_vm7 = vmor %vm2452_vm6, %vm2453_vm5  ;;  %v4616_v19 = vor.u32 %v4928_v49, %v4615_v35  ;;  %v4471_v11 = vld [vmem:[%s6610_s15 + $0x50] sm:$0xf]  ;;  %v4882_v35 = vld [vmem:[%s6610_s15 + $0x4] sm:$0xf0] }
 0x81f   : > { %v2448_v25 = vmul.f32 %v5123_v40, %v2447_v6  ;;  %v2445_v12 = vsel %vm2444_vm4, %v5121_v48, %v2441_v4  ;;  %v4672_v4 = vor.u32 %v4942_v2, %v4671_v10  ;;  %v4599_v6 = vld [vmem:[%s6610_s15 + $0x150] sm:$0xf]  ;;  %v4472_v15 = vor.u32 %v4892_v23, %v4471_v11  ;;  %v4489_v49 = vld [vmem:[%s6610_s15 + $0x78] sm:$0xf0]  ;;  %v4495_v10 = vld [vmem:[%s6610_s15 + $0x80] sm:$0xf] }
 0x820   : > { %v2456_v21 = vmul.f32 %v2445_v12, %v6458_v61  ;;  %v2457_v22 = vmul.f32 %v2445_v12, %v6461_v53  ;;  %v4487_v61 = vld [vmem:[%s6610_s15 + $0x70] sm:$0xf]  ;;  %v4896_v53 = vld [vmem:[%s6610_s15 + $0x74] sm:$0xf0]  ;;  %v4890_v12 = vld [vmem:[%s6610_s15 + $0x44] sm:$0xf0]  ;;  %v4600_v41 = vor.u32 %v4924_v56, %v4599_v6 }
 0x821   : > { %v2449_v30 = vmul.f32 0.5, %v2448_v25  ;;  %v4488_v18 = vor.u32 %v4896_v53, %v4487_v61  ;;  %v4463_v25 = vld [vmem:[%s6610_s15 + $0x40] sm:$0xf]  ;;  %v4439_v61 = vld [vmem:[%s6610_s15 + $0x10] sm:$0xf] }
 0x822   : > { %v2465_v46 = vmul.f32 %v2461_v32, %v2456_v21  ;;  %v2466_v48 = vmul.f32 %v2462_v33, %v2457_v22  ;;  %v4888_v22 = vld [vmem:[%s6610_s15 + $0x34] sm:$0xf0]  ;;  %v4898_v2 = vld [vmem:[%s6610_s15 + $0x84] sm:$0xf0]  ;;  %v4655_v11 = vld [vmem:[%s6610_s15 + $0x1c0] sm:$0xf] }
 0x823   : > { %v2450_v29 = vsub.f32 1.5, %v2449_v30  ;;  %v4527_v30 = vld [vmem:[%s6610_s15 + $0xc0] sm:$0xf]  ;;  %v4884_v53 = vld [vmem:[%s6610_s15 + $0x14] sm:$0xf0] }
 0x824   : > { %v2474_v42 = vadd.f32 %v2470_v38, %v2465_v46  ;;  %v2475_v16 = vadd.f32 %v2471_v39, %v2466_v48  ;;  %v4886_v48 = vld [vmem:[%s6610_s15 + $0x24] sm:$0xf0]  ;;  %v4911_v23 = vld [vmem:[%s6610_s15 + $0xf4] sm:$0xf] }
 0x825   : > { %v2451_v54 = vmul.f32 %v5123_v40, %v2450_v29  ;;  %v4906_v29 = vld [vmem:[%s6610_s15 + $0xc4] sm:$0xf0] }
 0x826   : > { %v4528_v21 = vor.u32 %v4906_v29, %v4527_v30  ;;  %v4936_v30 = vld [vmem:[%s6610_s15 + $0x1b4] sm:$0xf0] }
 0x827   : > { %v2455_v43 = vsel %vm2454_vm7, %v5123_v40, %v2451_v54  ;;  %v4535_v40 = vld [vmem:[%s6610_s15 + $0xd0] sm:$0xf] }
 0x828   : > { %v2458_v7 = vmul.f32 %v2455_v43, %v6469_v52  ;;  %v2459_v37 = vmul.f32 %v2455_v43, %v6472_v8  ;;  %v4551_v52 = vld [vmem:[%s6610_s15 + $0xf0] sm:$0xf]  ;;  %v4912_v8 = vld [vmem:[%s6610_s15 + $0xf4] sm:$0xf0]  ;;  %v4536_v27 = vor.u32 %v4908_v58, %v4535_v40  ;;  %v4447_v43 = vld [vmem:[%s6610_s15 + $0x20] sm:$0xf] }
 0x829   : > { %v4552_v59 = vor.u32 %v4912_v8, %v4551_v52  ;;  %v4519_v54 = vld [vmem:[%s6610_s15 + $0xb0] sm:$0xf]  ;;  %v4440_v52 = vor.u32 %v4884_v53, %v4439_v61  ;;  %v4431_v8 = vld [vmem:[%s6610_s15] sm:$0xf]  ;;  %v4553_v58 = vld [vmem:[%s6610_s15 + $0xf8] sm:$0xf0] }
 0x82a   : > { %v2467_v47 = vmul.f32 %v2461_v32, %v2458_v7  ;;  %v2468_v51 = vmul.f32 %v2462_v33, %v2459_v37  ;;  %v4464_v32 = vor.u32 %v4890_v12, %v4463_v25  ;;  %v4455_v33 = vld [vmem:[%s6610_s15 + $0x30] sm:$0xf]  ;;  %v4511_v7 = vld [vmem:[%s6610_s15 + $0xa0] sm:$0xf]  ;;  %v4902_v37 = vld [vmem:[%s6610_s15 + $0xa4] sm:$0xf0]  ;;  %v4556_v6 = vor.u32 %v4911_v23, %v4553_v58 }
 0x82b   : > { %v4473_v25 = vld [vmem:[%s6610_s15 + $0x58] sm:$0xf0]  ;;  %v4647_v12 = vld [vmem:[%s6610_s15 + $0x1b0] sm:$0xf]  ;;  %v4559_v61 = vld [vmem:[%s6610_s15 + $0x100] sm:$0xf] }
 0x82c   : > { %v2476_v50 = vadd.f32 %v2470_v38, %v2467_v47  ;;  %v2477_v13 = vadd.f32 %v2471_v39, %v2468_v51  ;;  %v4904_v38 = vld [vmem:[%s6610_s15 + $0xb4] sm:$0xf0]  ;;  %v4456_v39 = vor.u32 %v4888_v22, %v4455_v33  ;;  %v4448_v47 = vor.u32 %v4886_v48, %v4447_v43  ;;  %v4934_v48 = vld [vmem:[%s6610_s15 + $0x1a4] sm:$0xf0]  ;;  %v4441_v58 = vld [vmem:[%s6610_s15 + $0x18] sm:$0xf0] }
 0x82d   : > { %v4520_v46 = vor.u32 %v4904_v38, %v4519_v54  ;;  %v4512_v51 = vor.u32 %v4902_v37, %v4511_v7  ;;  %v4648_v29 = vor.u32 %v4936_v30, %v4647_v12  ;;  %v4916_v22 = vld [vmem:[%s6610_s15 + $0x114] sm:$0xf0]  ;;  %v4889_v38 = vld [vmem:[%s6610_s15 + $0x44] sm:$0xf]  ;;  %v4907_v37 = vld [vmem:[%s6610_s15 + $0xd4] sm:$0xf] }
 0x82e   : > { %v2478_v20 = vpack.c.bf16 %v2476_v50, %v2474_v42  ;;  %v2479_v24 = vpack.c.bf16 %v2477_v13, %v2475_v16  ;;  %v4591_v42 = vld [vmem:[%s6610_s15 + $0x140] sm:$0xf]  ;;  %v4432_v16 = vor.u32 %v4882_v35, %v4431_v8  ;;  %v4922_v50 = vld [vmem:[%s6610_s15 + $0x144] sm:$0xf0]  ;;  %v4895_v13 = vld [vmem:[%s6610_s15 + $0x74] sm:$0xf] }
 0x82f   : > { %v4592_v44 = vor.u32 %v4922_v50, %v4591_v42  ;;  %v4492_v34 = vor.u32 %v4895_v13, %v4489_v49  ;;  %v4914_v53 = vld [vmem:[%s6610_s15 + $0x104] sm:$0xf0]  ;;  %v4887_v8 = vld [vmem:[%s6610_s15 + $0x34] sm:$0xf]  ;;  %v4457_v35 = vld [vmem:[%s6610_s15 + $0x38] sm:$0xf0] }
 0x830   : > { %2887 = vmatmul.bf16.vlgmr.msra.gmra.mxu0 %v2478_v20  ;;  %2901 = vmatmul.bf16.vlgmr.msra.gmra.mxu1 %v2479_v24  ;;  %v4460_v42 = vor.u32 %v4887_v8, %v4457_v35  ;;  %v4617_v50 = vld [vmem:[%s6610_s15 + $0x178] sm:$0xf0]  ;;  %v4631_v13 = vld [vmem:[%s6610_s15 + $0x190] sm:$0xf]  ;;  %v4673_v30 = vld [vmem:[%s6610_s15 + $0x1e8] sm:$0xf0] }
 0x831   : > { %2915 = vmatmul.bf16.vlgmr.msra.gmra.mxu2 %v2478_v20  ;;  %2929 = vmatmul.bf16.vlgmr.msra.gmra.mxu3 %v2479_v24  ;;  %v4897_v35 = vld [vmem:[%s6610_s15 + $0x84] sm:$0xf] }
 0x832   : > { %3389 = vmatpush.bf16.msra.mxu0 %v4488_v18  ;;  %3403 = vmatpush.bf16.msra.mxu1 %v4552_v59  ;;  %v4663_v18 = vld [vmem:[%s6610_s15 + $0x1d0] sm:$0xf] }
 0x833   : > { %3417 = vmatpush.bf16.msra.mxu2 %v4616_v19  ;;  %3431 = vmatpush.bf16.msra.mxu3 %v4680_v5  ;;  %v4664_v59 = vor.u32 %v4940_v45, %v4663_v18  ;;  %v4584_v19 = vor.u32 %v4920_v63, %v4583_v60  ;;  %v4481_v5 = vld [vmem:[%s6610_s15 + $0x68] sm:$0xf0] }
 0x834   : > { %v4484_v36 = vor.u32 %v4893_v31, %v4481_v5  ;;  %v4449_v45 = vld [vmem:[%s6610_s15 + $0x28] sm:$0xf0]  ;;  %v4930_v31 = vld [vmem:[%s6610_s15 + $0x184] sm:$0xf0] }
 0x835   : > { %v4609_v63 = vld [vmem:[%s6610_s15 + $0x168] sm:$0xf0] }
 0x836   : > { %3390 = vmatpush.bf16.msra.mxu0 %v4480_v26  ;;  %3404 = vmatpush.bf16.msra.mxu1 %v4544_v17  ;;  %v4496_v26 = vor.u32 %v4898_v2, %v4495_v10  ;;  %v4938_v17 = vld [vmem:[%s6610_s15 + $0x1c4] sm:$0xf0]  ;;  %v4903_v10 = vld [vmem:[%s6610_s15 + $0xb4] sm:$0xf]  ;;  %v4521_v2 = vld [vmem:[%s6610_s15 + $0xb8] sm:$0xf0] }
 0x837   : > { %3418 = vmatpush.bf16.msra.mxu2 %v4608_v3  ;;  %3432 = vmatpush.bf16.msra.mxu3 %v4672_v4  ;;  %v4656_v40 = vor.u32 %v4938_v17, %v4655_v11  ;;  %v4575_v3 = vld [vmem:[%s6610_s15 + $0x120] sm:$0xf]  ;;  %v4918_v4 = vld [vmem:[%s6610_s15 + $0x124] sm:$0xf0]  ;;  %v4943_v11 = vld [vmem:[%s6610_s15 + $0x1f4] sm:$0xf] }
 0x838   : > { %v4576_v56 = vor.u32 %v4918_v4, %v4575_v3  ;;  %v4681_v17 = vld [vmem:[%s6610_s15 + $0x1f8] sm:$0xf0]  ;;  %v4923_v3 = vld [vmem:[%s6610_s15 + $0x154] sm:$0xf] }
 0x839   : > { %v4684_v23 = vor.u32 %v4943_v11, %v4681_v17  ;;  %v4641_v17 = vld [vmem:[%s6610_s15 + $0x1a8] sm:$0xf0] }
 0x83a   : > { %3391 = vmatpush.bf16.msra.mxu0 %v4472_v15  ;;  %3405 = vmatpush.bf16.msra.mxu1 %v4536_v27  ;;  %v4891_v15 = vld [vmem:[%s6610_s15 + $0x54] sm:$0xf] }
 0x83b   : > { %3419 = vmatpush.bf16.msra.mxu2 %v4600_v41  ;;  %3433 = vmatpush.bf16.msra.mxu3 %v4664_v59  ;;  %v4476_v27 = vor.u32 %v4891_v15, %v4473_v25  ;;  %v4909_v41 = vld [vmem:[%s6610_s15 + $0xe4] sm:$0xf]  ;;  %v4513_v25 = vld [vmem:[%s6610_s15 + $0xa8] sm:$0xf0] }
 0x83c   : > { %v4925_v59 = vld [vmem:[%s6610_s15 + $0x164] sm:$0xf] }
 0x83d   : > { %v4612_v5 = vor.u32 %v4925_v59, %v4609_v63  ;;  %v4901_v15 = vld [vmem:[%s6610_s15 + $0xa4] sm:$0xf] }
 0x83e   : > { %3392 = vmatpush.bf16.msra.mxu0 %v4464_v32  ;;  %3406 = vmatpush.bf16.msra.mxu1 %v4528_v21  ;;  %v4545_v32 = vld [vmem:[%s6610_s15 + $0xe8] sm:$0xf0]  ;;  %v4567_v21 = vld [vmem:[%s6610_s15 + $0x110] sm:$0xf]  ;;  %v4516_v12 = vor.u32 %v4901_v15, %v4513_v25 }
 0x83f   : > { %3420 = vmatpush.bf16.msra.mxu2 %v4592_v44  ;;  %3434 = vmatpush.bf16.msra.mxu3 %v4656_v40  ;;  %v4548_v33 = vor.u32 %v4909_v41, %v4545_v32  ;;  %v4568_v54 = vor.u32 %v4916_v22, %v4567_v21  ;;  %v4932_v44 = vld [vmem:[%s6610_s15 + $0x194] sm:$0xf0]  ;;  %v4883_v40 = vld [vmem:[%s6610_s15 + $0x14] sm:$0xf]  ;;  %v4881_v41 = vld [vmem:[%s6610_s15 + $0x4] sm:$0xf] }
 0x840   : > { %2943 = vmatmul.bf16.vlgmr.msrb.gmra.mxu0 %v2478_v20  ;;  %2957 = vmatmul.bf16.vlgmr.msrb.gmra.mxu1 %v2479_v24  ;;  %v4444_v4 = vor.u32 %v4883_v40, %v4441_v58  ;;  %v4433_v32 = vld [vmem:[%s6610_s15 + $0x8] sm:$0xf0]  ;;  %v6718_v21 = vld [vmem:[%s2548_s25] sm:$0xf] }
 0x841   : > { %2971 = vmatmul.bf16.vlgmr.msrb.gmra.mxu2 %v2478_v20  ;;  %2985 = vmatmul.bf16.vlgmr.msrb.gmra.mxu3 %v2479_v24  ;;  %v4503_v20 = vld [vmem:[%s6610_s15 + $0x90] sm:$0xf]  ;;  %v4900_v24 = vld [vmem:[%s6610_s15 + $0x94] sm:$0xf0]  ;;  %v4436_v22 = vor.u32 %v4881_v41, %v4433_v32  ;;  %v4561_v40 = vld [vmem:[%s6610_s15 + $0x108] sm:$0xf0] }
 0x842   : > { %3393 = vmatpush.bf16.msra.mxu0 %v4456_v39  ;;  %3407 = vmatpush.bf16.msra.mxu1 %v4520_v46  ;;  %v4504_v9 = vor.u32 %v4900_v24, %v4503_v20  ;;  %v4465_v39 = vld [vmem:[%s6610_s15 + $0x48] sm:$0xf0]  ;;  %v4639_v46 = vld [vmem:[%s6610_s15 + $0x1a0] sm:$0xf]  ;;  %v4632_v24 = vor.u32 %v4932_v44, %v4631_v13  ;;  %v4917_v44 = vld [vmem:[%s6610_s15 + $0x124] sm:$0xf] }
 0x843   : > { %3421 = vmatpush.bf16.msra.mxu2 %v4584_v19  ;;  %3435 = vmatpush.bf16.msra.mxu3 %v4648_v29  ;;  %v4468_v43 = vor.u32 %v4889_v38, %v4465_v39  ;;  %v4640_v7 = vor.u32 %v4934_v48, %v4639_v46  ;;  %v4529_v20 = vld [vmem:[%s6610_s15 + $0xc8] sm:$0xf0]  ;;  %v4623_v19 = vld [vmem:[%s6610_s15 + $0x180] sm:$0xf]  ;;  %v4899_v39 = vld [vmem:[%s6610_s15 + $0x94] sm:$0xf] }
 0x844   : > { %v4939_v46 = vld [vmem:[%s6610_s15 + $0x1d4] sm:$0xf]  ;;  %v4657_v13 = vld [vmem:[%s6610_s15 + $0x1c8] sm:$0xf0] }
 0x846   : > { %3394 = vmatpush.bf16.msra.mxu0 %v4448_v47  ;;  %3408 = vmatpush.bf16.msra.mxu1 %v4512_v51  ;;  %v4537_v47 = vld [vmem:[%s6610_s15 + $0xd8] sm:$0xf0] }
 0x847   : > { %3422 = vmatpush.bf16.msra.mxu2 %v4576_v56  ;;  %v4540_v51 = vor.u32 %v4907_v37, %v4537_v47  ;;  %3436 = vmatpush.bf16.msra.mxu3 %v4640_v7  ;;  %v4665_v7 = vld [vmem:[%s6610_s15 + $0x1d8] sm:$0xf0] }
 0x84a   : > { %3395 = vmatpush.bf16.msra.mxu0 %v4440_v52  ;;  %3409 = vmatpush.bf16.msra.mxu1 %v4504_v9  ;;  %v4560_v52 = vor.u32 %v4914_v53, %v4559_v61  ;;  %v4885_v9 = vld [vmem:[%s6610_s15 + $0x24] sm:$0xf]  ;;  %v4919_v61 = vld [vmem:[%s6610_s15 + $0x134] sm:$0xf]  ;;  %v4585_v53 = vld [vmem:[%s6610_s15 + $0x138] sm:$0xf0] }
 0x84b   : > { %3423 = vmatpush.bf16.msra.mxu2 %v4568_v54  ;;  %3437 = vmatpush.bf16.msra.mxu3 %v4632_v24  ;;  %v4452_v60 = vor.u32 %v4885_v9, %v4449_v45  ;;  %v4593_v54 = vld [vmem:[%s6610_s15 + $0x148] sm:$0xf0]  ;;  %v4588_v8 = vor.u32 %v4919_v61, %v4585_v53  ;;  %v4649_v9 = vld [vmem:[%s6610_s15 + $0x1b8] sm:$0xf0]  ;;  %v2552_v45 = vperm.slane %v6718_v21, 1 }
 0x84e   : > { %3396 = vmatpush.bf16.msra.mxu0 %v4432_v16  ;;  %3410 = vmatpush.bf16.msra.mxu1 %v4496_v26  ;;  %v4927_v16 = vld [vmem:[%s6610_s15 + $0x174] sm:$0xf]  ;;  %v4524_v26 = vor.u32 %v4903_v10, %v4521_v2  ;;  %v4933_v10 = vld [vmem:[%s6610_s15 + $0x1a4] sm:$0xf] }
 0x84f   : > { %v4620_v49 = vor.u32 %v4927_v16, %v4617_v50  ;;  %3424 = vmatpush.bf16.msra.mxu2 %v4560_v52  ;;  %v2551_v52 = vperm.slane %v6718_v21, 0  ;;  %v4937_v16 = vld [vmem:[%s6610_s15 + $0x1c4] sm:$0xf]  ;;  %v4644_v58 = vor.u32 %v4933_v10, %v4641_v17  ;;  %v3506_v10 = vld [vmem:[%s3505_s20] sm:$0x3] }
 0x852   : > { %3445 = vmatpush.bf16.msrb.mxu0 %v4492_v34  ;;  %3459 = vmatpush.bf16.msrb.mxu1 %v4556_v6  ;;  %v4905_v34 = vld [vmem:[%s6610_s15 + $0xc4] sm:$0xf]  ;;  %v4601_v6 = vld [vmem:[%s6610_s15 + $0x158] sm:$0xf0] }
 0x853   : > { %v4532_v18 = vor.u32 %v4905_v34, %v4529_v20  ;;  %3473 = vmatpush.bf16.msrb.mxu2 %v4620_v49  ;;  %v4604_v56 = vor.u32 %v4923_v3, %v4601_v6  ;;  %v4660_v49 = vor.u32 %v4937_v16, %v4657_v13  ;;  %v4577_v34 = vld [vmem:[%s6610_s15 + $0x128] sm:$0xf0]  ;;  %v4633_v6 = vld [vmem:[%s6610_s15 + $0x198] sm:$0xf0] }
 0x854   : > { %v4580_v24 = vor.u32 %v4917_v44, %v4577_v34 }
 0x856   : > { %3446 = vmatpush.bf16.msrb.mxu0 %v4484_v36  ;;  %3460 = vmatpush.bf16.msrb.mxu1 %v4548_v33  ;;  %v4624_v36 = vor.u32 %v4930_v31, %v4623_v19  ;;  %v4921_v33 = vld [vmem:[%s6610_s15 + $0x144] sm:$0xf] }
 0x857   : > { %3474 = vmatpush.bf16.msrb.mxu2 %v4612_v5  ;;  %v4596_v38 = vor.u32 %v4921_v33, %v4593_v54  ;;  %v4915_v5 = vld [vmem:[%s6610_s15 + $0x114] sm:$0xf] }
 0x858   : > { %3438 = vmatpush.bf16.msra.mxu3 %v4624_v36  ;;  %v4569_v36 = vld [vmem:[%s6610_s15 + $0x118] sm:$0xf0] }
 0x859   : > { %v4572_v11 = vor.u32 %v4915_v5, %v4569_v36 }
 0x85a   : > { %3447 = vmatpush.bf16.msrb.mxu0 %v4476_v27  ;;  %3461 = vmatpush.bf16.msrb.mxu1 %v4540_v51  ;;  %v4941_v27 = vld [vmem:[%s6610_s15 + $0x1e4] sm:$0xf]  ;;  %v4668_v51 = vor.u32 %v4939_v46, %v4665_v7 }
 0x85b   : > { %3475 = vmatpush.bf16.msrb.mxu2 %v4604_v56  ;;  %v4676_v29 = vor.u32 %v4941_v27, %v4673_v30 }
 0x85c   : > { %3487 = vmatpush.bf16.msrb.mxu3 %v4684_v23  ;;  %v4913_v23 = vld [vmem:[%s6610_s15 + $0x104] sm:$0xf] }
 0x85d   : > { %v4564_v15 = vor.u32 %v4913_v23, %v4561_v40  ;;  %v3508_v23 = vperm.slane %v3506_v10, 0 }
 0x85e   : > { %3448 = vmatpush.bf16.msrb.mxu0 %v4468_v43  ;;  %3462 = vmatpush.bf16.msrb.mxu1 %v4532_v18  ;;  %v4505_v43 = vld [vmem:[%s6610_s15 + $0x98] sm:$0xf0]  ;;  %v4935_v18 = vld [vmem:[%s6610_s15 + $0x1b4] sm:$0xf] }
 0x85f   : > { %v4508_v48 = vor.u32 %v4899_v39, %v4505_v43  ;;  %3476 = vmatpush.bf16.msrb.mxu2 %v4596_v38  ;;  %v4652_v63 = vor.u32 %v4935_v18, %v4649_v9  ;;  %v2553_v38 = vperm.slane %v6718_v21, 2  ;;  %v4929_v39 = vld [vmem:[%s6610_s15 + $0x184] sm:$0xf]  ;;  %v4625_v43 = vld [vmem:[%s6610_s15 + $0x188] sm:$0xf0] }
 0x860   : > { %3488 = vmatpush.bf16.msrb.mxu3 %v4676_v29 }
 0x862   : > { %3449 = vmatpush.bf16.msrb.mxu0 %v4460_v42  ;;  %3463 = vmatpush.bf16.msrb.mxu1 %v4524_v26  ;;  %v4497_v42 = vld [vmem:[%s6610_s15 + $0x88] sm:$0xf0] }
 0x863   : > { %v4500_v50 = vor.u32 %v4897_v35, %v4497_v42  ;;  %3477 = vmatpush.bf16.msrb.mxu2 %v4588_v8 }
 0x864   : > { %3489 = vmatpush.bf16.msrb.mxu3 %v4668_v51 }
 0x866   : > { %3450 = vmatpush.bf16.msrb.mxu0 %v4452_v60  ;;  %3464 = vmatpush.bf16.msrb.mxu1 %v4516_v12 }
 0x867   : > { %3478 = vmatpush.bf16.msrb.mxu2 %v4580_v24 }
 0x868   : > { %3490 = vmatpush.bf16.msrb.mxu3 %v4660_v49 }
 0x86a   : > { %3451 = vmatpush.bf16.msrb.mxu0 %v4444_v4  ;;  %3465 = vmatpush.bf16.msrb.mxu1 %v4508_v48  ;;  %v4931_v4 = vld [vmem:[%s6610_s15 + $0x194] sm:$0xf]  ;;  %v4628_v48 = vor.u32 %v4929_v39, %v4625_v43 }
 0x86b   : > { %3479 = vmatpush.bf16.msrb.mxu2 %v4572_v11  ;;  %v4636_v12 = vor.u32 %v4931_v4, %v4633_v6 }
 0x86c   : > { %3491 = vmatpush.bf16.msrb.mxu3 %v4652_v63 }
 0x86e   : > { %3452 = vmatpush.bf16.msrb.mxu0 %v4436_v22  ;;  %3466 = vmatpush.bf16.msrb.mxu1 %v4500_v50 }
 0x86f   : > { %3480 = vmatpush.bf16.msrb.mxu2 %v4564_v15 }
 0x870   : > { %3492 = vmatpush.bf16.msrb.mxu3 %v4644_v58 }
 0x874   : > { %3493 = vmatpush.bf16.msrb.mxu3 %v4636_v12 }
 0x878   : > { %3494 = vmatpush.bf16.msrb.mxu3 %v4628_v48 }
 0x8ad   : > { %v2888_v37 = vpop.f32.mrf.mxu0  ;;  %v2902_v47 = vpop.f32.mrf.mxu1 }
 0x8ae   : > { %v2889_v20 = vadd.f32 %v2888_v37, %v2551_v52 }
 0x8b0   : > { %v2903_v2 = vadd.f32 %v2902_v47, %v2889_v20 }
 0x8b2   : > { %v2991_v25 = vmax.f32 %v2903_v2, 0.0 }
 0x8b4   : > { %v2916_v59 = vpop.f32.mrf.mxu2  ;;  %v2930_v60 = vpop.f32.mrf.mxu3 }
 0x8b5   : > { %v2890_v19 = vpop.f32.mrf.mxu0  ;;  %v2904_v31 = vpop.f32.mrf.mxu1  ;;  %v2917_v56 = vadd.f32 %v2916_v59, %v2552_v45 }
 0x8b6   : > { %v2891_v26 = vadd.f32 %v2890_v19, %v2551_v52  ;;  %v2554_v52 = vperm.slane %v6718_v21, 3 }
 0x8b7   : > { %v2931_v32 = vadd.f32 %v2930_v60, %v2917_v56 }
 0x8b8   : > { %v2905_v3 = vadd.f32 %v2904_v31, %v2891_v26 }
 0x8b9   : > { %v2992_v7 = vmax.f32 %v2931_v32, 0.0 }
 0x8ba   : > { %v2995_v27 = vmax.f32 %v2905_v3, 0.0 }
 0x8bc   : > { %v2999_v30 = vpack.c.bf16 %v2995_v27, %v2991_v25  ;;  %v2918_v29 = vpop.f32.mrf.mxu2  ;;  %v2932_v41 = vpop.f32.mrf.mxu3 }
 0x8bd   : > { %v2919_v33 = vadd.f32 %v2918_v29, %v2552_v45  ;;  %v2944_v22 = vpop.f32.mrf.mxu0  ;;  %v2958_v54 = vpop.f32.mrf.mxu1 }
 0x8be   : > { %3397 = vmatmul.bf16.vlgmr.msra.gmra.mxu0 %v2999_v30  ;;  %v2945_v47 = vadd.f32 %v2944_v22, %v2553_v38 }
 0x8bf   : > { %v2933_v46 = vadd.f32 %v2932_v41, %v2919_v33 }
 0x8c0   : > { %v2959_v35 = vadd.f32 %v2958_v54, %v2945_v47  ;;  %v3509_v54 = vperm.slane %v3506_v10, 1  ;;  %v3562_v10 = vlaneseq (%p353_p0) }
 0x8c1   : > { %v2996_v37 = vmax.f32 %v2933_v46, 0.0 }
 0x8c2   : > { %v2993_v49 = vmax.f32 %v2959_v35, 0.0  ;;  %vm3564_vm10 = vcmp.lt.s32.totalorder (%p353_p0), %v3562_v10, 256 }
 0x8c3   : > { %v3000_v51 = vpack.c.bf16 %v2996_v37, %v2992_v7 }
 0x8c4   : > { %v2972_v61 = vpop.f32.mrf.mxu2  ;;  %v2986_v53 = vpop.f32.mrf.mxu3 }
 0x8c5   : > { %3411 = vmatmul.bf16.vlgmr.msra.gmra.mxu1 %v3000_v51  ;;  %v2946_v8 = vpop.f32.mrf.mxu0  ;;  %v2960_v16 = vpop.f32.mrf.mxu1  ;;  %v2973_v13 = vadd.f32 %v2972_v61, %v2554_v52 }
 0x8c6   : > { %v2947_v42 = vadd.f32 %v2946_v8, %v2553_v38 }
 0x8c7   : > { %v2987_v24 = vadd.f32 %v2986_v53, %v2973_v13  ;;  %v5548_v53 = vmov (%p353_p0), 8.0  }
 0x8c8   : > { %v2961_v50 = vadd.f32 %v2960_v16, %v2947_v42  ;;  %5124 = vrcp.f32 (%p353_p0), %v5548_v53 }
 0x8c9   : > { %v2994_v59 = vmax.f32 %v2987_v24, 0.0 }
 0x8ca   : > { %v2997_v44 = vmax.f32 %v2961_v50, 0.0 }
 0x8cc   : > { %v3001_v34 = vpack.c.bf16 %v2997_v44, %v2993_v49  ;;  %v2974_v20 = vpop.f32.mrf.mxu2  ;;  %v2988_v9 = vpop.f32.mrf.mxu3 }
 0x8cd   : > { %v2975_v18 = vadd.f32 %v2974_v20, %v2554_v52 }
 0x8ce   : > { %3425 = vmatmul.bf16.vlgmr.msra.gmra.mxu2 %v3001_v34  ;;  %3453 = vmatmul.bf16.vlgmr.msrb.gmra.mxu0 %v2999_v30  ;;  %v5125_v24 = vpop.eup (%p353_p0), %5124 }
 0x8cf   : > { %v2989_v45 = vadd.f32 %v2988_v9, %v2975_v18  ;;  %vm3545_vm8 = vweird.f32 (%p353_p0), %v5125_v24 }
 0x8d1   : > { %v2998_v21 = vmax.f32 %v2989_v45, 0.0  ;;  %v3541_v45 = vmul.f32 (%p353_p0), 8.0, %v5125_v24 }
 0x8d3   : > { %v3002_v60 = vpack.c.bf16 %v2998_v21, %v2994_v59  ;;  %v3542_v21 = vsub.f32 (%p353_p0), 1.0, %v3541_v45 }
 0x8d5   : > { %3439 = vmatmul.bf16.vlgmr.msra.gmra.mxu3 %v3002_v60  ;;  %3467 = vmatmul.bf16.vlgmr.msrb.gmra.mxu1 %v3000_v51 }
 0x8de   : > { %3481 = vmatmul.bf16.vlgmr.msrb.gmra.mxu2 %v3001_v34 }
 0x8e5   : > { %3495 = vmatmul.bf16.vlgmr.msrb.gmra.mxu3 %v3002_v60  ;;  %v3543_v60 = vmul.f32 (%p353_p0), %v5125_v24, %v3542_v21 }
 0x93b   : > { %v3398_v19 = vpop.f32.mrf.mxu0 }
 0x942   : > { %v3412_v63 = vpop.f32.mrf.mxu1 }
 0x943   : > { %v3413_v5 = vadd.f32 %v3412_v63, %v3398_v19  ;;  %v3400_v26 = vpop.f32.mrf.mxu0 }
 0x94a   : > { %v3414_v36 = vpop.f32.mrf.mxu1 }
 0x94b   : > { %v3415_v3 = vadd.f32 %v3414_v36, %v3400_v26  ;;  %v3454_v27 = vpop.f32.mrf.mxu0  ;;  %v3544_v36 = vadd.f32 (%p353_p0), %v5125_v24, %v3543_v60 }
 0x951   : > { %v3426_v31 = vpop.f32.mrf.mxu2 }
 0x952   : > { %v3427_v2 = vadd.f32 %v3426_v31, %v3413_v5  ;;  %v3468_v56 = vpop.f32.mrf.mxu1 }
 0x953   : > { %v3469_v29 = vadd.f32 %v3468_v56, %v3454_v27 }
 0x958   : > { %v3440_v11 = vpop.f32.mrf.mxu3 }
 0x959   : > { %v3441_v17 = vadd.f32 %v3440_v11, %v3427_v2  ;;  %v3428_v40 = vpop.f32.mrf.mxu2  ;;  %v3546_v2 = vsel (%p353_p0), %vm3545_vm8, %v5125_v24, %v3544_v36 }
 0x95a   : > { %v3429_v4 = vadd.f32 %v3428_v40, %v3415_v3  ;;  %v3470_v38 = vpop.f32.mrf.mxu1 }
 0x95b   : > { %v3501_v58 = vadd.f32 %v3441_v17, %v6420_v62  ;;  %v3456_v62 = vpop.f32.mrf.mxu0 }
 0x95c   : > { %v3471_v46 = vadd.f32 %v3470_v38, %v3456_v62 }
 0x95d   : > { %v3512_v6 = vadd.f32 %v3508_v23, %v3501_v58  }
 0x960   : > { %v3442_v15 = vpop.f32.mrf.mxu3 }
 0x961   : > { %v3443_v25 = vadd.f32 %v3442_v15, %v3429_v4  ;;  %v3482_v12 = vpop.f32.mrf.mxu2 }
 0x962   : > { %v3483_v32 = vadd.f32 %v3482_v12, %v3469_v29 }
 0x963   : > { %v3503_v30 = vadd.f32 %v3443_v25, %v6428_v28 }
 0x965   : > { %v3514_v41 = vadd.f32 %v3508_v23, %v3503_v30  }
 0x967   : > { %v6792_v3 = vmov %v3514_v41 }
 0x968   : > { %v3496_v33 = vpop.f32.mrf.mxu3 }
 0x969   : > { %v3497_v22 = vadd.f32 %v3496_v33, %v3483_v32  ;;  %v3484_v43 = vpop.f32.mrf.mxu2 }
 0x96a   : > { %v3485_v7 = vadd.f32 %v3484_v43, %v3471_v46 }
 0x96b   : > { %v3502_v39 = vadd.f32 %v3497_v22, %v6423_v55  ;;  %v3516_v55 = vrot.slane (%p353_p0), %v3512_v6, 4 }
 0x96d   : > { %v3513_v48 = vadd.f32 %v3509_v54, %v3502_v39   ;;  %v3517_v8 = vadd.f32 (%p353_p0), %v3516_v55, %v3512_v6 }
 0x96f   : > { %v6793_v58 = vmov %v3513_v48  ;;  %v3522_v28 = vrot.slane (%p353_p0), %v3513_v48, 4  ;;  %v3518_v50 = vrot.slane (%p353_p0), %v3517_v8, 2 }
 0x970   : > { %v3498_v37 = vpop.f32.mrf.mxu3 }
 0x971   : > { %v3499_v47 = vadd.f32 %v3498_v37, %v3485_v7  ;;  %v3523_v35 = vadd.f32 (%p353_p0), %v3522_v28, %v3513_v48  ;;  %v3519_v34 = vadd.f32 (%p353_p0), %v3518_v50, %v3517_v8 }
 0x973   : > { %v3504_v51 = vadd.f32 %v3499_v47, %v6431_v57  ;;  %v6794_v57 = vmov %v3512_v6  ;;  %355 = sbr.rel (!%p353_p0) target bundleno = 350 (0x15e), region = 159  ;;  %v3524_v13 = vrot.slane (%p353_p0), %v3523_v35, 2  ;;  %v3520_v0 = vrot.slane (%p353_p0), %v3519_v34, 1 }
 0x974   :  { %v3528_v57 = vrot.slane (%p353_p0), %v3514_v41, 4 }
 0x975   : > { %v3515_v61 = vadd.f32 %v3509_v54, %v3504_v51   ;;  %v3525_v20 = vadd.f32 (%p353_p0), %v3524_v13, %v3523_v35  ;;  %v3521_v63 = vadd.f32 (%p353_p0), %v3520_v0, %v3519_v34 }
 0x976   :  { %v3529_v42 = vadd.f32 (%p353_p0), %v3528_v57, %v3514_v41 }
 0x977   : > { %v6791_v4 = vmov %v3515_v61  ;;  %v3534_v52 = vrot.slane (%p353_p0), %v3515_v61, 4  ;;  %v3526_v1 = vrot.slane (%p353_p0), %v3525_v20, 1  ;;  %v3547_v26 = vmul.f32 (%p353_p0), %v3546_v2, %v3521_v63 }
 0x978   :  { %v3530_v49 = vrot.slane %v3529_v42, 2 }
 0x979   :  { %v3535_v16 = vadd.f32 %v3534_v52, %v3515_v61  ;;  %v3527_v19 = vadd.f32 %v3526_v1, %v3525_v20 }
 0x97a   :  { %v3531_v18 = vadd.f32 %v3530_v49, %v3529_v42 }
 0x97b   :  { %v3536_v44 = vrot.slane %v3535_v16, 2  ;;  %v3548_v11 = vmul.f32 %v3546_v2, %v3527_v19 }
 0x97c   :  { %v3532_v14 = vrot.slane %v3531_v18, 1 }
 0x97d   :  { %v3537_v9 = vadd.f32 %v3536_v44, %v3535_v16  ;;  %v3555_v40 = vrot.slane %v3548_v11, 7 }
 0x97e   :  { %v3533_v31 = vadd.f32 %v3532_v14, %v3531_v18 }
 0x97f   :  { %v3538_v59 = vrot.slane %v3537_v9, 1  ;;  %v3558_v3 = vsel %vm3557_vm9, %v3547_v26, %v3555_v40 }
 0x980   :  { %v3549_v17 = vmul.f32 %v3546_v2, %v3533_v31  ;;  %3566 = vst.msk [vmem:[%s6787_s16] sm:$0x3] %vm3564_vm10, %v3558_v3 }
 0x981   :  { %v3539_v5 = vadd.f32 %v3538_v59, %v3537_v9 }
 0x983   :  { %v3550_v23 = vmul.f32 %v3546_v2, %v3539_v5 }
 0x985   :  { %v3556_v58 = vrot.slane %v3550_v23, 7 }
 0x987   :  { %v3559_v6 = vsel %vm3557_vm9, %v3549_v17, %v3556_v58 }
 0x988   :  { %3567 = vst.msk [vmem:[%s6787_s16 + $0x2] sm:$0x3] %vm3564_vm10, %v3559_v6 }
 0x989   :  { %3572 = vsyncpa [#allocation3], 1 }
 0x98a   :  { %3573 = vsyncpa [#allocation5], 1 }
 0x98b   :  { %3574 = vsyncpa [#allocation8], 1 }
 0x98c   :  { %3575 = vsyncpa [#allocation11], 1 }
 0x98d   :  { %3576 = vsyncpa [#allocation14], 1 }
 0x98e   :  { %3577 = vsyncpa [#allocation17], 1 }
 0x98f   :  { %3578 = vsyncpa [#allocation20], 1 }
 0x990   :  { %3579 = vsyncpa [#allocation23], 1 }

</bundles_post_ra>
